<compile_context>
chip_gen: v7x
topology: tpu7x:2x2x1
jax: 0.10.0
libtpu: 0.0.40
codegen_flags: <defaults>
</compile_context>

<pallas_src>
import functools
import math

import jax
import jax.numpy as jnp
from jax.experimental import pallas as pl
from jax.experimental.pallas import tpu as pltpu

_NEG_INF = -1e9


# ----------------------------------------------------------------------------
# Per-generation tuning (VMEM limit + default tiles)
# ----------------------------------------------------------------------------
def _detect_vmem_bytes():
    try:
        info = pltpu.get_tpu_info()
        cap = getattr(info, "vmem_capacity_bytes", None)
        if cap:
            return int(cap)
    except Exception:
        pass
    return 64 * 1024 * 1024          # conservative (v7x-sized) fallback

_VMEM_PHYS = _detect_vmem_bytes()
_VMEM_LIMIT = int(_VMEM_PHYS * 3 // 4)          # ~48 MiB on v7x, ~96 MiB on v5e/v6e
_BIG_VMEM = _VMEM_PHYS >= 100 * 1024 * 1024
_TM_DEFAULT = 512 if _BIG_VMEM else 256
_TN_DEFAULT = 512
_TK_DEFAULT = 1024 if _BIG_VMEM else 512


def _round_up(x, m):
    return ((x + m - 1) // m) * m


def _tile(dim, target, align):
    """Largest block size <= target that is an `align`-multiple divisor of dim (else full dim).

    Used only for well-shaped weight dims (N, K); the M axis is padded instead (see _plan_m)."""
    if dim <= target:
        return dim
    t = (target // align) * align
    while t >= align:
        if dim % t == 0:
            return t
        t -= align
    return dim


def _plan_m(m, target):
    """Return (tm, m_pad): tm divides m_pad; both multiples of 8. M is padded, never full-dim."""
    if m <= target:
        mp = _round_up(m, 8)
        return mp, mp
    tm = max((target // 8) * 8, 8)
    return tm, _round_up(m, tm)


def _pad_rows(a, m_pad):
    m = a.shape[0]
    if m_pad == m:
        return a
    return jnp.pad(a, ((0, m_pad - m),) + ((0, 0),) * (a.ndim - 1))


def _epilogue(y, act, scale, res_ref, ln, o_ref):
    """y is f32.  Optional activation, scale, residual-add and output LayerNorm, then store."""
    if act == "swish":
        y = y * jax.nn.sigmoid(y)
    elif act == "relu":
        y = jnp.maximum(y, 0.0)
    if scale != 1.0:
        y = y * scale
    if res_ref is not None:
        y = y + res_ref[...].astype(jnp.float32)
    if ln is not None:
        g_ref, b_ref, eps = ln
        mu = jnp.mean(y, axis=-1, keepdims=True)
        var = jnp.mean(jnp.square(y - mu), axis=-1, keepdims=True)
        y = (y - mu) * jax.lax.rsqrt(var + eps)
        y = y * g_ref[...].astype(jnp.float32) + b_ref[...].astype(jnp.float32)
    o_ref[...] = y.astype(o_ref.dtype)


# ----------------------------------------------------------------------------
# Tiled matmul kernel (bf16 MXU operands, f32 accumulator, fused epilogue incl. output LN)
# ----------------------------------------------------------------------------
def _matmul_kernel(x_ref, w_ref, b_ref, *rest, nk, act, has_res, has_ln, scale, eps):
    rest = list(rest)
    res_ref = rest.pop(0) if has_res else None
    if has_ln:
        lng_ref = rest.pop(0)
        lnb_ref = rest.pop(0)
        ln = (lng_ref, lnb_ref, eps)
    else:
        ln = None
    o_ref, acc_ref = rest

    @pl.when(pl.program_id(2) == 0)
    def _():
        acc_ref[...] = jnp.zeros_like(acc_ref)

    acc_ref[...] += jnp.dot(x_ref[...], w_ref[...], preferred_element_type=jnp.float32)

    @pl.when(pl.program_id(2) == nk - 1)
    def _():
        y = acc_ref[...] + b_ref[...]
        _epilogue(y, act, scale, res_ref, ln, o_ref)


def pl_linear(x, w, b=None, act="none", residual=None, scale=1.0, ln_out=None,
              out_dtype=jnp.bfloat16, eps=1e-5, tm=None, tn=None, tk=None):
    m, kdim = x.shape
    n = w.shape[1]
    tm = _TM_DEFAULT if tm is None else tm
    tn = _TN_DEFAULT if tn is None else tn
    tk = _TK_DEFAULT if tk is None else tk
    if b is None:
        b = jnp.zeros((n,), jnp.float32)

    x = x.astype(jnp.bfloat16)
    w = w.astype(jnp.bfloat16)
    b = b.astype(jnp.float32)

    tm, m_pad = _plan_m(m, tm)
    if ln_out is not None:
        tn = n                       # output LN needs the full feature row in one block
    else:
        tn = _tile(n, tn, 128)
    tk = _tile(kdim, tk, 128)
    nk = kdim // tk
    grid = (m_pad // tm, n // tn, nk)

    x = _pad_rows(x, m_pad)
    in_specs = [
        pl.BlockSpec((tm, tk), lambda i, j, k: (i, k)),
        pl.BlockSpec((tk, tn), lambda i, j, k: (k, j)),
        pl.BlockSpec((1, tn), lambda i, j, k: (0, j)),
    ]
    args = [x, w, b.reshape(1, n)]
    if residual is not None:
        in_specs.append(pl.BlockSpec((tm, tn), lambda i, j, k: (i, j)))
        args.append(_pad_rows(residual.astype(jnp.bfloat16), m_pad))
    if ln_out is not None:
        g, bb = ln_out
        in_specs.append(pl.BlockSpec((1, tn), lambda i, j, k: (0, j)))
        in_specs.append(pl.BlockSpec((1, tn), lambda i, j, k: (0, j)))
        args.append(g.reshape(1, n).astype(jnp.float32))
        args.append(bb.reshape(1, n).astype(jnp.float32))

    cost = pl.CostEstimate(
        flops=int(2 * m_pad * n * kdim),
        transcendentals=int(m_pad * n) if act == "swish" else 0,
        bytes_accessed=int(2 * (m_pad * kdim + kdim * n + m_pad * n)))

    out = pl.pallas_call(
        functools.partial(_matmul_kernel, nk=nk, act=act, has_res=residual is not None,
                          has_ln=ln_out is not None, scale=scale, eps=eps),
        grid=grid,
        in_specs=in_specs,
        out_specs=pl.BlockSpec((tm, tn), lambda i, j, k: (i, j)),
        out_shape=jax.ShapeDtypeStruct((m_pad, n), out_dtype),
        scratch_shapes=[pltpu.VMEM((tm, tn), jnp.float32)],
        compiler_params=pltpu.CompilerParams(
            dimension_semantics=("parallel", "parallel", "arbitrary"),
            vmem_limit_bytes=_VMEM_LIMIT),
        cost_estimate=cost,
    )(*args)
    return out[:m] if m_pad != m else out


# ----------------------------------------------------------------------------
# Fused LayerNorm -> matmul kernel.  LN result is cached in a bf16 VMEM scratch and reused for
# every N tile of the same row block (computed only when the N-grid index is 0).
# ----------------------------------------------------------------------------
def _ln_matmul_kernel(x_ref, g_ref, bln_ref, w_ref, b_ref, *rest, act, has_res, scale, eps):
    if has_res:
        res_ref, o_ref, xn_ref = rest
    else:
        o_ref, xn_ref = rest
        res_ref = None

    @pl.when(pl.program_id(1) == 0)
    def _():
        x = x_ref[...].astype(jnp.float32)
        mu = jnp.mean(x, axis=-1, keepdims=True)
        var = jnp.mean(jnp.square(x - mu), axis=-1, keepdims=True)
        xn = (x - mu) * jax.lax.rsqrt(var + eps)
        xn_ref[...] = (xn * g_ref[...] + bln_ref[...]).astype(xn_ref.dtype)

    y = jnp.dot(xn_ref[...], w_ref[...], preferred_element_type=jnp.float32) + b_ref[...]
    _epilogue(y, act, scale, res_ref, None, o_ref)


def pl_ln_linear(x, ln_g, ln_b, w, b=None, act="none", residual=None, scale=1.0,
                 eps=1e-5, out_dtype=jnp.bfloat16, tm=None, tn=None):
    m, kdim = x.shape
    n = w.shape[1]
    tm = _TM_DEFAULT if tm is None else tm
    tn = _TN_DEFAULT if tn is None else tn
    if b is None:
        b = jnp.zeros((n,), jnp.float32)

    x = x.astype(jnp.bfloat16)
    w = w.astype(jnp.bfloat16)
    tm, m_pad = _plan_m(m, tm)
    tn = _tile(n, tn, 128)
    grid = (m_pad // tm, n // tn)
    x = _pad_rows(x, m_pad)

    in_specs = [
        pl.BlockSpec((tm, kdim), lambda i, j: (i, 0)),
        pl.BlockSpec((1, kdim), lambda i, j: (0, 0)),
        pl.BlockSpec((1, kdim), lambda i, j: (0, 0)),
        pl.BlockSpec((kdim, tn), lambda i, j: (0, j)),
        pl.BlockSpec((1, tn), lambda i, j: (0, j)),
    ]
    args = [x, ln_g.reshape(1, kdim).astype(jnp.float32),
            ln_b.reshape(1, kdim).astype(jnp.float32),
            w, b.reshape(1, n).astype(jnp.float32)]
    if residual is not None:
        in_specs.append(pl.BlockSpec((tm, tn), lambda i, j: (i, j)))
        args.append(_pad_rows(residual.astype(jnp.bfloat16), m_pad))

    cost = pl.CostEstimate(
        flops=int(2 * m_pad * n * kdim),
        transcendentals=int(m_pad * n) if act == "swish" else 0,
        bytes_accessed=int(2 * (m_pad * kdim + kdim * n + m_pad * n)))

    out = pl.pallas_call(
        functools.partial(_ln_matmul_kernel, act=act,
                          has_res=residual is not None, scale=scale, eps=eps),
        grid=grid,
        in_specs=in_specs,
        out_specs=pl.BlockSpec((tm, tn), lambda i, j: (i, j)),
        out_shape=jax.ShapeDtypeStruct((m_pad, n), out_dtype),
        scratch_shapes=[pltpu.VMEM((tm, kdim), jnp.bfloat16)],
        compiler_params=pltpu.CompilerParams(
            dimension_semantics=("parallel", "arbitrary"),   # N axis sequential for LN caching
            vmem_limit_bytes=_VMEM_LIMIT),
        cost_estimate=cost,
    )(*args)
    return out[:m] if m_pad != m else out


# ----------------------------------------------------------------------------
# Fused LayerNorm -> pointwise conv -> GLU kernel (two weight slabs, cached LN, one store)
# ----------------------------------------------------------------------------
def _ln_glu_kernel(x_ref, g_ref, bln_ref, wa_ref, wg_ref, ba_ref, bg_ref, o_ref, xn_ref, *, eps):
    @pl.when(pl.program_id(1) == 0)
    def _():
        x = x_ref[...].astype(jnp.float32)
        mu = jnp.mean(x, axis=-1, keepdims=True)
        var = jnp.mean(jnp.square(x - mu), axis=-1, keepdims=True)
        xn = (x - mu) * jax.lax.rsqrt(var + eps)
        xn_ref[...] = (xn * g_ref[...] + bln_ref[...]).astype(xn_ref.dtype)

    xb = xn_ref[...]
    a = jnp.dot(xb, wa_ref[...], preferred_element_type=jnp.float32) + ba_ref[...]
    g = jnp.dot(xb, wg_ref[...], preferred_element_type=jnp.float32) + bg_ref[...]
    o_ref[...] = (a * jax.nn.sigmoid(g)).astype(o_ref.dtype)


def pl_ln_linear_glu(x, ln_g, ln_b, wa, wg, ba, bg, eps=1e-5, tm=None, tn=None):
    m, kdim = x.shape
    n = wa.shape[1]
    tm = _TM_DEFAULT if tm is None else tm
    tn = _TN_DEFAULT if tn is None else tn
    x = x.astype(jnp.bfloat16)
    wa = wa.astype(jnp.bfloat16)
    wg = wg.astype(jnp.bfloat16)
    tm, m_pad = _plan_m(m, tm)
    tn = _tile(n, tn, 128)
    grid = (m_pad // tm, n // tn)
    x = _pad_rows(x, m_pad)

    cost = pl.CostEstimate(
        flops=int(4 * m_pad * n * kdim),
        transcendentals=int(m_pad * n),
        bytes_accessed=int(2 * (m_pad * kdim + 2 * kdim * n + m_pad * n)))

    out = pl.pallas_call(
        functools.partial(_ln_glu_kernel, eps=eps),
        grid=grid,
        in_specs=[
            pl.BlockSpec((tm, kdim), lambda i, j: (i, 0)),
            pl.BlockSpec((1, kdim), lambda i, j: (0, 0)),
            pl.BlockSpec((1, kdim), lambda i, j: (0, 0)),
            pl.BlockSpec((kdim, tn), lambda i, j: (0, j)),
            pl.BlockSpec((kdim, tn), lambda i, j: (0, j)),
            pl.BlockSpec((1, tn), lambda i, j: (0, j)),
            pl.BlockSpec((1, tn), lambda i, j: (0, j)),
        ],
        out_specs=pl.BlockSpec((tm, tn), lambda i, j: (i, j)),
        out_shape=jax.ShapeDtypeStruct((m_pad, n), jnp.bfloat16),
        scratch_shapes=[pltpu.VMEM((tm, kdim), jnp.bfloat16)],
        compiler_params=pltpu.CompilerParams(
            dimension_semantics=("parallel", "arbitrary"),
            vmem_limit_bytes=_VMEM_LIMIT),
        cost_estimate=cost,
    )(x, ln_g.reshape(1, kdim).astype(jnp.float32), ln_b.reshape(1, kdim).astype(jnp.float32),
      wa, wg, ba.reshape(1, n).astype(jnp.float32), bg.reshape(1, n).astype(jnp.float32))
    return out[:m] if m_pad != m else out


# ----------------------------------------------------------------------------
# Depthwise conv1d + folded BatchNorm + Swish kernel (roll-based shifts, batch x channel grid)
# ----------------------------------------------------------------------------
def _dwconv_kernel(x_ref, w_ref, b_ref, s_ref, sh_ref, o_ref, *, k, t_out):
    x = x_ref[...].astype(jnp.float32)        # (Tpad_aligned, tc), zero padded
    tpad = x.shape[0]
    w = w_ref[...].astype(jnp.float32)        # (k, tc)
    acc = x * w[0:1, :]
    for i in range(1, k):
        # roll by (tpad - i) moves row t+i to row t; rows we consume (t < t_out,
        # t+i <= t_out+k-2 < tpad) never wrap, so no masking is needed.
        acc = acc + pltpu.roll(x, tpad - i, axis=0) * w[i:i + 1, :]
    y = acc[:t_out, :] + b_ref[...]
    y = y * s_ref[...] + sh_ref[...]          # folded inference BatchNorm
    o_ref[...] = (y * jax.nn.sigmoid(y)).astype(o_ref.dtype)


def pl_dwconv_bn_swish(x, dw_w, dw_b, bn_scale, bn_shift):
    b, t, c = x.shape
    k = dw_w.shape[0]
    pad = (k - 1) // 2
    tpad = t + 2 * pad
    tpad_aligned = _round_up(tpad, 8)
    x = x.astype(jnp.bfloat16)
    x_pad = jnp.pad(x, ((0, 0), (pad, pad + tpad_aligned - tpad), (0, 0)))
    tc = _tile(c, 512, 128)
    grid = (b, c // tc)
    return pl.pallas_call(
        functools.partial(_dwconv_kernel, k=k, t_out=t),
        grid=grid,
        in_specs=[
            pl.BlockSpec((None, tpad_aligned, tc), lambda i, j: (i, 0, j)),
            pl.BlockSpec((k, tc), lambda i, j: (0, j)),
            pl.BlockSpec((1, tc), lambda i, j: (0, j)),
            pl.BlockSpec((1, tc), lambda i, j: (0, j)),
            pl.BlockSpec((1, tc), lambda i, j: (0, j)),
        ],
        out_specs=pl.BlockSpec((None, t, tc), lambda i, j: (i, 0, j)),
        out_shape=jax.ShapeDtypeStruct((b, t, c), jnp.bfloat16),
        compiler_params=pltpu.CompilerParams(
            dimension_semantics=("parallel", "parallel"),
            vmem_limit_bytes=_VMEM_LIMIT),
    )(x_pad, dw_w, dw_b.reshape(1, c).astype(jnp.float32),
      bn_scale.reshape(1, c).astype(jnp.float32), bn_shift.reshape(1, c).astype(jnp.float32))


# ----------------------------------------------------------------------------
# Flash-style multi-head attention: grid = (batch, head, kv-tile), online softmax with m/l/acc
# scratch, padding/causal mask built in-kernel from scalar-prefetched key lengths.
# ----------------------------------------------------------------------------
def _mha_kernel(len_ref, q_ref, k_ref, v_ref, o_ref, m_ref, l_ref, acc_ref, *,
                scale, causal, tkv):
    b = pl.program_id(0)
    kv = pl.program_id(2)
    klen = len_ref[b]

    @pl.when(kv == 0)
    def _():
        m_ref[...] = jnp.full_like(m_ref, _NEG_INF)
        l_ref[...] = jnp.zeros_like(l_ref)
        acc_ref[...] = jnp.zeros_like(acc_ref)

    q = q_ref[...]                 # (Tq, dh) bf16
    k = k_ref[...]                 # (tkv, dh) bf16
    v = v_ref[...]                 # (tkv, dh) bf16
    tq = q.shape[0]

    col = kv * tkv + jax.lax.broadcasted_iota(jnp.int32, (tq, tkv), 1)
    valid = col < klen
    if causal:
        row = jax.lax.broadcasted_iota(jnp.int32, (tq, tkv), 0)
        valid = jnp.logical_and(valid, col <= row)

    s = jax.lax.dot_general(q, k, (((1,), (1,)), ((), ())),
                            preferred_element_type=jnp.float32) * scale
    s = jnp.where(valid, s, _NEG_INF)

    m_prev = m_ref[...]
    m_new = jnp.maximum(m_prev, jnp.max(s, axis=-1, keepdims=True))
    alpha = jnp.exp(m_prev - m_new)
    p = jnp.exp(s - m_new)
    l_ref[...] = alpha * l_ref[...] + jnp.sum(p, axis=-1, keepdims=True)
    acc_ref[...] = alpha * acc_ref[...] + jnp.dot(p.astype(jnp.bfloat16), v,
                                                  preferred_element_type=jnp.float32)
    m_ref[...] = m_new

    @pl.when(kv == pl.num_programs(2) - 1)
    def _():
        # exact division (not approximate reciprocal) for softmax normalization
        o_ref[...] = (acc_ref[...] / l_ref[...]).astype(o_ref.dtype)


def pl_mha(q, k, v, lengths, causal=False, tkv_target=512):
    """q: (B, H, Tq, dh), k/v: (B, H, Tk, dh), lengths: (B,) valid key lengths."""
    b, h, tq, dh = q.shape
    tk = k.shape[2]
    scale = 1.0 / math.sqrt(dh)

    if tk <= tkv_target:
        tkv, tk_pad = tk, tk
    else:
        tkv = tkv_target
        tk_pad = _round_up(tk, tkv)
    if tk_pad != tk:
        padw = ((0, 0), (0, 0), (0, tk_pad - tk), (0, 0))
        k = jnp.pad(k, padw)
        v = jnp.pad(v, padw)
    nkv = tk_pad // tkv

    q = q.astype(jnp.bfloat16)
    k = k.astype(jnp.bfloat16)
    v = v.astype(jnp.bfloat16)

    cost = pl.CostEstimate(
        flops=int(4 * b * h * tq * tk_pad * dh),
        transcendentals=int(b * h * tq * tk_pad),
        bytes_accessed=int(2 * b * h * (2 * tq * dh + 2 * tk_pad * dh)))

    grid_spec = pltpu.PrefetchScalarGridSpec(
        num_scalar_prefetch=1,
        grid=(b, h, nkv),
        in_specs=[
            pl.BlockSpec((None, None, tq, dh), lambda i, j, kv, L: (i, j, 0, 0)),
            pl.BlockSpec((None, None, tkv, dh), lambda i, j, kv, L: (i, j, kv, 0)),
            pl.BlockSpec((None, None, tkv, dh), lambda i, j, kv, L: (i, j, kv, 0)),
        ],
        out_specs=pl.BlockSpec((None, None, tq, dh), lambda i, j, kv, L: (i, j, 0, 0)),
        scratch_shapes=[pltpu.VMEM((tq, 1), jnp.float32),
                        pltpu.VMEM((tq, 1), jnp.float32),
                        pltpu.VMEM((tq, dh), jnp.float32)])

    return pl.pallas_call(
        functools.partial(_mha_kernel, scale=scale, causal=causal, tkv=tkv),
        grid_spec=grid_spec,
        out_shape=jax.ShapeDtypeStruct((b, h, tq, dh), jnp.bfloat16),
        compiler_params=pltpu.CompilerParams(
            dimension_semantics=("parallel", "parallel", "arbitrary"),
            vmem_limit_bytes=_VMEM_LIMIT),
        cost_estimate=cost,
    )(lengths.astype(jnp.int32), q, k, v)


# ----------------------------------------------------------------------------
# Model glue (plain JAX composing the Pallas kernels)
# ----------------------------------------------------------------------------
def self_attention_block(x2d, b, t, p, ln_g, ln_b, lengths, n_heads, causal=False):
    """Pre-LN MHSA with fused LN->QKV projection and fused residual output projection."""
    d = x2d.shape[1]
    dh = d // n_heads
    qkv = pl_ln_linear(x2d, ln_g, ln_b, p["w_qkv"], p["b_qkv"])
    qkv = qkv.reshape(b, t, 3, n_heads, dh).transpose(2, 0, 3, 1, 4)   # (3, B, H, T, dh)
    o = pl_mha(qkv[0], qkv[1], qkv[2], lengths, causal=causal)         # (B, H, T, dh)
    o = o.transpose(0, 2, 1, 3).reshape(b * t, d)
    return pl_linear(o, p["wo"], p["bo"], residual=x2d)


def cross_attention_block(x2d, b, u, enc2d, tp, p, ln_g, ln_b, enc_lengths, n_heads):
    d = x2d.shape[1]
    dh = d // n_heads
    q = pl_ln_linear(x2d, ln_g, ln_b, p["wq"], p["bq"])
    q = q.reshape(b, u, n_heads, dh).transpose(0, 2, 1, 3)
    kv = pl_linear(enc2d, p["w_kv"], p["b_kv"])
    kv = kv.reshape(b, tp, 2, n_heads, dh).transpose(2, 0, 3, 1, 4)
    o = pl_mha(q, kv[0], kv[1], enc_lengths, causal=False)
    o = o.transpose(0, 2, 1, 3).reshape(b * u, d)
    return pl_linear(o, p["wo"], p["bo"], residual=x2d)


def conformer_block(x2d, b, t, p, n_heads, lengths):
    d = x2d.shape[1]
    # FF1 (half-step residual): LN+Linear+Swish fused, then Linear + 0.5*scale + residual fused.
    h = pl_ln_linear(x2d, p["ff1"]["ln_g"], p["ff1"]["ln_b"],
                     p["ff1"]["w1"], p["ff1"]["b1"], act="swish")
    x2d = pl_linear(h, p["ff1"]["w2"], p["ff1"]["b2"], residual=x2d, scale=0.5)
    # MHSA.  TODO(synk): relative positional multi-head attention approximated with standard MHSA.
    x2d = self_attention_block(x2d, b, t, p["mhsa"], p["mhsa_ln_g"], p["mhsa_ln_b"],
                               lengths, n_heads)
    # Conv module: LN + pointwise conv + GLU fused, dwconv + BN + Swish fused, pw2 + residual fused.
    cp = p["conv"]
    h = pl_ln_linear_glu(x2d, cp["ln_g"], cp["ln_b"], cp["wa"], cp["wg"], cp["ba"], cp["bg"])
    h = pl_dwconv_bn_swish(h.reshape(b, t, d), cp["dw_w"], cp["dw_b"],
                           cp["bn_scale"], cp["bn_shift"])
    x2d = pl_linear(h.reshape(-1, d), cp["pw2_w"], cp["pw2_b"], residual=x2d)
    # FF2 (half-step residual) with the block-final LayerNorm fused into the same epilogue.
    h = pl_ln_linear(x2d, p["ff2"]["ln_g"], p["ff2"]["ln_b"],
                     p["ff2"]["w1"], p["ff2"]["b1"], act="swish")
    x2d = pl_linear(h, p["ff2"]["w2"], p["ff2"]["b2"], residual=x2d, scale=0.5,
                    ln_out=(p["ln_g"], p["ln_b"]))
    return x2d


def im2col(x, k, s):
    """x: (B, C, H, W) NCHW -> patches (B, Ho, Wo, C*k*k)."""
    b, c, h, w = x.shape
    ho = (h - k) // s + 1
    wo = (w - k) // s + 1
    cols = []
    for i in range(k):
        for j in range(k):
            cols.append(x[:, :, i:i + s * ho:s, j:j + s * wo:s])   # (B,C,Ho,Wo)
    p = jnp.stack(cols, axis=2)                                    # (B,C,k*k,Ho,Wo)
    p = p.transpose(0, 3, 4, 1, 2).reshape(b, ho, wo, c * k * k)
    return p


def conv2d_subsample(x, p):
    """x: (B, T, Dfeat) -> (B, T', C*D') (two stride-2 3x3 convs + ReLU, PyTorch NCHW)."""
    # TODO(synk): the 3x3 subsampling conv still uses an im2col patch tensor (now bf16) rather
    # than a fully fused 9-shifted-BlockSpec Pallas kernel.
    h = x.astype(jnp.bfloat16)[:, None, :, :]                      # (B,1,T,D) NCHW, bf16 patches

    def conv(h_nchw, w2, bias):
        patches = im2col(h_nchw, 3, 2)
        bb, ho, wo, pk = patches.shape
        cout = w2.shape[1]
        y = pl_linear(patches.reshape(-1, pk), w2, bias, act="relu")
        return y.reshape(bb, ho, wo, cout).transpose(0, 3, 1, 2)   # back to NCHW

    h = conv(h, p["conv1_w"], p["conv1_b"])
    h = conv(h, p["conv2_w"], p["conv2_b"])
    b2, c, tp, dp = h.shape
    return h.transpose(0, 2, 1, 3).reshape(b2, tp, c * dp)


def encoder_forward(params, inputs, input_lengths, cfg):
    d = cfg["encoder_dim"]
    h = conv2d_subsample(inputs, params["subsample"])
    b, tp, f = h.shape
    h2d = pl_linear(h.reshape(-1, f), params["in_proj_w"], params["in_proj_b"])
    # exact stride-2 3x3 conv length arithmetic applied twice: L -> (L-1)//2 -> ((L-1)//2 - 1)//2
    out_lengths = jnp.maximum(((input_lengths - 1) // 2 - 1) // 2, 1).astype(jnp.int32)
    for blk in params["blocks"]:
        h2d = conformer_block(h2d, b, tp, blk, cfg["n_heads"], out_lengths)
    return h2d.reshape(b, tp, d), out_lengths


def sinusoidal_pe(length, d):
    pos = jnp.arange(length, dtype=jnp.float32)[:, None]
    i = jnp.arange(d // 2, dtype=jnp.float32)[None, :]
    angle = pos / jnp.power(10000.0, 2.0 * i / d)
    pe = jnp.zeros((length, d), jnp.float32)
    pe = pe.at[:, 0::2].set(jnp.sin(angle))
    pe = pe.at[:, 1::2].set(jnp.cos(angle))
    return pe


def decoder_forward(params, enc_out, enc_lengths, targets, target_lengths, cfg):
    b, u = targets.shape
    d = cfg["decoder_dim"]
    tp = enc_out.shape[1]
    enc2d = enc_out.reshape(-1, d)
    x = jnp.take(params["embedding"], targets, axis=0) * math.sqrt(d) + sinusoidal_pe(u, d)[None]
    x2d = x.reshape(-1, d).astype(jnp.bfloat16)
    tgt_len = target_lengths.astype(jnp.int32)

    for lyr in params["layers"]:
        x2d = self_attention_block(x2d, b, u, lyr["self_attn"], lyr["ln1_g"], lyr["ln1_b"],
                                   tgt_len, cfg["n_heads"], causal=True)
        x2d = cross_attention_block(x2d, b, u, enc2d, tp, lyr["cross_attn"],
                                    lyr["ln2_g"], lyr["ln2_b"], enc_lengths, cfg["n_heads"])
        h = pl_ln_linear(x2d, lyr["ln3_g"], lyr["ln3_b"], lyr["ff_w1"], lyr["ff_b1"], act="relu")
        x2d = pl_linear(h, lyr["ff_w2"], lyr["ff_b2"], residual=x2d)

    logits = pl_ln_linear(x2d, params["ln_g"], params["ln_b"], params["out_w"], params["out_b"],
                          out_dtype=jnp.float32)
    return logits.reshape(b, u, cfg["n_classes"])


def conformer_forward(params, inputs, input_lengths, targets, target_lengths, cfg):
    # TODO(synk): teacher-forcing probability / autoregressive decode loop is host-side control
    # flow with no Pallas equivalent; forward uses full teacher forcing (training-style path).
    enc_out, enc_lengths = encoder_forward(params["encoder"], inputs, input_lengths, cfg)
    return decoder_forward(params["decoder"], enc_out, enc_lengths, targets, target_lengths, cfg)


# ----------------------------------------------------------------------------
# Deterministic parameter initialization (matmul weights stored once in bf16)
# ----------------------------------------------------------------------------
class KeyGen:
    def __init__(self, key):
        self.key = key

    def __call__(self):
        self.key, sub = jax.random.split(self.key)
        return sub


def dense_init(kg, din, dout):
    w = jax.random.normal(kg(), (din, dout), jnp.float32) * (1.0 / math.sqrt(din))
    return w.astype(jnp.bfloat16), jnp.zeros((dout,), jnp.float32)


def conv3x3_init(kg, cin, cout):
    w = jax.random.normal(kg(), (cout, cin, 3, 3), jnp.float32) * (1.0 / math.sqrt(cin * 9))
    # pre-reshaped to the (Cin*9, Cout) im2col layout, stored in bf16 once
    return w.reshape(cout, cin * 9).T.astype(jnp.bfloat16), jnp.zeros((cout,), jnp.float32)


def init_mha_self(kg, d):
    w_qkv, b_qkv = dense_init(kg, d, 3 * d)     # fused Q/K/V projection
    wo, bo = dense_init(kg, d, d)
    return {"w_qkv": w_qkv, "b_qkv": b_qkv, "wo": wo, "bo": bo}


def init_mha_cross(kg, d):
    wq, bq = dense_init(kg, d, d)
    w_kv, b_kv = dense_init(kg, d, 2 * d)       # fused K/V projection of encoder memory
    wo, bo = dense_init(kg, d, d)
    return {"wq": wq, "bq": bq, "w_kv": w_kv, "b_kv": b_kv, "wo": wo, "bo": bo}


def init_ff(kg, d, mult):
    w1, b1 = dense_init(kg, d, d * mult)
    w2, b2 = dense_init(kg, d * mult, d)
    return {"ln_g": jnp.ones((d,)), "ln_b": jnp.zeros((d,)),
            "w1": w1, "b1": b1, "w2": w2, "b2": b2}


def init_conv_module(kg, d, k):
    wa, ba = dense_init(kg, d, d)               # pointwise conv1, GLU "value" half
    wg, bg = dense_init(kg, d, d)               # pointwise conv1, GLU "gate" half
    pw2_w, pw2_b = dense_init(kg, d, d)
    dw_w = jax.random.normal(kg(), (k, d), jnp.float32) * (1.0 / math.sqrt(k))
    dw_b = jnp.zeros((d,), jnp.float32)
    eps = 1e-5
    gamma, beta = jnp.ones((d,)), jnp.zeros((d,))
    rm, rv = jnp.zeros((d,)), jnp.ones((d,))
    scale = gamma / jnp.sqrt(rv + eps)
    shift = beta - rm * scale
    return {"ln_g": jnp.ones((d,)), "ln_b": jnp.zeros((d,)),
            "wa": wa, "ba": ba, "wg": wg, "bg": bg,
            "pw2_w": pw2_w, "pw2_b": pw2_b,
            "dw_w": dw_w, "dw_b": dw_b, "bn_scale": scale, "bn_shift": shift}


def init_block(kg, cfg):
    d = cfg["encoder_dim"]
    return {"ff1": init_ff(kg, d, cfg["ffn_expansion"]),
            "mhsa_ln_g": jnp.ones((d,)), "mhsa_ln_b": jnp.zeros((d,)),
            "mhsa": init_mha_self(kg, d),
            "conv": init_conv_module(kg, d, cfg["kernel_size"]),
            "ff2": init_ff(kg, d, cfg["ffn_expansion"]),
            "ln_g": jnp.ones((d,)), "ln_b": jnp.zeros((d,))}


def init_encoder(kg, cfg):
    d, df = cfg["encoder_dim"], cfg["input_dim"]
    dp = ((df - 1) // 2 - 1) // 2
    c1w, c1b = conv3x3_init(kg, 1, d)
    c2w, c2b = conv3x3_init(kg, d, d)
    sub = {"conv1_w": c1w, "conv1_b": c1b, "conv2_w": c2w, "conv2_b": c2b}
    in_w, in_b = dense_init(kg, d * dp, d)
    return {"subsample": sub, "in_proj_w": in_w, "in_proj_b": in_b,
            "blocks": [init_block(kg, cfg) for _ in range(cfg["n_encoder_layers"])]}


def init_decoder(kg, cfg):
    d, v, dff = cfg["decoder_dim"], cfg["n_classes"], cfg["d_ff"]
    layers = []
    for _ in range(cfg["n_decoder_layers"]):
        w1, b1 = dense_init(kg, d, dff)
        w2, b2 = dense_init(kg, dff, d)
        layers.append({"ln1_g": jnp.ones((d,)), "ln1_b": jnp.zeros((d,)),
                       "self_attn": init_mha_self(kg, d),
                       "ln2_g": jnp.ones((d,)), "ln2_b": jnp.zeros((d,)),
                       "cross_attn": init_mha_cross(kg, d),
                       "ln3_g": jnp.ones((d,)), "ln3_b": jnp.zeros((d,)),
                       "ff_w1": w1, "ff_b1": b1, "ff_w2": w2, "ff_b2": b2})
    out_w, out_b = dense_init(kg, d, v)
    return {"embedding": jax.random.normal(kg(), (v, d), jnp.float32) * 0.02,
            "layers": layers, "ln_g": jnp.ones((d,)), "ln_b": jnp.zeros((d,)),
            "out_w": out_w, "out_b": out_b}


def init_params(cfg, kg):
    return {"encoder": init_encoder(kg, cfg), "decoder": init_decoder(kg, cfg)}


# ----------------------------------------------------------------------------
if __name__ == "__main__":
    cfg = dict(
        input_dim=16,        # feature dim (PyTorch default 80, shrunk)
        encoder_dim=32,      # PyTorch default 512
        decoder_dim=32,
        n_encoder_layers=2,  # PyTorch default 17
        n_decoder_layers=2,  # decoder default 6
        n_heads=4,
        ffn_expansion=4,
        conv_expansion=2,
        kernel_size=7,       # PyTorch default 31 (kept odd, "same" padding)
        d_ff=64,             # decoder FFN (PyTorch 2048)
        n_classes=16,
    )

    kg = KeyGen(jax.random.PRNGKey(0))
    params = init_params(cfg, kg)

    key = jax.random.PRNGKey(0)
    k_in, k_tgt = jax.random.split(key)
    B, T, U = 2, 32, 8
    inputs = jax.random.normal(k_in, (B, T, cfg["input_dim"]), jnp.float32)   # (batch, time, dim)
    input_lengths = jnp.array([32, 28], jnp.int32)
    targets = jax.random.randint(k_tgt, (B, U), 3, cfg["n_classes"])
    target_lengths = jnp.array([8, 6], jnp.int32)

    fwd = jax.jit(functools.partial(conformer_forward, cfg=cfg))
    logits = fwd(params, inputs, input_lengths, targets, target_lengths)
    logits = jax.block_until_ready(logits)
    assert logits.shape == (B, U, cfg["n_classes"])
    assert bool(jnp.all(jnp.isfinite(logits)))
    print("KERNEL_OK")
</pallas_src>

<mosaic_0001>
module attributes {stable_mosaic.version = 11 : i64} {
  func.func @_matmul_kernel(%arg0: i32, %arg1: i32, %arg2: i32, %arg3: memref<216x9xbf16, #tpu.memory_space<vmem>>, %arg4: memref<9x32xbf16, #tpu.memory_space<vmem>>, %arg5: memref<1x32xf32, #tpu.memory_space<vmem>>, %arg6: memref<216x32xbf16, #tpu.memory_space<vmem>>, %arg7: memref<216x32xf32, #tpu.memory_space<vmem>>) attributes {dimension_semantics = [#tpu.dimension_semantics<parallel>, #tpu.dimension_semantics<parallel>, #tpu.dimension_semantics<arbitrary>], iteration_bounds = array<i64: 1, 1, 1>, scalar_prefetch = 0 : i64, scratch_operands = 1 : i64, tpu.core_type = #tpu.core_type<tc>, window_params = [{transform_indices = @transform_0, window_bounds = array<i64: 216, 9>}, {transform_indices = @transform_1, window_bounds = array<i64: 9, 32>}, {transform_indices = @transform_2, window_bounds = array<i64: 1, 32>}, {transform_indices = @transform_3, window_bounds = array<i64: 216, 32>}]} {
    %c0_i32 = arith.constant 0 : i32
    %0 = arith.cmpi eq, %arg2, %c0_i32 : i32
    %1 = arith.extui %0 : i1 to i32
    %c0_i32_0 = arith.constant 0 : i32
    %2 = arith.cmpi ne, %1, %c0_i32_0 : i32
    scf.if %2 {
      %cst_10 = arith.constant 0.000000e+00 : f32
      %12 = vector.broadcast %cst_10 : f32 to vector<216x32xf32>
      %c0_11 = arith.constant 0 : index
      %c0_12 = arith.constant 0 : index
      %13 = vector.load %arg7[%c0_11, %c0_12] : memref<216x32xf32, #tpu.memory_space<vmem>>, vector<216x32xf32>
      tpu.vector_store %arg7[%c0_11, %c0_12], %12 {strides = array<i32>} : memref<216x32xf32, #tpu.memory_space<vmem>>, vector<216x32xf32>,
    } else {
    }
    %c0 = arith.constant 0 : index
    %c0_1 = arith.constant 0 : index
    %3 = vector.load %arg7[%c0, %c0_1] : memref<216x32xf32, #tpu.memory_space<vmem>>, vector<216x32xf32>
    %c0_2 = arith.constant 0 : index
    %c0_3 = arith.constant 0 : index
    %4 = vector.load %arg3[%c0_2, %c0_3] : memref<216x9xbf16, #tpu.memory_space<vmem>>, vector<216x9xbf16>
    %c0_4 = arith.constant 0 : index
    %c0_5 = arith.constant 0 : index
    %5 = vector.load %arg4[%c0_4, %c0_5] : memref<9x32xbf16, #tpu.memory_space<vmem>>, vector<9x32xbf16>
    %cst = arith.constant dense<0.000000e+00> : vector<216x32xf32>
    %6 = tpu.matmul %4, %5, %cst {dimension_numbers = #tpu.dot_dimension_numbers<[1], [0], [0], [1], [0, 0, 1, 1], [], []>} : vector<216x9xbf16>, vector<9x32xbf16>, vector<216x32xf32> -> vector<216x32xf32>
    %7 = arith.addf %3, %6 : vector<216x32xf32>
    %c0_6 = arith.constant 0 : index
    %c0_7 = arith.constant 0 : index
    %8 = vector.load %arg7[%c0_6, %c0_7] : memref<216x32xf32, #tpu.memory_space<vmem>>, vector<216x32xf32>
    tpu.vector_store %arg7[%c0_6, %c0_7], %7 {strides = array<i32>} : memref<216x32xf32, #tpu.memory_space<vmem>>, vector<216x32xf32>,
    %c0_i32_8 = arith.constant 0 : i32
    %9 = arith.cmpi eq, %arg2, %c0_i32_8 : i32
    %10 = arith.extui %9 : i1 to i32
    %c0_i32_9 = arith.constant 0 : i32
    %11 = arith.cmpi ne, %10, %c0_i32_9 : i32
    scf.if %11 {
      %c0_10 = arith.constant 0 : index
      %c0_11 = arith.constant 0 : index
      %12 = vector.load %arg7[%c0_10, %c0_11] : memref<216x32xf32, #tpu.memory_space<vmem>>, vector<216x32xf32>
      %c0_12 = arith.constant 0 : index
      %c0_13 = arith.constant 0 : index
      %13 = vector.load %arg5[%c0_12, %c0_13] : memref<1x32xf32, #tpu.memory_space<vmem>>, vector<1x32xf32>
      %14 = vector.broadcast %13 : vector<1x32xf32> to vector<216x32xf32>
      %15 = arith.addf %12, %14 : vector<216x32xf32>
      %cst_14 = arith.constant 0.000000e+00 : f32
      %16 = vector.broadcast %cst_14 : f32 to vector<216x32xf32>
      %17 = arith.maximumf %15, %16 : vector<216x32xf32>
      %18 = arith.truncf %17 : vector<216x32xf32> to vector<216x32xbf16>
      %c0_15 = arith.constant 0 : index
      %c0_16 = arith.constant 0 : index
      %19 = vector.load %arg6[%c0_15, %c0_16] : memref<216x32xbf16, #tpu.memory_space<vmem>>, vector<216x32xbf16>
      tpu.vector_store %arg6[%c0_15, %c0_16], %18 {strides = array<i32>} : memref<216x32xbf16, #tpu.memory_space<vmem>>, vector<216x32xbf16>,
    } else {
    }
    return
  }
  func.func @transform_0(%arg0: i32, %arg1: i32, %arg2: i32) -> (i32, i32) {
    %c0_i32 = arith.constant 0 : i32
    return %arg0, %arg2 : i32, i32
  }
  func.func @transform_1(%arg0: i32, %arg1: i32, %arg2: i32) -> (i32, i32) {
    %c0_i32 = arith.constant 0 : i32
    return %arg2, %arg1 : i32, i32
  }
  func.func @transform_2(%arg0: i32, %arg1: i32, %arg2: i32) -> (i32, i32) {
    %c0_i32 = arith.constant 0 : i32
    %c0_i32_0 = arith.constant 0 : i32
    return %c0_i32, %arg1 : i32, i32
  }
  func.func @transform_3(%arg0: i32, %arg1: i32, %arg2: i32) -> (i32, i32) {
    %c0_i32 = arith.constant 0 : i32
    return %arg0, %arg1 : i32, i32
  }
}

module attributes {stable_mosaic.version = 11 : i64} {
  func.func @_matmul_kernel(%arg0: i32, %arg1: i32, %arg2: i32, %arg3: memref<48x288xbf16, #tpu.memory_space<vmem>>, %arg4: memref<288x32xbf16, #tpu.memory_space<vmem>>, %arg5: memref<1x32xf32, #tpu.memory_space<vmem>>, %arg6: memref<48x32xbf16, #tpu.memory_space<vmem>>, %arg7: memref<48x32xf32, #tpu.memory_space<vmem>>) attributes {dimension_semantics = [#tpu.dimension_semantics<parallel>, #tpu.dimension_semantics<parallel>, #tpu.dimension_semantics<arbitrary>], iteration_bounds = array<i64: 1, 1, 1>, scalar_prefetch = 0 : i64, scratch_operands = 1 : i64, tpu.core_type = #tpu.core_type<tc>, window_params = [{transform_indices = @transform_0, window_bounds = array<i64: 48, 288>}, {transform_indices = @transform_1, window_bounds = array<i64: 288, 32>}, {transform_indices = @transform_2, window_bounds = array<i64: 1, 32>}, {transform_indices = @transform_3, window_bounds = array<i64: 48, 32>}]} {
    %c0_i32 = arith.constant 0 : i32
    %0 = arith.cmpi eq, %arg2, %c0_i32 : i32
    %1 = arith.extui %0 : i1 to i32
    %c0_i32_0 = arith.constant 0 : i32
    %2 = arith.cmpi ne, %1, %c0_i32_0 : i32
    scf.if %2 {
      %cst_10 = arith.constant 0.000000e+00 : f32
      %12 = vector.broadcast %cst_10 : f32 to vector<48x32xf32>
      %c0_11 = arith.constant 0 : index
      %c0_12 = arith.constant 0 : index
      %13 = vector.load %arg7[%c0_11, %c0_12] : memref<48x32xf32, #tpu.memory_space<vmem>>, vector<48x32xf32>
      tpu.vector_store %arg7[%c0_11, %c0_12], %12 {strides = array<i32>} : memref<48x32xf32, #tpu.memory_space<vmem>>, vector<48x32xf32>,
    } else {
    }
    %c0 = arith.constant 0 : index
    %c0_1 = arith.constant 0 : index
    %3 = vector.load %arg7[%c0, %c0_1] : memref<48x32xf32, #tpu.memory_space<vmem>>, vector<48x32xf32>
    %c0_2 = arith.constant 0 : index
    %c0_3 = arith.constant 0 : index
    %4 = vector.load %arg3[%c0_2, %c0_3] : memref<48x288xbf16, #tpu.memory_space<vmem>>, vector<48x288xbf16>
    %c0_4 = arith.constant 0 : index
    %c0_5 = arith.constant 0 : index
    %5 = vector.load %arg4[%c0_4, %c0_5] : memref<288x32xbf16, #tpu.memory_space<vmem>>, vector<288x32xbf16>
    %cst = arith.constant dense<0.000000e+00> : vector<48x32xf32>
    %6 = tpu.matmul %4, %5, %cst {dimension_numbers = #tpu.dot_dimension_numbers<[1], [0], [0], [1], [0, 0, 1, 1], [], []>} : vector<48x288xbf16>, vector<288x32xbf16>, vector<48x32xf32> -> vector<48x32xf32>
    %7 = arith.addf %3, %6 : vector<48x32xf32>
    %c0_6 = arith.constant 0 : index
    %c0_7 = arith.constant 0 : index
    %8 = vector.load %arg7[%c0_6, %c0_7] : memref<48x32xf32, #tpu.memory_space<vmem>>, vector<48x32xf32>
    tpu.vector_store %arg7[%c0_6, %c0_7], %7 {strides = array<i32>} : memref<48x32xf32, #tpu.memory_space<vmem>>, vector<48x32xf32>,
    %c0_i32_8 = arith.constant 0 : i32
    %9 = arith.cmpi eq, %arg2, %c0_i32_8 : i32
    %10 = arith.extui %9 : i1 to i32
    %c0_i32_9 = arith.constant 0 : i32
    %11 = arith.cmpi ne, %10, %c0_i32_9 : i32
    scf.if %11 {
      %c0_10 = arith.constant 0 : index
      %c0_11 = arith.constant 0 : index
      %12 = vector.load %arg7[%c0_10, %c0_11] : memref<48x32xf32, #tpu.memory_space<vmem>>, vector<48x32xf32>
      %c0_12 = arith.constant 0 : index
      %c0_13 = arith.constant 0 : index
      %13 = vector.load %arg5[%c0_12, %c0_13] : memref<1x32xf32, #tpu.memory_space<vmem>>, vector<1x32xf32>
      %14 = vector.broadcast %13 : vector<1x32xf32> to vector<48x32xf32>
      %15 = arith.addf %12, %14 : vector<48x32xf32>
      %cst_14 = arith.constant 0.000000e+00 : f32
      %16 = vector.broadcast %cst_14 : f32 to vector<48x32xf32>
      %17 = arith.maximumf %15, %16 : vector<48x32xf32>
      %18 = arith.truncf %17 : vector<48x32xf32> to vector<48x32xbf16>
      %c0_15 = arith.constant 0 : index
      %c0_16 = arith.constant 0 : index
      %19 = vector.load %arg6[%c0_15, %c0_16] : memref<48x32xbf16, #tpu.memory_space<vmem>>, vector<48x32xbf16>
      tpu.vector_store %arg6[%c0_15, %c0_16], %18 {strides = array<i32>} : memref<48x32xbf16, #tpu.memory_space<vmem>>, vector<48x32xbf16>,
    } else {
    }
    return
  }
  func.func @transform_0(%arg0: i32, %arg1: i32, %arg2: i32) -> (i32, i32) {
    %c0_i32 = arith.constant 0 : i32
    return %arg0, %arg2 : i32, i32
  }
  func.func @transform_1(%arg0: i32, %arg1: i32, %arg2: i32) -> (i32, i32) {
    %c0_i32 = arith.constant 0 : i32
    return %arg2, %arg1 : i32, i32
  }
  func.func @transform_2(%arg0: i32, %arg1: i32, %arg2: i32) -> (i32, i32) {
    %c0_i32 = arith.constant 0 : i32
    %c0_i32_0 = arith.constant 0 : i32
    return %c0_i32, %arg1 : i32, i32
  }
  func.func @transform_3(%arg0: i32, %arg1: i32, %arg2: i32) -> (i32, i32) {
    %c0_i32 = arith.constant 0 : i32
    return %arg0, %arg1 : i32, i32
  }
}

module attributes {stable_mosaic.version = 11 : i64} {
  func.func @_matmul_kernel(%arg0: i32, %arg1: i32, %arg2: i32, %arg3: memref<16x96xbf16, #tpu.memory_space<vmem>>, %arg4: memref<96x32xbf16, #tpu.memory_space<vmem>>, %arg5: memref<1x32xf32, #tpu.memory_space<vmem>>, %arg6: memref<16x32xbf16, #tpu.memory_space<vmem>>, %arg7: memref<16x32xf32, #tpu.memory_space<vmem>>) attributes {dimension_semantics = [#tpu.dimension_semantics<parallel>, #tpu.dimension_semantics<parallel>, #tpu.dimension_semantics<arbitrary>], iteration_bounds = array<i64: 1, 1, 1>, scalar_prefetch = 0 : i64, scratch_operands = 1 : i64, tpu.core_type = #tpu.core_type<tc>, window_params = [{transform_indices = @transform_0, window_bounds = array<i64: 16, 96>}, {transform_indices = @transform_1, window_bounds = array<i64: 96, 32>}, {transform_indices = @transform_2, window_bounds = array<i64: 1, 32>}, {transform_indices = @transform_3, window_bounds = array<i64: 16, 32>}]} {
    %c0_i32 = arith.constant 0 : i32
    %0 = arith.cmpi eq, %arg2, %c0_i32 : i32
    %1 = arith.extui %0 : i1 to i32
    %c0_i32_0 = arith.constant 0 : i32
    %2 = arith.cmpi ne, %1, %c0_i32_0 : i32
    scf.if %2 {
      %cst_10 = arith.constant 0.000000e+00 : f32
      %12 = vector.broadcast %cst_10 : f32 to vector<16x32xf32>
      %c0_11 = arith.constant 0 : index
      %c0_12 = arith.constant 0 : index
      %13 = vector.load %arg7[%c0_11, %c0_12] : memref<16x32xf32, #tpu.memory_space<vmem>>, vector<16x32xf32>
      tpu.vector_store %arg7[%c0_11, %c0_12], %12 {strides = array<i32>} : memref<16x32xf32, #tpu.memory_space<vmem>>, vector<16x32xf32>,
    } else {
    }
    %c0 = arith.constant 0 : index
    %c0_1 = arith.constant 0 : index
    %3 = vector.load %arg7[%c0, %c0_1] : memref<16x32xf32, #tpu.memory_space<vmem>>, vector<16x32xf32>
    %c0_2 = arith.constant 0 : index
    %c0_3 = arith.constant 0 : index
    %4 = vector.load %arg3[%c0_2, %c0_3] : memref<16x96xbf16, #tpu.memory_space<vmem>>, vector<16x96xbf16>
    %c0_4 = arith.constant 0 : index
    %c0_5 = arith.constant 0 : index
    %5 = vector.load %arg4[%c0_4, %c0_5] : memref<96x32xbf16, #tpu.memory_space<vmem>>, vector<96x32xbf16>
    %cst = arith.constant dense<0.000000e+00> : vector<16x32xf32>
    %6 = tpu.matmul %4, %5, %cst {dimension_numbers = #tpu.dot_dimension_numbers<[1], [0], [0], [1], [0, 0, 1, 1], [], []>} : vector<16x96xbf16>, vector<96x32xbf16>, vector<16x32xf32> -> vector<16x32xf32>
    %7 = arith.addf %3, %6 : vector<16x32xf32>
    %c0_6 = arith.constant 0 : index
    %c0_7 = arith.constant 0 : index
    %8 = vector.load %arg7[%c0_6, %c0_7] : memref<16x32xf32, #tpu.memory_space<vmem>>, vector<16x32xf32>
    tpu.vector_store %arg7[%c0_6, %c0_7], %7 {strides = array<i32>} : memref<16x32xf32, #tpu.memory_space<vmem>>, vector<16x32xf32>,
    %c0_i32_8 = arith.constant 0 : i32
    %9 = arith.cmpi eq, %arg2, %c0_i32_8 : i32
    %10 = arith.extui %9 : i1 to i32
    %c0_i32_9 = arith.constant 0 : i32
    %11 = arith.cmpi ne, %10, %c0_i32_9 : i32
    scf.if %11 {
      %c0_10 = arith.constant 0 : index
      %c0_11 = arith.constant 0 : index
      %12 = vector.load %arg7[%c0_10, %c0_11] : memref<16x32xf32, #tpu.memory_space<vmem>>, vector<16x32xf32>
      %c0_12 = arith.constant 0 : index
      %c0_13 = arith.constant 0 : index
      %13 = vector.load %arg5[%c0_12, %c0_13] : memref<1x32xf32, #tpu.memory_space<vmem>>, vector<1x32xf32>
      %14 = vector.broadcast %13 : vector<1x32xf32> to vector<16x32xf32>
      %15 = arith.addf %12, %14 : vector<16x32xf32>
      %16 = arith.truncf %15 : vector<16x32xf32> to vector<16x32xbf16>
      %c0_14 = arith.constant 0 : index
      %c0_15 = arith.constant 0 : index
      %17 = vector.load %arg6[%c0_14, %c0_15] : memref<16x32xbf16, #tpu.memory_space<vmem>>, vector<16x32xbf16>
      tpu.vector_store %arg6[%c0_14, %c0_15], %16 {strides = array<i32>} : memref<16x32xbf16, #tpu.memory_space<vmem>>, vector<16x32xbf16>,
    } else {
    }
    return
  }
  func.func @transform_0(%arg0: i32, %arg1: i32, %arg2: i32) -> (i32, i32) {
    %c0_i32 = arith.constant 0 : i32
    return %arg0, %arg2 : i32, i32
  }
  func.func @transform_1(%arg0: i32, %arg1: i32, %arg2: i32) -> (i32, i32) {
    %c0_i32 = arith.constant 0 : i32
    return %arg2, %arg1 : i32, i32
  }
  func.func @transform_2(%arg0: i32, %arg1: i32, %arg2: i32) -> (i32, i32) {
    %c0_i32 = arith.constant 0 : i32
    %c0_i32_0 = arith.constant 0 : i32
    return %c0_i32, %arg1 : i32, i32
  }
  func.func @transform_3(%arg0: i32, %arg1: i32, %arg2: i32) -> (i32, i32) {
    %c0_i32 = arith.constant 0 : i32
    return %arg0, %arg1 : i32, i32
  }
}

module attributes {stable_mosaic.version = 11 : i64} {
  func.func @_ln_matmul_kernel(%arg0: i32, %arg1: i32, %arg2: memref<16x32xbf16, #tpu.memory_space<vmem>>, %arg3: memref<1x32xf32, #tpu.memory_space<vmem>>, %arg4: memref<1x32xf32, #tpu.memory_space<vmem>>, %arg5: memref<32x128xbf16, #tpu.memory_space<vmem>>, %arg6: memref<1x128xf32, #tpu.memory_space<vmem>>, %arg7: memref<16x128xbf16, #tpu.memory_space<vmem>>, %arg8: memref<16x32xbf16, #tpu.memory_space<vmem>>) attributes {dimension_semantics = [#tpu.dimension_semantics<parallel>, #tpu.dimension_semantics<arbitrary>], iteration_bounds = array<i64: 1, 1>, scalar_prefetch = 0 : i64, scratch_operands = 1 : i64, tpu.core_type = #tpu.core_type<tc>, window_params = [{transform_indices = @transform_0, window_bounds = array<i64: 16, 32>}, {pipeline_mode = #tpu.pipeline_mode<synchronous>, transform_indices = @transform_1, window_bounds = array<i64: 1, 32>}, {pipeline_mode = #tpu.pipeline_mode<synchronous>, transform_indices = @transform_2, window_bounds = array<i64: 1, 32>}, {transform_indices = @transform_3, window_bounds = array<i64: 32, 128>}, {transform_indices = @transform_4, window_bounds = array<i64: 1, 128>}, {transform_indices = @transform_5, window_bounds = array<i64: 16, 128>}]} {
    %c0_i32 = arith.constant 0 : i32
    %0 = arith.cmpi eq, %arg1, %c0_i32 : i32
    %1 = arith.extui %0 : i1 to i32
    %c0_i32_0 = arith.constant 0 : i32
    %2 = arith.cmpi ne, %1, %c0_i32_0 : i32
    scf.if %2 {
      %c0_9 = arith.constant 0 : index
      %c0_10 = arith.constant 0 : index
      %17 = vector.load %arg2[%c0_9, %c0_10] : memref<16x32xbf16, #tpu.memory_space<vmem>>, vector<16x32xbf16>
      %18 = arith.extf %17 : vector<16x32xbf16> to vector<16x32xf32>
      %cst_11 = arith.constant dense<0.000000e+00> : vector<16xf32>
      %19 = vector.multi_reduction <add>, %18, %cst_11 [1] : vector<16x32xf32> to vector<16xf32>
      %20 = vector.shape_cast %19 : vector<16xf32> to vector<16x1xf32>
      %cst_12 = arith.constant 3.200000e+01 : f32
      %21 = vector.broadcast %cst_12 : f32 to vector<16x1xf32>
      %22 = arith.divf %20, %21 : vector<16x1xf32>
      %23 = vector.broadcast %22 : vector<16x1xf32> to vector<16x32xf32>
      %24 = arith.subf %18, %23 : vector<16x32xf32>
      %25 = arith.mulf %24, %24 : vector<16x32xf32>
      %cst_13 = arith.constant dense<0.000000e+00> : vector<16xf32>
      %26 = vector.multi_reduction <add>, %25, %cst_13 [1] : vector<16x32xf32> to vector<16xf32>
      %27 = vector.shape_cast %26 : vector<16xf32> to vector<16x1xf32>
      %cst_14 = arith.constant 3.200000e+01 : f32
      %28 = vector.broadcast %cst_14 : f32 to vector<16x1xf32>
      %29 = arith.divf %27, %28 : vector<16x1xf32>
      %30 = vector.broadcast %22 : vector<16x1xf32> to vector<16x32xf32>
      %31 = arith.subf %18, %30 : vector<16x32xf32>
      %cst_15 = arith.constant 9.99999974E-6 : f32
      %32 = vector.broadcast %cst_15 : f32 to vector<16x1xf32>
      %33 = arith.addf %29, %32 : vector<16x1xf32>
      %34 = math.rsqrt %33 : vector<16x1xf32>
      %35 = vector.broadcast %34 : vector<16x1xf32> to vector<16x32xf32>
      %36 = arith.mulf %31, %35 : vector<16x32xf32>
      %c0_16 = arith.constant 0 : index
      %c0_17 = arith.constant 0 : index
      %37 = vector.load %arg3[%c0_16, %c0_17] : memref<1x32xf32, #tpu.memory_space<vmem>>, vector<1x32xf32>
      %38 = vector.broadcast %37 : vector<1x32xf32> to vector<16x32xf32>
      %39 = arith.mulf %36, %38 : vector<16x32xf32>
      %c0_18 = arith.constant 0 : index
      %c0_19 = arith.constant 0 : index
      %40 = vector.load %arg4[%c0_18, %c0_19] : memref<1x32xf32, #tpu.memory_space<vmem>>, vector<1x32xf32>
      %41 = vector.broadcast %40 : vector<1x32xf32> to vector<16x32xf32>
      %42 = arith.addf %39, %41 : vector<16x32xf32>
      %43 = arith.truncf %42 : vector<16x32xf32> to vector<16x32xbf16>
      %c0_20 = arith.constant 0 : index
      %c0_21 = arith.constant 0 : index
      %44 = vector.load %arg8[%c0_20, %c0_21] : memref<16x32xbf16, #tpu.memory_space<vmem>>, vector<16x32xbf16>
      tpu.vector_store %arg8[%c0_20, %c0_21], %43 {strides = array<i32>} : memref<16x32xbf16, #tpu.memory_space<vmem>>, vector<16x32xbf16>,
    } else {
    }
    %c0 = arith.constant 0 : index
    %c0_1 = arith.constant 0 : index
    %3 = vector.load %arg8[%c0, %c0_1] : memref<16x32xbf16, #tpu.memory_space<vmem>>, vector<16x32xbf16>
    %c0_2 = arith.constant 0 : index
    %c0_3 = arith.constant 0 : index
    %4 = vector.load %arg5[%c0_2, %c0_3] : memref<32x128xbf16, #tpu.memory_space<vmem>>, vector<32x128xbf16>
    %cst = arith.constant dense<0.000000e+00> : vector<16x128xf32>
    %5 = tpu.matmul %3, %4, %cst {dimension_numbers = #tpu.dot_dimension_numbers<[1], [0], [0], [1], [0, 0, 1, 1], [], []>} : vector<16x32xbf16>, vector<32x128xbf16>, vector<16x128xf32> -> vector<16x128xf32>
    %c0_4 = arith.constant 0 : index
    %c0_5 = arith.constant 0 : index
    %6 = vector.load %arg6[%c0_4, %c0_5] : memref<1x128xf32, #tpu.memory_space<vmem>>, vector<1x128xf32>
    %7 = vector.broadcast %6 : vector<1x128xf32> to vector<16x128xf32>
    %8 = arith.addf %5, %7 : vector<16x128xf32>
    %9 = arith.negf %8 : vector<16x128xf32>
    %10 = math.exp %9 : vector<16x128xf32>
    %cst_6 = arith.constant 1.000000e+00 : f32
    %11 = vector.broadcast %cst_6 : f32 to vector<16x128xf32>
    %12 = arith.addf %11, %10 : vector<16x128xf32>
    %13 = arith.divf %11, %12 : vector<16x128xf32>
    %14 = arith.mulf %8, %13 : vector<16x128xf32>
    %15 = arith.truncf %14 : vector<16x128xf32> to vector<16x128xbf16>
    %c0_7 = arith.constant 0 : index
    %c0_8 = arith.constant 0 : index
    %16 = vector.load %arg7[%c0_7, %c0_8] : memref<16x128xbf16, #tpu.memory_space<vmem>>, vector<16x128xbf16>
    tpu.vector_store %arg7[%c0_7, %c0_8], %15 {strides = array<i32>} : memref<16x128xbf16, #tpu.memory_space<vmem>>, vector<16x128xbf16>,
    return
  }
  func.func @transform_0(%arg0: i32, %arg1: i32) -> (i32, i32) {
    %c0_i32 = arith.constant 0 : i32
    %c0_i32_0 = arith.constant 0 : i32
    return %arg0, %c0_i32 : i32, i32
  }
  func.func @transform_1(%arg0: i32, %arg1: i32) -> (i32, i32) {
    %c0_i32 = arith.constant 0 : i32
    %c0_i32_0 = arith.constant 0 : i32
    %c0_i32_1 = arith.constant 0 : i32
    return %c0_i32, %c0_i32_0 : i32, i32
  }
  func.func @transform_2(%arg0: i32, %arg1: i32) -> (i32, i32) {
    %c0_i32 = arith.constant 0 : i32
    %c0_i32_0 = arith.constant 0 : i32
    %c0_i32_1 = arith.constant 0 : i32
    return %c0_i32, %c0_i32_0 : i32, i32
  }
  func.func @transform_3(%arg0: i32, %arg1: i32) -> (i32, i32) {
    %c0_i32 = arith.constant 0 : i32
    %c0_i32_0 = arith.constant 0 : i32
    return %c0_i32, %arg1 : i32, i32
  }
  func.func @transform_4(%arg0: i32, %arg1: i32) -> (i32, i32) {
    %c0_i32 = arith.constant 0 : i32
    %c0_i32_0 = arith.constant 0 : i32
    return %c0_i32, %arg1 : i32, i32
  }
  func.func @transform_5(%arg0: i32, %arg1: i32) -> (i32, i32) {
    %c0_i32 = arith.constant 0 : i32
    return %arg0, %arg1 : i32, i32
  }
}

module attributes {stable_mosaic.version = 11 : i64} {
  func.func @_matmul_kernel(%arg0: i32, %arg1: i32, %arg2: i32, %arg3: memref<16x128xbf16, #tpu.memory_space<vmem>>, %arg4: memref<128x32xbf16, #tpu.memory_space<vmem>>, %arg5: memref<1x32xf32, #tpu.memory_space<vmem>>, %arg6: memref<16x32xbf16, #tpu.memory_space<vmem>>, %arg7: memref<16x32xbf16, #tpu.memory_space<vmem>>, %arg8: memref<16x32xf32, #tpu.memory_space<vmem>>) attributes {dimension_semantics = [#tpu.dimension_semantics<parallel>, #tpu.dimension_semantics<parallel>, #tpu.dimension_semantics<arbitrary>], iteration_bounds = array<i64: 1, 1, 1>, scalar_prefetch = 0 : i64, scratch_operands = 1 : i64, tpu.core_type = #tpu.core_type<tc>, window_params = [{transform_indices = @transform_0, window_bounds = array<i64: 16, 128>}, {transform_indices = @transform_1, window_bounds = array<i64: 128, 32>}, {transform_indices = @transform_2, window_bounds = array<i64: 1, 32>}, {transform_indices = @transform_3, window_bounds = array<i64: 16, 32>}, {transform_indices = @transform_4, window_bounds = array<i64: 16, 32>}]} {
    %c0_i32 = arith.constant 0 : i32
    %0 = arith.cmpi eq, %arg2, %c0_i32 : i32
    %1 = arith.extui %0 : i1 to i32
    %c0_i32_0 = arith.constant 0 : i32
    %2 = arith.cmpi ne, %1, %c0_i32_0 : i32
    scf.if %2 {
      %cst_10 = arith.constant 0.000000e+00 : f32
      %12 = vector.broadcast %cst_10 : f32 to vector<16x32xf32>
      %c0_11 = arith.constant 0 : index
      %c0_12 = arith.constant 0 : index
      %13 = vector.load %arg8[%c0_11, %c0_12] : memref<16x32xf32, #tpu.memory_space<vmem>>, vector<16x32xf32>
      tpu.vector_store %arg8[%c0_11, %c0_12], %12 {strides = array<i32>} : memref<16x32xf32, #tpu.memory_space<vmem>>, vector<16x32xf32>,
    } else {
    }
    %c0 = arith.constant 0 : index
    %c0_1 = arith.constant 0 : index
    %3 = vector.load %arg8[%c0, %c0_1] : memref<16x32xf32, #tpu.memory_space<vmem>>, vector<16x32xf32>
    %c0_2 = arith.constant 0 : index
    %c0_3 = arith.constant 0 : index
    %4 = vector.load %arg3[%c0_2, %c0_3] : memref<16x128xbf16, #tpu.memory_space<vmem>>, vector<16x128xbf16>
    %c0_4 = arith.constant 0 : index
    %c0_5 = arith.constant 0 : index
    %5 = vector.load %arg4[%c0_4, %c0_5] : memref<128x32xbf16, #tpu.memory_space<vmem>>, vector<128x32xbf16>
    %cst = arith.constant dense<0.000000e+00> : vector<16x32xf32>
    %6 = tpu.matmul %4, %5, %cst {dimension_numbers = #tpu.dot_dimension_numbers<[1], [0], [0], [1], [0, 0, 1, 1], [], []>} : vector<16x128xbf16>, vector<128x32xbf16>, vector<16x32xf32> -> vector<16x32xf32>
    %7 = arith.addf %3, %6 : vector<16x32xf32>
    %c0_6 = arith.constant 0 : index
    %c0_7 = arith.constant 0 : index
    %8 = vector.load %arg8[%c0_6, %c0_7] : memref<16x32xf32, #tpu.memory_space<vmem>>, vector<16x32xf32>
    tpu.vector_store %arg8[%c0_6, %c0_7], %7 {strides = array<i32>} : memref<16x32xf32, #tpu.memory_space<vmem>>, vector<16x32xf32>,
    %c0_i32_8 = arith.constant 0 : i32
    %9 = arith.cmpi eq, %arg2, %c0_i32_8 : i32
    %10 = arith.extui %9 : i1 to i32
    %c0_i32_9 = arith.constant 0 : i32
    %11 = arith.cmpi ne, %10, %c0_i32_9 : i32
    scf.if %11 {
      %c0_10 = arith.constant 0 : index
      %c0_11 = arith.constant 0 : index
      %12 = vector.load %arg8[%c0_10, %c0_11] : memref<16x32xf32, #tpu.memory_space<vmem>>, vector<16x32xf32>
      %c0_12 = arith.constant 0 : index
      %c0_13 = arith.constant 0 : index
      %13 = vector.load %arg5[%c0_12, %c0_13] : memref<1x32xf32, #tpu.memory_space<vmem>>, vector<1x32xf32>
      %14 = vector.broadcast %13 : vector<1x32xf32> to vector<16x32xf32>
      %15 = arith.addf %12, %14 : vector<16x32xf32>
      %cst_14 = arith.constant 5.000000e-01 : f32
      %16 = vector.broadcast %cst_14 : f32 to vector<16x32xf32>
      %17 = arith.mulf %15, %16 : vector<16x32xf32>
      %c0_15 = arith.constant 0 : index
      %c0_16 = arith.constant 0 : index
      %18 = vector.load %arg6[%c0_15, %c0_16] : memref<16x32xbf16, #tpu.memory_space<vmem>>, vector<16x32xbf16>
      %19 = arith.extf %18 : vector<16x32xbf16> to vector<16x32xf32>
      %20 = arith.addf %17, %19 : vector<16x32xf32>
      %21 = arith.truncf %20 : vector<16x32xf32> to vector<16x32xbf16>
      %c0_17 = arith.constant 0 : index
      %c0_18 = arith.constant 0 : index
      %22 = vector.load %arg7[%c0_17, %c0_18] : memref<16x32xbf16, #tpu.memory_space<vmem>>, vector<16x32xbf16>
      tpu.vector_store %arg7[%c0_17, %c0_18], %21 {strides = array<i32>} : memref<16x32xbf16, #tpu.memory_space<vmem>>, vector<16x32xbf16>,
    } else {
    }
    return
  }
  func.func @transform_0(%arg0: i32, %arg1: i32, %arg2: i32) -> (i32, i32) {
    %c0_i32 = arith.constant 0 : i32
    return %arg0, %arg2 : i32, i32
  }
  func.func @transform_1(%arg0: i32, %arg1: i32, %arg2: i32) -> (i32, i32) {
    %c0_i32 = arith.constant 0 : i32
    return %arg2, %arg1 : i32, i32
  }
  func.func @transform_2(%arg0: i32, %arg1: i32, %arg2: i32) -> (i32, i32) {
    %c0_i32 = arith.constant 0 : i32
    %c0_i32_0 = arith.constant 0 : i32
    return %c0_i32, %arg1 : i32, i32
  }
  func.func @transform_3(%arg0: i32, %arg1: i32, %arg2: i32) -> (i32, i32) {
    %c0_i32 = arith.constant 0 : i32
    return %arg0, %arg1 : i32, i32
  }
  func.func @transform_4(%arg0: i32, %arg1: i32, %arg2: i32) -> (i32, i32) {
    %c0_i32 = arith.constant 0 : i32
    return %arg0, %arg1 : i32, i32
  }
}

module attributes {stable_mosaic.version = 11 : i64} {
  func.func @_ln_matmul_kernel(%arg0: i32, %arg1: i32, %arg2: memref<16x32xbf16, #tpu.memory_space<vmem>>, %arg3: memref<1x32xf32, #tpu.memory_space<vmem>>, %arg4: memref<1x32xf32, #tpu.memory_space<vmem>>, %arg5: memref<32x96xbf16, #tpu.memory_space<vmem>>, %arg6: memref<1x96xf32, #tpu.memory_space<vmem>>, %arg7: memref<16x96xbf16, #tpu.memory_space<vmem>>, %arg8: memref<16x32xbf16, #tpu.memory_space<vmem>>) attributes {dimension_semantics = [#tpu.dimension_semantics<parallel>, #tpu.dimension_semantics<arbitrary>], iteration_bounds = array<i64: 1, 1>, scalar_prefetch = 0 : i64, scratch_operands = 1 : i64, tpu.core_type = #tpu.core_type<tc>, window_params = [{transform_indices = @transform_0, window_bounds = array<i64: 16, 32>}, {pipeline_mode = #tpu.pipeline_mode<synchronous>, transform_indices = @transform_1, window_bounds = array<i64: 1, 32>}, {pipeline_mode = #tpu.pipeline_mode<synchronous>, transform_indices = @transform_2, window_bounds = array<i64: 1, 32>}, {transform_indices = @transform_3, window_bounds = array<i64: 32, 96>}, {transform_indices = @transform_4, window_bounds = array<i64: 1, 96>}, {transform_indices = @transform_5, window_bounds = array<i64: 16, 96>}]} {
    %c0_i32 = arith.constant 0 : i32
    %0 = arith.cmpi eq, %arg1, %c0_i32 : i32
    %1 = arith.extui %0 : i1 to i32
    %c0_i32_0 = arith.constant 0 : i32
    %2 = arith.cmpi ne, %1, %c0_i32_0 : i32
    scf.if %2 {
      %c0_8 = arith.constant 0 : index
      %c0_9 = arith.constant 0 : index
      %11 = vector.load %arg2[%c0_8, %c0_9] : memref<16x32xbf16, #tpu.memory_space<vmem>>, vector<16x32xbf16>
      %12 = arith.extf %11 : vector<16x32xbf16> to vector<16x32xf32>
      %cst_10 = arith.constant dense<0.000000e+00> : vector<16xf32>
      %13 = vector.multi_reduction <add>, %12, %cst_10 [1] : vector<16x32xf32> to vector<16xf32>
      %14 = vector.shape_cast %13 : vector<16xf32> to vector<16x1xf32>
      %cst_11 = arith.constant 3.200000e+01 : f32
      %15 = vector.broadcast %cst_11 : f32 to vector<16x1xf32>
      %16 = arith.divf %14, %15 : vector<16x1xf32>
      %17 = vector.broadcast %16 : vector<16x1xf32> to vector<16x32xf32>
      %18 = arith.subf %12, %17 : vector<16x32xf32>
      %19 = arith.mulf %18, %18 : vector<16x32xf32>
      %cst_12 = arith.constant dense<0.000000e+00> : vector<16xf32>
      %20 = vector.multi_reduction <add>, %19, %cst_12 [1] : vector<16x32xf32> to vector<16xf32>
      %21 = vector.shape_cast %20 : vector<16xf32> to vector<16x1xf32>
      %cst_13 = arith.constant 3.200000e+01 : f32
      %22 = vector.broadcast %cst_13 : f32 to vector<16x1xf32>
      %23 = arith.divf %21, %22 : vector<16x1xf32>
      %24 = vector.broadcast %16 : vector<16x1xf32> to vector<16x32xf32>
      %25 = arith.subf %12, %24 : vector<16x32xf32>
      %cst_14 = arith.constant 9.99999974E-6 : f32
      %26 = vector.broadcast %cst_14 : f32 to vector<16x1xf32>
      %27 = arith.addf %23, %26 : vector<16x1xf32>
      %28 = math.rsqrt %27 : vector<16x1xf32>
      %29 = vector.broadcast %28 : vector<16x1xf32> to vector<16x32xf32>
      %30 = arith.mulf %25, %29 : vector<16x32xf32>
      %c0_15 = arith.constant 0 : index
      %c0_16 = arith.constant 0 : index
      %31 = vector.load %arg3[%c0_15, %c0_16] : memref<1x32xf32, #tpu.memory_space<vmem>>, vector<1x32xf32>
      %32 = vector.broadcast %31 : vector<1x32xf32> to vector<16x32xf32>
      %33 = arith.mulf %30, %32 : vector<16x32xf32>
      %c0_17 = arith.constant 0 : index
      %c0_18 = arith.constant 0 : index
      %34 = vector.load %arg4[%c0_17, %c0_18] : memref<1x32xf32, #tpu.memory_space<vmem>>, vector<1x32xf32>
      %35 = vector.broadcast %34 : vector<1x32xf32> to vector<16x32xf32>
      %36 = arith.addf %33, %35 : vector<16x32xf32>
      %37 = arith.truncf %36 : vector<16x32xf32> to vector<16x32xbf16>
      %c0_19 = arith.constant 0 : index
      %c0_20 = arith.constant 0 : index
      %38 = vector.load %arg8[%c0_19, %c0_20] : memref<16x32xbf16, #tpu.memory_space<vmem>>, vector<16x32xbf16>
      tpu.vector_store %arg8[%c0_19, %c0_20], %37 {strides = array<i32>} : memref<16x32xbf16, #tpu.memory_space<vmem>>, vector<16x32xbf16>,
    } else {
    }
    %c0 = arith.constant 0 : index
    %c0_1 = arith.constant 0 : index
    %3 = vector.load %arg8[%c0, %c0_1] : memref<16x32xbf16, #tpu.memory_space<vmem>>, vector<16x32xbf16>
    %c0_2 = arith.constant 0 : index
    %c0_3 = arith.constant 0 : index
    %4 = vector.load %arg5[%c0_2, %c0_3] : memref<32x96xbf16, #tpu.memory_space<vmem>>, vector<32x96xbf16>
    %cst = arith.constant dense<0.000000e+00> : vector<16x96xf32>
    %5 = tpu.matmul %3, %4, %cst {dimension_numbers = #tpu.dot_dimension_numbers<[1], [0], [0], [1], [0, 0, 1, 1], [], []>} : vector<16x32xbf16>, vector<32x96xbf16>, vector<16x96xf32> -> vector<16x96xf32>
    %c0_4 = arith.constant 0 : index
    %c0_5 = arith.constant 0 : index
    %6 = vector.load %arg6[%c0_4, %c0_5] : memref<1x96xf32, #tpu.memory_space<vmem>>, vector<1x96xf32>
    %7 = vector.broadcast %6 : vector<1x96xf32> to vector<16x96xf32>
    %8 = arith.addf %5, %7 : vector<16x96xf32>
    %9 = arith.truncf %8 : vector<16x96xf32> to vector<16x96xbf16>
    %c0_6 = arith.constant 0 : index
    %c0_7 = arith.constant 0 : index
    %10 = vector.load %arg7[%c0_6, %c0_7] : memref<16x96xbf16, #tpu.memory_space<vmem>>, vector<16x96xbf16>
    tpu.vector_store %arg7[%c0_6, %c0_7], %9 {strides = array<i32>} : memref<16x96xbf16, #tpu.memory_space<vmem>>, vector<16x96xbf16>,
    return
  }
  func.func @transform_0(%arg0: i32, %arg1: i32) -> (i32, i32) {
    %c0_i32 = arith.constant 0 : i32
    %c0_i32_0 = arith.constant 0 : i32
    return %arg0, %c0_i32 : i32, i32
  }
  func.func @transform_1(%arg0: i32, %arg1: i32) -> (i32, i32) {
    %c0_i32 = arith.constant 0 : i32
    %c0_i32_0 = arith.constant 0 : i32
    %c0_i32_1 = arith.constant 0 : i32
    return %c0_i32, %c0_i32_0 : i32, i32
  }
  func.func @transform_2(%arg0: i32, %arg1: i32) -> (i32, i32) {
    %c0_i32 = arith.constant 0 : i32
    %c0_i32_0 = arith.constant 0 : i32
    %c0_i32_1 = arith.constant 0 : i32
    return %c0_i32, %c0_i32_0 : i32, i32
  }
  func.func @transform_3(%arg0: i32, %arg1: i32) -> (i32, i32) {
    %c0_i32 = arith.constant 0 : i32
    %c0_i32_0 = arith.constant 0 : i32
    return %c0_i32, %arg1 : i32, i32
  }
  func.func @transform_4(%arg0: i32, %arg1: i32) -> (i32, i32) {
    %c0_i32 = arith.constant 0 : i32
    %c0_i32_0 = arith.constant 0 : i32
    return %c0_i32, %arg1 : i32, i32
  }
  func.func @transform_5(%arg0: i32, %arg1: i32) -> (i32, i32) {
    %c0_i32 = arith.constant 0 : i32
    return %arg0, %arg1 : i32, i32
  }
}

module attributes {stable_mosaic.version = 11 : i64} {
  func.func @_mha_kernel(%arg0: i32, %arg1: i32, %arg2: i32, %arg3: memref<2xi32, #tpu.memory_space<smem>>, %arg4: memref<1x1x7x8xbf16, #tpu.memory_space<vmem>>, %arg5: memref<1x1x7x8xbf16, #tpu.memory_space<vmem>>, %arg6: memref<1x1x7x8xbf16, #tpu.memory_space<vmem>>, %arg7: memref<1x1x7x8xbf16, #tpu.memory_space<vmem>>, %arg8: memref<7x1xf32, #tpu.memory_space<vmem>>, %arg9: memref<7x1xf32, #tpu.memory_space<vmem>>, %arg10: memref<7x8xf32, #tpu.memory_space<vmem>>) attributes {dimension_semantics = [#tpu.dimension_semantics<parallel>, #tpu.dimension_semantics<parallel>, #tpu.dimension_semantics<arbitrary>], iteration_bounds = array<i64: 2, 4, 1>, scalar_prefetch = 1 : i64, scratch_operands = 3 : i64, tpu.core_type = #tpu.core_type<tc>, window_params = [{transform_indices = @transform_0, window_bounds = array<i64: 1, 1, 7, 8>}, {transform_indices = @transform_1, window_bounds = array<i64: 1, 1, 7, 8>}, {transform_indices = @transform_2, window_bounds = array<i64: 1, 1, 7, 8>}, {transform_indices = @transform_3, window_bounds = array<i64: 1, 1, 7, 8>}]} {
    %0 = arith.index_cast %arg0 : i32 to index
    %1 = memref.load %arg3[%0] : memref<2xi32, #tpu.memory_space<smem>>
    %c0_i32 = arith.constant 0 : i32
    %2 = arith.cmpi eq, %arg2, %c0_i32 : i32
    %3 = arith.extui %2 : i1 to i32
    %c0_i32_0 = arith.constant 0 : i32
    %4 = arith.cmpi ne, %3, %c0_i32_0 : i32
    scf.if %4 {
      %cst_31 = arith.constant -1.000000e+09 : f32
      %48 = vector.broadcast %cst_31 : f32 to vector<7x1xf32>
      %c0_32 = arith.constant 0 : index
      %c0_33 = arith.constant 0 : index
      %49 = vector.load %arg8[%c0_32, %c0_33] : memref<7x1xf32, #tpu.memory_space<vmem>>, vector<7x1xf32>
      tpu.vector_store %arg8[%c0_32, %c0_33], %48 {strides = array<i32>} : memref<7x1xf32, #tpu.memory_space<vmem>>, vector<7x1xf32>,
      %cst_34 = arith.constant 0.000000e+00 : f32
      %50 = vector.broadcast %cst_34 : f32 to vector<7x1xf32>
      %c0_35 = arith.constant 0 : index
      %c0_36 = arith.constant 0 : index
      %51 = vector.load %arg9[%c0_35, %c0_36] : memref<7x1xf32, #tpu.memory_space<vmem>>, vector<7x1xf32>
      tpu.vector_store %arg9[%c0_35, %c0_36], %50 {strides = array<i32>} : memref<7x1xf32, #tpu.memory_space<vmem>>, vector<7x1xf32>,
      %cst_37 = arith.constant 0.000000e+00 : f32
      %52 = vector.broadcast %cst_37 : f32 to vector<7x8xf32>
      %c0_38 = arith.constant 0 : index
      %c0_39 = arith.constant 0 : index
      %53 = vector.load %arg10[%c0_38, %c0_39] : memref<7x8xf32, #tpu.memory_space<vmem>>, vector<7x8xf32>
      tpu.vector_store %arg10[%c0_38, %c0_39], %52 {strides = array<i32>} : memref<7x8xf32, #tpu.memory_space<vmem>>, vector<7x8xf32>,
    } else {
    }
    %c0 = arith.constant 0 : index
    %c0_1 = arith.constant 0 : index
    %c0_2 = arith.constant 0 : index
    %c0_3 = arith.constant 0 : index
    %5 = vector.load %arg4[%c0, %c0_1, %c0_2, %c0_3] : memref<1x1x7x8xbf16, #tpu.memory_space<vmem>>, vector<1x1x7x8xbf16>
    %6 = vector.shape_cast %5 : vector<1x1x7x8xbf16> to vector<7x8xbf16>
    %c0_4 = arith.constant 0 : index
    %c0_5 = arith.constant 0 : index
    %c0_6 = arith.constant 0 : index
    %c0_7 = arith.constant 0 : index
    %7 = vector.load %arg5[%c0_4, %c0_5, %c0_6, %c0_7] : memref<1x1x7x8xbf16, #tpu.memory_space<vmem>>, vector<1x1x7x8xbf16>
    %8 = vector.shape_cast %7 : vector<1x1x7x8xbf16> to vector<7x8xbf16>
    %c0_8 = arith.constant 0 : index
    %c0_9 = arith.constant 0 : index
    %c0_10 = arith.constant 0 : index
    %c0_11 = arith.constant 0 : index
    %9 = vector.load %arg6[%c0_8, %c0_9, %c0_10, %c0_11] : memref<1x1x7x8xbf16, #tpu.memory_space<vmem>>, vector<1x1x7x8xbf16>
    %10 = vector.shape_cast %9 : vector<1x1x7x8xbf16> to vector<7x8xbf16>
    %c7_i32 = arith.constant 7 : i32
    %11 = arith.muli %arg2, %c7_i32 : i32
    %12 = tpu.iota {dimensions = array<i32: 1>} : vector<7x7xi32>
    %13 = vector.broadcast %11 : i32 to vector<7x7xi32>
    %14 = arith.addi %13, %12 : vector<7x7xi32>
    %15 = vector.broadcast %1 : i32 to vector<7x7xi32>
    %16 = arith.cmpi slt, %14, %15 : vector<7x7xi32>
    %cst = arith.constant dense<0.000000e+00> : vector<7x7xf32>
    %17 = tpu.matmul %6, %8, %cst {dimension_numbers = #tpu.dot_dimension_numbers<[1], [1], [0], [0], [0, 0, 1, 0], [], []>} : vector<7x8xbf16>, vector<7x8xbf16>, vector<7x7xf32> -> vector<7x7xf32>
    %cst_12 = arith.constant 0.353553385 : f32
    %18 = vector.broadcast %cst_12 : f32 to vector<7x7xf32>
    %19 = arith.mulf %17, %18 : vector<7x7xf32>
    %cst_13 = arith.constant -1.000000e+09 : f32
    %20 = vector.broadcast %cst_13 : f32 to vector<7x7xf32>
    %21 = arith.select %16, %19, %20 : vector<7x7xi1>, vector<7x7xf32>
    %c0_14 = arith.constant 0 : index
    %c0_15 = arith.constant 0 : index
    %22 = vector.load %arg8[%c0_14, %c0_15] : memref<7x1xf32, #tpu.memory_space<vmem>>, vector<7x1xf32>
    %cst_16 = arith.constant dense<0xFF800000> : vector<7xf32>
    %23 = vector.multi_reduction <maximumf>, %21, %cst_16 [1] : vector<7x7xf32> to vector<7xf32>
    %24 = vector.shape_cast %23 : vector<7xf32> to vector<7x1xf32>
    %25 = arith.maximumf %22, %24 : vector<7x1xf32>
    %26 = arith.subf %22, %25 : vector<7x1xf32>
    %27 = math.exp %26 : vector<7x1xf32>
    %28 = vector.broadcast %25 : vector<7x1xf32> to vector<7x7xf32>
    %29 = arith.subf %21, %28 : vector<7x7xf32>
    %30 = math.exp %29 : vector<7x7xf32>
    %c0_17 = arith.constant 0 : index
    %c0_18 = arith.constant 0 : index
    %31 = vector.load %arg9[%c0_17, %c0_18] : memref<7x1xf32, #tpu.memory_space<vmem>>, vector<7x1xf32>
    %32 = arith.mulf %27, %31 : vector<7x1xf32>
    %cst_19 = arith.constant dense<0.000000e+00> : vector<7xf32>
    %33 = vector.multi_reduction <add>, %30, %cst_19 [1] : vector<7x7xf32> to vector<7xf32>
    %34 = vector.shape_cast %33 : vector<7xf32> to vector<7x1xf32>
    %35 = arith.addf %32, %34 : vector<7x1xf32>
    %c0_20 = arith.constant 0 : index
    %c0_21 = arith.constant 0 : index
    %36 = vector.load %arg9[%c0_20, %c0_21] : memref<7x1xf32, #tpu.memory_space<vmem>>, vector<7x1xf32>
    tpu.vector_store %arg9[%c0_20, %c0_21], %35 {strides = array<i32>} : memref<7x1xf32, #tpu.memory_space<vmem>>, vector<7x1xf32>,
    %c0_22 = arith.constant 0 : index
    %c0_23 = arith.constant 0 : index
    %37 = vector.load %arg10[%c0_22, %c0_23] : memref<7x8xf32, #tpu.memory_space<vmem>>, vector<7x8xf32>
    %38 = vector.broadcast %27 : vector<7x1xf32> to vector<7x8xf32>
    %39 = arith.mulf %38, %37 : vector<7x8xf32>
    %40 = arith.truncf %30 : vector<7x7xf32> to vector<7x7xbf16>
    %cst_24 = arith.constant dense<0.000000e+00> : vector<7x8xf32>
    %41 = tpu.matmul %40, %10, %cst_24 {dimension_numbers = #tpu.dot_dimension_numbers<[1], [0], [0], [1], [0, 0, 1, 1], [], []>} : vector<7x7xbf16>, vector<7x8xbf16>, vector<7x8xf32> -> vector<7x8xf32>
    %42 = arith.addf %39, %41 : vector<7x8xf32>
    %c0_25 = arith.constant 0 : index
    %c0_26 = arith.constant 0 : index
    %43 = vector.load %arg10[%c0_25, %c0_26] : memref<7x8xf32, #tpu.memory_space<vmem>>, vector<7x8xf32>
    tpu.vector_store %arg10[%c0_25, %c0_26], %42 {strides = array<i32>} : memref<7x8xf32, #tpu.memory_space<vmem>>, vector<7x8xf32>,
    %c0_27 = arith.constant 0 : index
    %c0_28 = arith.constant 0 : index
    %44 = vector.load %arg8[%c0_27, %c0_28] : memref<7x1xf32, #tpu.memory_space<vmem>>, vector<7x1xf32>
    tpu.vector_store %arg8[%c0_27, %c0_28], %25 {strides = array<i32>} : memref<7x1xf32, #tpu.memory_space<vmem>>, vector<7x1xf32>,
    %c0_i32_29 = arith.constant 0 : i32
    %45 = arith.cmpi eq, %arg2, %c0_i32_29 : i32
    %46 = arith.extui %45 : i1 to i32
    %c0_i32_30 = arith.constant 0 : i32
    %47 = arith.cmpi ne, %46, %c0_i32_30 : i32
    scf.if %47 {
      %c0_31 = arith.constant 0 : index
      %c0_32 = arith.constant 0 : index
      %48 = vector.load %arg10[%c0_31, %c0_32] : memref<7x8xf32, #tpu.memory_space<vmem>>, vector<7x8xf32>
      %c0_33 = arith.constant 0 : index
      %c0_34 = arith.constant 0 : index
      %49 = vector.load %arg9[%c0_33, %c0_34] : memref<7x1xf32, #tpu.memory_space<vmem>>, vector<7x1xf32>
      %50 = vector.broadcast %49 : vector<7x1xf32> to vector<7x8xf32>
      %51 = arith.divf %48, %50 : vector<7x8xf32>
      %52 = arith.truncf %51 : vector<7x8xf32> to vector<7x8xbf16>
      %c0_35 = arith.constant 0 : index
      %c0_36 = arith.constant 0 : index
      %c0_37 = arith.constant 0 : index
      %c0_38 = arith.constant 0 : index
      %53 = vector.load %arg7[%c0_35, %c0_36, %c0_37, %c0_38] : memref<1x1x7x8xbf16, #tpu.memory_space<vmem>>, vector<1x1x7x8xbf16>
      %54 = vector.shape_cast %53 : vector<1x1x7x8xbf16> to vector<7x8xbf16>
      %55 = vector.shape_cast %52 : vector<7x8xbf16> to vector<1x1x7x8xbf16>
      tpu.vector_store %arg7[%c0_35, %c0_36, %c0_37, %c0_38], %55 {strides = array<i32>} : memref<1x1x7x8xbf16, #tpu.memory_space<vmem>>, vector<1x1x7x8xbf16>,
    } else {
    }
    return
  }
  func.func @transform_0(%arg0: i32, %arg1: i32, %arg2: i32, %arg3: memref<2xi32, #tpu.memory_space<smem>>) -> (i32, i32, i32, i32) {
    %c0_i32 = arith.constant 0 : i32
    %c0_i32_0 = arith.constant 0 : i32
    %c0_i32_1 = arith.constant 0 : i32
    return %arg0, %arg1, %c0_i32, %c0_i32_0 : i32, i32, i32, i32
  }
  func.func @transform_1(%arg0: i32, %arg1: i32, %arg2: i32, %arg3: memref<2xi32, #tpu.memory_space<smem>>) -> (i32, i32, i32, i32) {
    %c0_i32 = arith.constant 0 : i32
    %c0_i32_0 = arith.constant 0 : i32
    return %arg0, %arg1, %arg2, %c0_i32 : i32, i32, i32, i32
  }
  func.func @transform_2(%arg0: i32, %arg1: i32, %arg2: i32, %arg3: memref<2xi32, #tpu.memory_space<smem>>) -> (i32, i32, i32, i32) {
    %c0_i32 = arith.constant 0 : i32
    %c0_i32_0 = arith.constant 0 : i32
    return %arg0, %arg1, %arg2, %c0_i32 : i32, i32, i32, i32
  }
  func.func @transform_3(%arg0: i32, %arg1: i32, %arg2: i32, %arg3: memref<2xi32, #tpu.memory_space<smem>>) -> (i32, i32, i32, i32) {
    %c0_i32 = arith.constant 0 : i32
    %c0_i32_0 = arith.constant 0 : i32
    %c0_i32_1 = arith.constant 0 : i32
    return %arg0, %arg1, %c0_i32, %c0_i32_0 : i32, i32, i32, i32
  }
}

module attributes {stable_mosaic.version = 11 : i64} {
  func.func @_matmul_kernel(%arg0: i32, %arg1: i32, %arg2: i32, %arg3: memref<16x32xbf16, #tpu.memory_space<vmem>>, %arg4: memref<32x32xbf16, #tpu.memory_space<vmem>>, %arg5: memref<1x32xf32, #tpu.memory_space<vmem>>, %arg6: memref<16x32xbf16, #tpu.memory_space<vmem>>, %arg7: memref<16x32xbf16, #tpu.memory_space<vmem>>, %arg8: memref<16x32xf32, #tpu.memory_space<vmem>>) attributes {dimension_semantics = [#tpu.dimension_semantics<parallel>, #tpu.dimension_semantics<parallel>, #tpu.dimension_semantics<arbitrary>], iteration_bounds = array<i64: 1, 1, 1>, scalar_prefetch = 0 : i64, scratch_operands = 1 : i64, tpu.core_type = #tpu.core_type<tc>, window_params = [{transform_indices = @transform_0, window_bounds = array<i64: 16, 32>}, {transform_indices = @transform_1, window_bounds = array<i64: 32, 32>}, {transform_indices = @transform_2, window_bounds = array<i64: 1, 32>}, {transform_indices = @transform_3, window_bounds = array<i64: 16, 32>}, {transform_indices = @transform_4, window_bounds = array<i64: 16, 32>}]} {
    %c0_i32 = arith.constant 0 : i32
    %0 = arith.cmpi eq, %arg2, %c0_i32 : i32
    %1 = arith.extui %0 : i1 to i32
    %c0_i32_0 = arith.constant 0 : i32
    %2 = arith.cmpi ne, %1, %c0_i32_0 : i32
    scf.if %2 {
      %cst_10 = arith.constant 0.000000e+00 : f32
      %12 = vector.broadcast %cst_10 : f32 to vector<16x32xf32>
      %c0_11 = arith.constant 0 : index
      %c0_12 = arith.constant 0 : index
      %13 = vector.load %arg8[%c0_11, %c0_12] : memref<16x32xf32, #tpu.memory_space<vmem>>, vector<16x32xf32>
      tpu.vector_store %arg8[%c0_11, %c0_12], %12 {strides = array<i32>} : memref<16x32xf32, #tpu.memory_space<vmem>>, vector<16x32xf32>,
    } else {
    }
    %c0 = arith.constant 0 : index
    %c0_1 = arith.constant 0 : index
    %3 = vector.load %arg8[%c0, %c0_1] : memref<16x32xf32, #tpu.memory_space<vmem>>, vector<16x32xf32>
    %c0_2 = arith.constant 0 : index
    %c0_3 = arith.constant 0 : index
    %4 = vector.load %arg3[%c0_2, %c0_3] : memref<16x32xbf16, #tpu.memory_space<vmem>>, vector<16x32xbf16>
    %c0_4 = arith.constant 0 : index
    %c0_5 = arith.constant 0 : index
    %5 = vector.load %arg4[%c0_4, %c0_5] : memref<32x32xbf16, #tpu.memory_space<vmem>>, vector<32x32xbf16>
    %cst = arith.constant dense<0.000000e+00> : vector<16x32xf32>
    %6 = tpu.matmul %4, %5, %cst {dimension_numbers = #tpu.dot_dimension_numbers<[1], [0], [0], [1], [0, 0, 1, 1], [], []>} : vector<16x32xbf16>, vector<32x32xbf16>, vector<16x32xf32> -> vector<16x32xf32>
    %7 = arith.addf %3, %6 : vector<16x32xf32>
    %c0_6 = arith.constant 0 : index
    %c0_7 = arith.constant 0 : index
    %8 = vector.load %arg8[%c0_6, %c0_7] : memref<16x32xf32, #tpu.memory_space<vmem>>, vector<16x32xf32>
    tpu.vector_store %arg8[%c0_6, %c0_7], %7 {strides = array<i32>} : memref<16x32xf32, #tpu.memory_space<vmem>>, vector<16x32xf32>,
    %c0_i32_8 = arith.constant 0 : i32
    %9 = arith.cmpi eq, %arg2, %c0_i32_8 : i32
    %10 = arith.extui %9 : i1 to i32
    %c0_i32_9 = arith.constant 0 : i32
    %11 = arith.cmpi ne, %10, %c0_i32_9 : i32
    scf.if %11 {
      %c0_10 = arith.constant 0 : index
      %c0_11 = arith.constant 0 : index
      %12 = vector.load %arg8[%c0_10, %c0_11] : memref<16x32xf32, #tpu.memory_space<vmem>>, vector<16x32xf32>
      %c0_12 = arith.constant 0 : index
      %c0_13 = arith.constant 0 : index
      %13 = vector.load %arg5[%c0_12, %c0_13] : memref<1x32xf32, #tpu.memory_space<vmem>>, vector<1x32xf32>
      %14 = vector.broadcast %13 : vector<1x32xf32> to vector<16x32xf32>
      %15 = arith.addf %12, %14 : vector<16x32xf32>
      %c0_14 = arith.constant 0 : index
      %c0_15 = arith.constant 0 : index
      %16 = vector.load %arg6[%c0_14, %c0_15] : memref<16x32xbf16, #tpu.memory_space<vmem>>, vector<16x32xbf16>
      %17 = arith.extf %16 : vector<16x32xbf16> to vector<16x32xf32>
      %18 = arith.addf %15, %17 : vector<16x32xf32>
      %19 = arith.truncf %18 : vector<16x32xf32> to vector<16x32xbf16>
      %c0_16 = arith.constant 0 : index
      %c0_17 = arith.constant 0 : index
      %20 = vector.load %arg7[%c0_16, %c0_17] : memref<16x32xbf16, #tpu.memory_space<vmem>>, vector<16x32xbf16>
      tpu.vector_store %arg7[%c0_16, %c0_17], %19 {strides = array<i32>} : memref<16x32xbf16, #tpu.memory_space<vmem>>, vector<16x32xbf16>,
    } else {
    }
    return
  }
  func.func @transform_0(%arg0: i32, %arg1: i32, %arg2: i32) -> (i32, i32) {
    %c0_i32 = arith.constant 0 : i32
    return %arg0, %arg2 : i32, i32
  }
  func.func @transform_1(%arg0: i32, %arg1: i32, %arg2: i32) -> (i32, i32) {
    %c0_i32 = arith.constant 0 : i32
    return %arg2, %arg1 : i32, i32
  }
  func.func @transform_2(%arg0: i32, %arg1: i32, %arg2: i32) -> (i32, i32) {
    %c0_i32 = arith.constant 0 : i32
    %c0_i32_0 = arith.constant 0 : i32
    return %c0_i32, %arg1 : i32, i32
  }
  func.func @transform_3(%arg0: i32, %arg1: i32, %arg2: i32) -> (i32, i32) {
    %c0_i32 = arith.constant 0 : i32
    return %arg0, %arg1 : i32, i32
  }
  func.func @transform_4(%arg0: i32, %arg1: i32, %arg2: i32) -> (i32, i32) {
    %c0_i32 = arith.constant 0 : i32
    return %arg0, %arg1 : i32, i32
  }
}

module attributes {stable_mosaic.version = 11 : i64} {
  func.func @_ln_glu_kernel(%arg0: i32, %arg1: i32, %arg2: memref<16x32xbf16, #tpu.memory_space<vmem>>, %arg3: memref<1x32xf32, #tpu.memory_space<vmem>>, %arg4: memref<1x32xf32, #tpu.memory_space<vmem>>, %arg5: memref<32x32xbf16, #tpu.memory_space<vmem>>, %arg6: memref<32x32xbf16, #tpu.memory_space<vmem>>, %arg7: memref<1x32xf32, #tpu.memory_space<vmem>>, %arg8: memref<1x32xf32, #tpu.memory_space<vmem>>, %arg9: memref<16x32xbf16, #tpu.memory_space<vmem>>, %arg10: memref<16x32xbf16, #tpu.memory_space<vmem>>) attributes {dimension_semantics = [#tpu.dimension_semantics<parallel>, #tpu.dimension_semantics<arbitrary>], iteration_bounds = array<i64: 1, 1>, scalar_prefetch = 0 : i64, scratch_operands = 1 : i64, tpu.core_type = #tpu.core_type<tc>, window_params = [{transform_indices = @transform_0, window_bounds = array<i64: 16, 32>}, {pipeline_mode = #tpu.pipeline_mode<synchronous>, transform_indices = @transform_1, window_bounds = array<i64: 1, 32>}, {pipeline_mode = #tpu.pipeline_mode<synchronous>, transform_indices = @transform_2, window_bounds = array<i64: 1, 32>}, {transform_indices = @transform_3, window_bounds = array<i64: 32, 32>}, {transform_indices = @transform_4, window_bounds = array<i64: 32, 32>}, {transform_indices = @transform_5, window_bounds = array<i64: 1, 32>}, {transform_indices = @transform_6, window_bounds = array<i64: 1, 32>}, {transform_indices = @transform_7, window_bounds = array<i64: 16, 32>}]} {
    %c0_i32 = arith.constant 0 : i32
    %0 = arith.cmpi eq, %arg1, %c0_i32 : i32
    %1 = arith.extui %0 : i1 to i32
    %c0_i32_0 = arith.constant 0 : i32
    %2 = arith.cmpi ne, %1, %c0_i32_0 : i32
    scf.if %2 {
      %c0_14 = arith.constant 0 : index
      %c0_15 = arith.constant 0 : index
      %22 = vector.load %arg2[%c0_14, %c0_15] : memref<16x32xbf16, #tpu.memory_space<vmem>>, vector<16x32xbf16>
      %23 = arith.extf %22 : vector<16x32xbf16> to vector<16x32xf32>
      %cst_16 = arith.constant dense<0.000000e+00> : vector<16xf32>
      %24 = vector.multi_reduction <add>, %23, %cst_16 [1] : vector<16x32xf32> to vector<16xf32>
      %25 = vector.shape_cast %24 : vector<16xf32> to vector<16x1xf32>
      %cst_17 = arith.constant 3.200000e+01 : f32
      %26 = vector.broadcast %cst_17 : f32 to vector<16x1xf32>
      %27 = arith.divf %25, %26 : vector<16x1xf32>
      %28 = vector.broadcast %27 : vector<16x1xf32> to vector<16x32xf32>
      %29 = arith.subf %23, %28 : vector<16x32xf32>
      %30 = arith.mulf %29, %29 : vector<16x32xf32>
      %cst_18 = arith.constant dense<0.000000e+00> : vector<16xf32>
      %31 = vector.multi_reduction <add>, %30, %cst_18 [1] : vector<16x32xf32> to vector<16xf32>
      %32 = vector.shape_cast %31 : vector<16xf32> to vector<16x1xf32>
      %cst_19 = arith.constant 3.200000e+01 : f32
      %33 = vector.broadcast %cst_19 : f32 to vector<16x1xf32>
      %34 = arith.divf %32, %33 : vector<16x1xf32>
      %35 = vector.broadcast %27 : vector<16x1xf32> to vector<16x32xf32>
      %36 = arith.subf %23, %35 : vector<16x32xf32>
      %cst_20 = arith.constant 9.99999974E-6 : f32
      %37 = vector.broadcast %cst_20 : f32 to vector<16x1xf32>
      %38 = arith.addf %34, %37 : vector<16x1xf32>
      %39 = math.rsqrt %38 : vector<16x1xf32>
      %40 = vector.broadcast %39 : vector<16x1xf32> to vector<16x32xf32>
      %41 = arith.mulf %36, %40 : vector<16x32xf32>
      %c0_21 = arith.constant 0 : index
      %c0_22 = arith.constant 0 : index
      %42 = vector.load %arg3[%c0_21, %c0_22] : memref<1x32xf32, #tpu.memory_space<vmem>>, vector<1x32xf32>
      %43 = vector.broadcast %42 : vector<1x32xf32> to vector<16x32xf32>
      %44 = arith.mulf %41, %43 : vector<16x32xf32>
      %c0_23 = arith.constant 0 : index
      %c0_24 = arith.constant 0 : index
      %45 = vector.load %arg4[%c0_23, %c0_24] : memref<1x32xf32, #tpu.memory_space<vmem>>, vector<1x32xf32>
      %46 = vector.broadcast %45 : vector<1x32xf32> to vector<16x32xf32>
      %47 = arith.addf %44, %46 : vector<16x32xf32>
      %48 = arith.truncf %47 : vector<16x32xf32> to vector<16x32xbf16>
      %c0_25 = arith.constant 0 : index
      %c0_26 = arith.constant 0 : index
      %49 = vector.load %arg10[%c0_25, %c0_26] : memref<16x32xbf16, #tpu.memory_space<vmem>>, vector<16x32xbf16>
      tpu.vector_store %arg10[%c0_25, %c0_26], %48 {strides = array<i32>} : memref<16x32xbf16, #tpu.memory_space<vmem>>, vector<16x32xbf16>,
    } else {
    }
    %c0 = arith.constant 0 : index
    %c0_1 = arith.constant 0 : index
    %3 = vector.load %arg10[%c0, %c0_1] : memref<16x32xbf16, #tpu.memory_space<vmem>>, vector<16x32xbf16>
    %c0_2 = arith.constant 0 : index
    %c0_3 = arith.constant 0 : index
    %4 = vector.load %arg5[%c0_2, %c0_3] : memref<32x32xbf16, #tpu.memory_space<vmem>>, vector<32x32xbf16>
    %cst = arith.constant dense<0.000000e+00> : vector<16x32xf32>
    %5 = tpu.matmul %3, %4, %cst {dimension_numbers = #tpu.dot_dimension_numbers<[1], [0], [0], [1], [0, 0, 1, 1], [], []>} : vector<16x32xbf16>, vector<32x32xbf16>, vector<16x32xf32> -> vector<16x32xf32>
    %c0_4 = arith.constant 0 : index
    %c0_5 = arith.constant 0 : index
    %6 = vector.load %arg7[%c0_4, %c0_5] : memref<1x32xf32, #tpu.memory_space<vmem>>, vector<1x32xf32>
    %7 = vector.broadcast %6 : vector<1x32xf32> to vector<16x32xf32>
    %8 = arith.addf %5, %7 : vector<16x32xf32>
    %c0_6 = arith.constant 0 : index
    %c0_7 = arith.constant 0 : index
    %9 = vector.load %arg6[%c0_6, %c0_7] : memref<32x32xbf16, #tpu.memory_space<vmem>>, vector<32x32xbf16>
    %cst_8 = arith.constant dense<0.000000e+00> : vector<16x32xf32>
    %10 = tpu.matmul %3, %9, %cst_8 {dimension_numbers = #tpu.dot_dimension_numbers<[1], [0], [0], [1], [0, 0, 1, 1], [], []>} : vector<16x32xbf16>, vector<32x32xbf16>, vector<16x32xf32> -> vector<16x32xf32>
    %c0_9 = arith.constant 0 : index
    %c0_10 = arith.constant 0 : index
    %11 = vector.load %arg8[%c0_9, %c0_10] : memref<1x32xf32, #tpu.memory_space<vmem>>, vector<1x32xf32>
    %12 = vector.broadcast %11 : vector<1x32xf32> to vector<16x32xf32>
    %13 = arith.addf %10, %12 : vector<16x32xf32>
    %14 = arith.negf %13 : vector<16x32xf32>
    %15 = math.exp %14 : vector<16x32xf32>
    %cst_11 = arith.constant 1.000000e+00 : f32
    %16 = vector.broadcast %cst_11 : f32 to vector<16x32xf32>
    %17 = arith.addf %16, %15 : vector<16x32xf32>
    %18 = arith.divf %16, %17 : vector<16x32xf32>
    %19 = arith.mulf %8, %18 : vector<16x32xf32>
    %20 = arith.truncf %19 : vector<16x32xf32> to vector<16x32xbf16>
    %c0_12 = arith.constant 0 : index
    %c0_13 = arith.constant 0 : index
    %21 = vector.load %arg9[%c0_12, %c0_13] : memref<16x32xbf16, #tpu.memory_space<vmem>>, vector<16x32xbf16>
    tpu.vector_store %arg9[%c0_12, %c0_13], %20 {strides = array<i32>} : memref<16x32xbf16, #tpu.memory_space<vmem>>, vector<16x32xbf16>,
    return
  }
  func.func @transform_0(%arg0: i32, %arg1: i32) -> (i32, i32) {
    %c0_i32 = arith.constant 0 : i32
    %c0_i32_0 = arith.constant 0 : i32
    return %arg0, %c0_i32 : i32, i32
  }
  func.func @transform_1(%arg0: i32, %arg1: i32) -> (i32, i32) {
    %c0_i32 = arith.constant 0 : i32
    %c0_i32_0 = arith.constant 0 : i32
    %c0_i32_1 = arith.constant 0 : i32
    return %c0_i32, %c0_i32_0 : i32, i32
  }
  func.func @transform_2(%arg0: i32, %arg1: i32) -> (i32, i32) {
    %c0_i32 = arith.constant 0 : i32
    %c0_i32_0 = arith.constant 0 : i32
    %c0_i32_1 = arith.constant 0 : i32
    return %c0_i32, %c0_i32_0 : i32, i32
  }
  func.func @transform_3(%arg0: i32, %arg1: i32) -> (i32, i32) {
    %c0_i32 = arith.constant 0 : i32
    %c0_i32_0 = arith.constant 0 : i32
    return %c0_i32, %arg1 : i32, i32
  }
  func.func @transform_4(%arg0: i32, %arg1: i32) -> (i32, i32) {
    %c0_i32 = arith.constant 0 : i32
    %c0_i32_0 = arith.constant 0 : i32
    return %c0_i32, %arg1 : i32, i32
  }
  func.func @transform_5(%arg0: i32, %arg1: i32) -> (i32, i32) {
    %c0_i32 = arith.constant 0 : i32
    %c0_i32_0 = arith.constant 0 : i32
    return %c0_i32, %arg1 : i32, i32
  }
  func.func @transform_6(%arg0: i32, %arg1: i32) -> (i32, i32) {
    %c0_i32 = arith.constant 0 : i32
    %c0_i32_0 = arith.constant 0 : i32
    return %c0_i32, %arg1 : i32, i32
  }
  func.func @transform_7(%arg0: i32, %arg1: i32) -> (i32, i32) {
    %c0_i32 = arith.constant 0 : i32
    return %arg0, %arg1 : i32, i32
  }
}

module attributes {stable_mosaic.version = 11 : i64} {
  func.func @_dwconv_kernel(%arg0: i32, %arg1: i32, %arg2: memref<1x16x32xbf16, #tpu.memory_space<vmem>>, %arg3: memref<7x32xf32, #tpu.memory_space<vmem>>, %arg4: memref<1x32xf32, #tpu.memory_space<vmem>>, %arg5: memref<1x32xf32, #tpu.memory_space<vmem>>, %arg6: memref<1x32xf32, #tpu.memory_space<vmem>>, %arg7: memref<1x7x32xbf16, #tpu.memory_space<vmem>>) attributes {dimension_semantics = [#tpu.dimension_semantics<parallel>, #tpu.dimension_semantics<parallel>], iteration_bounds = array<i64: 2, 1>, scalar_prefetch = 0 : i64, scratch_operands = 0 : i64, tpu.core_type = #tpu.core_type<tc>, window_params = [{transform_indices = @transform_0, window_bounds = array<i64: 1, 16, 32>}, {transform_indices = @transform_1, window_bounds = array<i64: 7, 32>}, {transform_indices = @transform_2, window_bounds = array<i64: 1, 32>}, {transform_indices = @transform_3, window_bounds = array<i64: 1, 32>}, {transform_indices = @transform_4, window_bounds = array<i64: 1, 32>}, {transform_indices = @transform_5, window_bounds = array<i64: 1, 7, 32>}]} {
    %c0 = arith.constant 0 : index
    %c0_0 = arith.constant 0 : index
    %c0_1 = arith.constant 0 : index
    %0 = vector.load %arg2[%c0, %c0_0, %c0_1] : memref<1x16x32xbf16, #tpu.memory_space<vmem>>, vector<1x16x32xbf16>
    %1 = vector.shape_cast %0 : vector<1x16x32xbf16> to vector<16x32xbf16>
    %2 = arith.extf %1 : vector<16x32xbf16> to vector<16x32xf32>
    %c0_2 = arith.constant 0 : index
    %c0_3 = arith.constant 0 : index
    %3 = vector.load %arg3[%c0_2, %c0_3] : memref<7x32xf32, #tpu.memory_space<vmem>>, vector<7x32xf32>
    %4 = vector.extract_strided_slice %3 {offsets = [0, 0], sizes = [1, 32], strides = [1, 1]} : vector<7x32xf32> to vector<1x32xf32>
    %5 = vector.broadcast %4 : vector<1x32xf32> to vector<16x32xf32>
    %6 = arith.mulf %2, %5 : vector<16x32xf32>
    %c15_i32 = arith.constant 15 : i32
    %7 = tpu.dynamic_rotate %2 by %c15_i32 dim 0 : vector<16x32xf32>, i32 -> vector<16x32xf32>
    %8 = vector.extract_strided_slice %3 {offsets = [1, 0], sizes = [1, 32], strides = [1, 1]} : vector<7x32xf32> to vector<1x32xf32>
    %9 = vector.broadcast %8 : vector<1x32xf32> to vector<16x32xf32>
    %10 = arith.mulf %7, %9 : vector<16x32xf32>
    %11 = arith.addf %6, %10 : vector<16x32xf32>
    %c14_i32 = arith.constant 14 : i32
    %12 = tpu.dynamic_rotate %2 by %c14_i32 dim 0 : vector<16x32xf32>, i32 -> vector<16x32xf32>
    %13 = vector.extract_strided_slice %3 {offsets = [2, 0], sizes = [1, 32], strides = [1, 1]} : vector<7x32xf32> to vector<1x32xf32>
    %14 = vector.broadcast %13 : vector<1x32xf32> to vector<16x32xf32>
    %15 = arith.mulf %12, %14 : vector<16x32xf32>
    %16 = arith.addf %11, %15 : vector<16x32xf32>
    %c13_i32 = arith.constant 13 : i32
    %17 = tpu.dynamic_rotate %2 by %c13_i32 dim 0 : vector<16x32xf32>, i32 -> vector<16x32xf32>
    %18 = vector.extract_strided_slice %3 {offsets = [3, 0], sizes = [1, 32], strides = [1, 1]} : vector<7x32xf32> to vector<1x32xf32>
    %19 = vector.broadcast %18 : vector<1x32xf32> to vector<16x32xf32>
    %20 = arith.mulf %17, %19 : vector<16x32xf32>
    %21 = arith.addf %16, %20 : vector<16x32xf32>
    %c12_i32 = arith.constant 12 : i32
    %22 = tpu.dynamic_rotate %2 by %c12_i32 dim 0 : vector<16x32xf32>, i32 -> vector<16x32xf32>
    %23 = vector.extract_strided_slice %3 {offsets = [4, 0], sizes = [1, 32], strides = [1, 1]} : vector<7x32xf32> to vector<1x32xf32>
    %24 = vector.broadcast %23 : vector<1x32xf32> to vector<16x32xf32>
    %25 = arith.mulf %22, %24 : vector<16x32xf32>
    %26 = arith.addf %21, %25 : vector<16x32xf32>
    %c11_i32 = arith.constant 11 : i32
    %27 = tpu.dynamic_rotate %2 by %c11_i32 dim 0 : vector<16x32xf32>, i32 -> vector<16x32xf32>
    %28 = vector.extract_strided_slice %3 {offsets = [5, 0], sizes = [1, 32], strides = [1, 1]} : vector<7x32xf32> to vector<1x32xf32>
    %29 = vector.broadcast %28 : vector<1x32xf32> to vector<16x32xf32>
    %30 = arith.mulf %27, %29 : vector<16x32xf32>
    %31 = arith.addf %26, %30 : vector<16x32xf32>
    %c10_i32 = arith.constant 10 : i32
    %32 = tpu.dynamic_rotate %2 by %c10_i32 dim 0 : vector<16x32xf32>, i32 -> vector<16x32xf32>
    %33 = vector.extract_strided_slice %3 {offsets = [6, 0], sizes = [1, 32], strides = [1, 1]} : vector<7x32xf32> to vector<1x32xf32>
    %34 = vector.broadcast %33 : vector<1x32xf32> to vector<16x32xf32>
    %35 = arith.mulf %32, %34 : vector<16x32xf32>
    %36 = arith.addf %31, %35 : vector<16x32xf32>
    %37 = vector.extract_strided_slice %36 {offsets = [0, 0], sizes = [7, 32], strides = [1, 1]} : vector<16x32xf32> to vector<7x32xf32>
    %c0_4 = arith.constant 0 : index
    %c0_5 = arith.constant 0 : index
    %38 = vector.load %arg4[%c0_4, %c0_5] : memref<1x32xf32, #tpu.memory_space<vmem>>, vector<1x32xf32>
    %39 = vector.broadcast %38 : vector<1x32xf32> to vector<7x32xf32>
    %40 = arith.addf %37, %39 : vector<7x32xf32>
    %c0_6 = arith.constant 0 : index
    %c0_7 = arith.constant 0 : index
    %41 = vector.load %arg5[%c0_6, %c0_7] : memref<1x32xf32, #tpu.memory_space<vmem>>, vector<1x32xf32>
    %42 = vector.broadcast %41 : vector<1x32xf32> to vector<7x32xf32>
    %43 = arith.mulf %40, %42 : vector<7x32xf32>
    %c0_8 = arith.constant 0 : index
    %c0_9 = arith.constant 0 : index
    %44 = vector.load %arg6[%c0_8, %c0_9] : memref<1x32xf32, #tpu.memory_space<vmem>>, vector<1x32xf32>
    %45 = vector.broadcast %44 : vector<1x32xf32> to vector<7x32xf32>
    %46 = arith.addf %43, %45 : vector<7x32xf32>
    %47 = arith.negf %46 : vector<7x32xf32>
    %48 = math.exp %47 : vector<7x32xf32>
    %cst = arith.constant 1.000000e+00 : f32
    %49 = vector.broadcast %cst : f32 to vector<7x32xf32>
    %50 = arith.addf %49, %48 : vector<7x32xf32>
    %51 = arith.divf %49, %50 : vector<7x32xf32>
    %52 = arith.mulf %46, %51 : vector<7x32xf32>
    %53 = arith.truncf %52 : vector<7x32xf32> to vector<7x32xbf16>
    %c0_10 = arith.constant 0 : index
    %c0_11 = arith.constant 0 : index
    %c0_12 = arith.constant 0 : index
    %54 = vector.load %arg7[%c0_10, %c0_11, %c0_12] : memref<1x7x32xbf16, #tpu.memory_space<vmem>>, vector<1x7x32xbf16>
    %55 = vector.shape_cast %54 : vector<1x7x32xbf16> to vector<7x32xbf16>
    %56 = vector.shape_cast %53 : vector<7x32xbf16> to vector<1x7x32xbf16>
    tpu.vector_store %arg7[%c0_10, %c0_11, %c0_12], %56 {strides = array<i32>} : memref<1x7x32xbf16, #tpu.memory_space<vmem>>, vector<1x7x32xbf16>,
    return
  }
  func.func @transform_0(%arg0: i32, %arg1: i32) -> (i32, i32, i32) {
    %c0_i32 = arith.constant 0 : i32
    %c0_i32_0 = arith.constant 0 : i32
    return %arg0, %c0_i32, %arg1 : i32, i32, i32
  }
  func.func @transform_1(%arg0: i32, %arg1: i32) -> (i32, i32) {
    %c0_i32 = arith.constant 0 : i32
    %c0_i32_0 = arith.constant 0 : i32
    return %c0_i32, %arg1 : i32, i32
  }
  func.func @transform_2(%arg0: i32, %arg1: i32) -> (i32, i32) {
    %c0_i32 = arith.constant 0 : i32
    %c0_i32_0 = arith.constant 0 : i32
    return %c0_i32, %arg1 : i32, i32
  }
  func.func @transform_3(%arg0: i32, %arg1: i32) -> (i32, i32) {
    %c0_i32 = arith.constant 0 : i32
    %c0_i32_0 = arith.constant 0 : i32
    return %c0_i32, %arg1 : i32, i32
  }
  func.func @transform_4(%arg0: i32, %arg1: i32) -> (i32, i32) {
    %c0_i32 = arith.constant 0 : i32
    %c0_i32_0 = arith.constant 0 : i32
    return %c0_i32, %arg1 : i32, i32
  }
  func.func @transform_5(%arg0: i32, %arg1: i32) -> (i32, i32, i32) {
    %c0_i32 = arith.constant 0 : i32
    %c0_i32_0 = arith.constant 0 : i32
    return %arg0, %c0_i32, %arg1 : i32, i32, i32
  }
}

module attributes {stable_mosaic.version = 11 : i64} {
  func.func @_matmul_kernel(%arg0: i32, %arg1: i32, %arg2: i32, %arg3: memref<16x128xbf16, #tpu.memory_space<vmem>>, %arg4: memref<128x32xbf16, #tpu.memory_space<vmem>>, %arg5: memref<1x32xf32, #tpu.memory_space<vmem>>, %arg6: memref<16x32xbf16, #tpu.memory_space<vmem>>, %arg7: memref<1x32xf32, #tpu.memory_space<vmem>>, %arg8: memref<1x32xf32, #tpu.memory_space<vmem>>, %arg9: memref<16x32xbf16, #tpu.memory_space<vmem>>, %arg10: memref<16x32xf32, #tpu.memory_space<vmem>>) attributes {dimension_semantics = [#tpu.dimension_semantics<parallel>, #tpu.dimension_semantics<parallel>, #tpu.dimension_semantics<arbitrary>], iteration_bounds = array<i64: 1, 1, 1>, scalar_prefetch = 0 : i64, scratch_operands = 1 : i64, tpu.core_type = #tpu.core_type<tc>, window_params = [{transform_indices = @transform_0, window_bounds = array<i64: 16, 128>}, {transform_indices = @transform_1, window_bounds = array<i64: 128, 32>}, {transform_indices = @transform_2, window_bounds = array<i64: 1, 32>}, {transform_indices = @transform_3, window_bounds = array<i64: 16, 32>}, {transform_indices = @transform_4, window_bounds = array<i64: 1, 32>}, {transform_indices = @transform_5, window_bounds = array<i64: 1, 32>}, {transform_indices = @transform_6, window_bounds = array<i64: 16, 32>}]} {
    %c0_i32 = arith.constant 0 : i32
    %0 = arith.cmpi eq, %arg2, %c0_i32 : i32
    %1 = arith.extui %0 : i1 to i32
    %c0_i32_0 = arith.constant 0 : i32
    %2 = arith.cmpi ne, %1, %c0_i32_0 : i32
    scf.if %2 {
      %cst_10 = arith.constant 0.000000e+00 : f32
      %12 = vector.broadcast %cst_10 : f32 to vector<16x32xf32>
      %c0_11 = arith.constant 0 : index
      %c0_12 = arith.constant 0 : index
      %13 = vector.load %arg10[%c0_11, %c0_12] : memref<16x32xf32, #tpu.memory_space<vmem>>, vector<16x32xf32>
      tpu.vector_store %arg10[%c0_11, %c0_12], %12 {strides = array<i32>} : memref<16x32xf32, #tpu.memory_space<vmem>>, vector<16x32xf32>,
    } else {
    }
    %c0 = arith.constant 0 : index
    %c0_1 = arith.constant 0 : index
    %3 = vector.load %arg10[%c0, %c0_1] : memref<16x32xf32, #tpu.memory_space<vmem>>, vector<16x32xf32>
    %c0_2 = arith.constant 0 : index
    %c0_3 = arith.constant 0 : index
    %4 = vector.load %arg3[%c0_2, %c0_3] : memref<16x128xbf16, #tpu.memory_space<vmem>>, vector<16x128xbf16>
    %c0_4 = arith.constant 0 : index
    %c0_5 = arith.constant 0 : index
    %5 = vector.load %arg4[%c0_4, %c0_5] : memref<128x32xbf16, #tpu.memory_space<vmem>>, vector<128x32xbf16>
    %cst = arith.constant dense<0.000000e+00> : vector<16x32xf32>
    %6 = tpu.matmul %4, %5, %cst {dimension_numbers = #tpu.dot_dimension_numbers<[1], [0], [0], [1], [0, 0, 1, 1], [], []>} : vector<16x128xbf16>, vector<128x32xbf16>, vector<16x32xf32> -> vector<16x32xf32>
    %7 = arith.addf %3, %6 : vector<16x32xf32>
    %c0_6 = arith.constant 0 : index
    %c0_7 = arith.constant 0 : index
    %8 = vector.load %arg10[%c0_6, %c0_7] : memref<16x32xf32, #tpu.memory_space<vmem>>, vector<16x32xf32>
    tpu.vector_store %arg10[%c0_6, %c0_7], %7 {strides = array<i32>} : memref<16x32xf32, #tpu.memory_space<vmem>>, vector<16x32xf32>,
    %c0_i32_8 = arith.constant 0 : i32
    %9 = arith.cmpi eq, %arg2, %c0_i32_8 : i32
    %10 = arith.extui %9 : i1 to i32
    %c0_i32_9 = arith.constant 0 : i32
    %11 = arith.cmpi ne, %10, %c0_i32_9 : i32
    scf.if %11 {
      %c0_10 = arith.constant 0 : index
      %c0_11 = arith.constant 0 : index
      %12 = vector.load %arg10[%c0_10, %c0_11] : memref<16x32xf32, #tpu.memory_space<vmem>>, vector<16x32xf32>
      %c0_12 = arith.constant 0 : index
      %c0_13 = arith.constant 0 : index
      %13 = vector.load %arg5[%c0_12, %c0_13] : memref<1x32xf32, #tpu.memory_space<vmem>>, vector<1x32xf32>
      %14 = vector.broadcast %13 : vector<1x32xf32> to vector<16x32xf32>
      %15 = arith.addf %12, %14 : vector<16x32xf32>
      %cst_14 = arith.constant 5.000000e-01 : f32
      %16 = vector.broadcast %cst_14 : f32 to vector<16x32xf32>
      %17 = arith.mulf %15, %16 : vector<16x32xf32>
      %c0_15 = arith.constant 0 : index
      %c0_16 = arith.constant 0 : index
      %18 = vector.load %arg6[%c0_15, %c0_16] : memref<16x32xbf16, #tpu.memory_space<vmem>>, vector<16x32xbf16>
      %19 = arith.extf %18 : vector<16x32xbf16> to vector<16x32xf32>
      %20 = arith.addf %17, %19 : vector<16x32xf32>
      %cst_17 = arith.constant dense<0.000000e+00> : vector<16xf32>
      %21 = vector.multi_reduction <add>, %20, %cst_17 [1] : vector<16x32xf32> to vector<16xf32>
      %22 = vector.shape_cast %21 : vector<16xf32> to vector<16x1xf32>
      %cst_18 = arith.constant 3.200000e+01 : f32
      %23 = vector.broadcast %cst_18 : f32 to vector<16x1xf32>
      %24 = arith.divf %22, %23 : vector<16x1xf32>
      %25 = vector.broadcast %24 : vector<16x1xf32> to vector<16x32xf32>
      %26 = arith.subf %20, %25 : vector<16x32xf32>
      %27 = arith.mulf %26, %26 : vector<16x32xf32>
      %cst_19 = arith.constant dense<0.000000e+00> : vector<16xf32>
      %28 = vector.multi_reduction <add>, %27, %cst_19 [1] : vector<16x32xf32> to vector<16xf32>
      %29 = vector.shape_cast %28 : vector<16xf32> to vector<16x1xf32>
      %cst_20 = arith.constant 3.200000e+01 : f32
      %30 = vector.broadcast %cst_20 : f32 to vector<16x1xf32>
      %31 = arith.divf %29, %30 : vector<16x1xf32>
      %32 = vector.broadcast %24 : vector<16x1xf32> to vector<16x32xf32>
      %33 = arith.subf %20, %32 : vector<16x32xf32>
      %cst_21 = arith.constant 9.99999974E-6 : f32
      %34 = vector.broadcast %cst_21 : f32 to vector<16x1xf32>
      %35 = arith.addf %31, %34 : vector<16x1xf32>
      %36 = math.rsqrt %35 : vector<16x1xf32>
      %37 = vector.broadcast %36 : vector<16x1xf32> to vector<16x32xf32>
      %38 = arith.mulf %33, %37 : vector<16x32xf32>
      %c0_22 = arith.constant 0 : index
      %c0_23 = arith.constant 0 : index
      %39 = vector.load %arg7[%c0_22, %c0_23] : memref<1x32xf32, #tpu.memory_space<vmem>>, vector<1x32xf32>
      %40 = vector.broadcast %39 : vector<1x32xf32> to vector<16x32xf32>
      %41 = arith.mulf %38, %40 : vector<16x32xf32>
      %c0_24 = arith.constant 0 : index
      %c0_25 = arith.constant 0 : index
      %42 = vector.load %arg8[%c0_24, %c0_25] : memref<1x32xf32, #tpu.memory_space<vmem>>, vector<1x32xf32>
      %43 = vector.broadcast %42 : vector<1x32xf32> to vector<16x32xf32>
      %44 = arith.addf %41, %43 : vector<16x32xf32>
      %45 = arith.truncf %44 : vector<16x32xf32> to vector<16x32xbf16>
      %c0_26 = arith.constant 0 : index
      %c0_27 = arith.constant 0 : index
      %46 = vector.load %arg9[%c0_26, %c0_27] : memref<16x32xbf16, #tpu.memory_space<vmem>>, vector<16x32xbf16>
      tpu.vector_store %arg9[%c0_26, %c0_27], %45 {strides = array<i32>} : memref<16x32xbf16, #tpu.memory_space<vmem>>, vector<16x32xbf16>,
    } else {
    }
    return
  }
  func.func @transform_0(%arg0: i32, %arg1: i32, %arg2: i32) -> (i32, i32) {
    %c0_i32 = arith.constant 0 : i32
    return %arg0, %arg2 : i32, i32
  }
  func.func @transform_1(%arg0: i32, %arg1: i32, %arg2: i32) -> (i32, i32) {
    %c0_i32 = arith.constant 0 : i32
    return %arg2, %arg1 : i32, i32
  }
  func.func @transform_2(%arg0: i32, %arg1: i32, %arg2: i32) -> (i32, i32) {
    %c0_i32 = arith.constant 0 : i32
    %c0_i32_0 = arith.constant 0 : i32
    return %c0_i32, %arg1 : i32, i32
  }
  func.func @transform_3(%arg0: i32, %arg1: i32, %arg2: i32) -> (i32, i32) {
    %c0_i32 = arith.constant 0 : i32
    return %arg0, %arg1 : i32, i32
  }
  func.func @transform_4(%arg0: i32, %arg1: i32, %arg2: i32) -> (i32, i32) {
    %c0_i32 = arith.constant 0 : i32
    %c0_i32_0 = arith.constant 0 : i32
    return %c0_i32, %arg1 : i32, i32
  }
  func.func @transform_5(%arg0: i32, %arg1: i32, %arg2: i32) -> (i32, i32) {
    %c0_i32 = arith.constant 0 : i32
    %c0_i32_0 = arith.constant 0 : i32
    return %c0_i32, %arg1 : i32, i32
  }
  func.func @transform_6(%arg0: i32, %arg1: i32, %arg2: i32) -> (i32, i32) {
    %c0_i32 = arith.constant 0 : i32
    return %arg0, %arg1 : i32, i32
  }
}

module attributes {stable_mosaic.version = 11 : i64} {
  func.func @_matmul_kernel(%arg0: i32, %arg1: i32, %arg2: i32, %arg3: memref<16x32xbf16, #tpu.memory_space<vmem>>, %arg4: memref<32x64xbf16, #tpu.memory_space<vmem>>, %arg5: memref<1x64xf32, #tpu.memory_space<vmem>>, %arg6: memref<16x64xbf16, #tpu.memory_space<vmem>>, %arg7: memref<16x64xf32, #tpu.memory_space<vmem>>) attributes {dimension_semantics = [#tpu.dimension_semantics<parallel>, #tpu.dimension_semantics<parallel>, #tpu.dimension_semantics<arbitrary>], iteration_bounds = array<i64: 1, 1, 1>, scalar_prefetch = 0 : i64, scratch_operands = 1 : i64, tpu.core_type = #tpu.core_type<tc>, window_params = [{transform_indices = @transform_0, window_bounds = array<i64: 16, 32>}, {transform_indices = @transform_1, window_bounds = array<i64: 32, 64>}, {transform_indices = @transform_2, window_bounds = array<i64: 1, 64>}, {transform_indices = @transform_3, window_bounds = array<i64: 16, 64>}]} {
    %c0_i32 = arith.constant 0 : i32
    %0 = arith.cmpi eq, %arg2, %c0_i32 : i32
    %1 = arith.extui %0 : i1 to i32
    %c0_i32_0 = arith.constant 0 : i32
    %2 = arith.cmpi ne, %1, %c0_i32_0 : i32
    scf.if %2 {
      %cst_10 = arith.constant 0.000000e+00 : f32
      %12 = vector.broadcast %cst_10 : f32 to vector<16x64xf32>
      %c0_11 = arith.constant 0 : index
      %c0_12 = arith.constant 0 : index
      %13 = vector.load %arg7[%c0_11, %c0_12] : memref<16x64xf32, #tpu.memory_space<vmem>>, vector<16x64xf32>
      tpu.vector_store %arg7[%c0_11, %c0_12], %12 {strides = array<i32>} : memref<16x64xf32, #tpu.memory_space<vmem>>, vector<16x64xf32>,
    } else {
    }
    %c0 = arith.constant 0 : index
    %c0_1 = arith.constant 0 : index
    %3 = vector.load %arg7[%c0, %c0_1] : memref<16x64xf32, #tpu.memory_space<vmem>>, vector<16x64xf32>
    %c0_2 = arith.constant 0 : index
    %c0_3 = arith.constant 0 : index
    %4 = vector.load %arg3[%c0_2, %c0_3] : memref<16x32xbf16, #tpu.memory_space<vmem>>, vector<16x32xbf16>
    %c0_4 = arith.constant 0 : index
    %c0_5 = arith.constant 0 : index
    %5 = vector.load %arg4[%c0_4, %c0_5] : memref<32x64xbf16, #tpu.memory_space<vmem>>, vector<32x64xbf16>
    %cst = arith.constant dense<0.000000e+00> : vector<16x64xf32>
    %6 = tpu.matmul %4, %5, %cst {dimension_numbers = #tpu.dot_dimension_numbers<[1], [0], [0], [1], [0, 0, 1, 1], [], []>} : vector<16x32xbf16>, vector<32x64xbf16>, vector<16x64xf32> -> vector<16x64xf32>
    %7 = arith.addf %3, %6 : vector<16x64xf32>
    %c0_6 = arith.constant 0 : index
    %c0_7 = arith.constant 0 : index
    %8 = vector.load %arg7[%c0_6, %c0_7] : memref<16x64xf32, #tpu.memory_space<vmem>>, vector<16x64xf32>
    tpu.vector_store %arg7[%c0_6, %c0_7], %7 {strides = array<i32>} : memref<16x64xf32, #tpu.memory_space<vmem>>, vector<16x64xf32>,
    %c0_i32_8 = arith.constant 0 : i32
    %9 = arith.cmpi eq, %arg2, %c0_i32_8 : i32
    %10 = arith.extui %9 : i1 to i32
    %c0_i32_9 = arith.constant 0 : i32
    %11 = arith.cmpi ne, %10, %c0_i32_9 : i32
    scf.if %11 {
      %c0_10 = arith.constant 0 : index
      %c0_11 = arith.constant 0 : index
      %12 = vector.load %arg7[%c0_10, %c0_11] : memref<16x64xf32, #tpu.memory_space<vmem>>, vector<16x64xf32>
      %c0_12 = arith.constant 0 : index
      %c0_13 = arith.constant 0 : index
      %13 = vector.load %arg5[%c0_12, %c0_13] : memref<1x64xf32, #tpu.memory_space<vmem>>, vector<1x64xf32>
      %14 = vector.broadcast %13 : vector<1x64xf32> to vector<16x64xf32>
      %15 = arith.addf %12, %14 : vector<16x64xf32>
      %16 = arith.truncf %15 : vector<16x64xf32> to vector<16x64xbf16>
      %c0_14 = arith.constant 0 : index
      %c0_15 = arith.constant 0 : index
      %17 = vector.load %arg6[%c0_14, %c0_15] : memref<16x64xbf16, #tpu.memory_space<vmem>>, vector<16x64xbf16>
      tpu.vector_store %arg6[%c0_14, %c0_15], %16 {strides = array<i32>} : memref<16x64xbf16, #tpu.memory_space<vmem>>, vector<16x64xbf16>,
    } else {
    }
    return
  }
  func.func @transform_0(%arg0: i32, %arg1: i32, %arg2: i32) -> (i32, i32) {
    %c0_i32 = arith.constant 0 : i32
    return %arg0, %arg2 : i32, i32
  }
  func.func @transform_1(%arg0: i32, %arg1: i32, %arg2: i32) -> (i32, i32) {
    %c0_i32 = arith.constant 0 : i32
    return %arg2, %arg1 : i32, i32
  }
  func.func @transform_2(%arg0: i32, %arg1: i32, %arg2: i32) -> (i32, i32) {
    %c0_i32 = arith.constant 0 : i32
    %c0_i32_0 = arith.constant 0 : i32
    return %c0_i32, %arg1 : i32, i32
  }
  func.func @transform_3(%arg0: i32, %arg1: i32, %arg2: i32) -> (i32, i32) {
    %c0_i32 = arith.constant 0 : i32
    return %arg0, %arg1 : i32, i32
  }
}

module attributes {stable_mosaic.version = 11 : i64} {
  func.func @_mha_kernel(%arg0: i32, %arg1: i32, %arg2: i32, %arg3: memref<2xi32, #tpu.memory_space<smem>>, %arg4: memref<1x1x8x8xbf16, #tpu.memory_space<vmem>>, %arg5: memref<1x1x8x8xbf16, #tpu.memory_space<vmem>>, %arg6: memref<1x1x8x8xbf16, #tpu.memory_space<vmem>>, %arg7: memref<1x1x8x8xbf16, #tpu.memory_space<vmem>>, %arg8: memref<8x1xf32, #tpu.memory_space<vmem>>, %arg9: memref<8x1xf32, #tpu.memory_space<vmem>>, %arg10: memref<8x8xf32, #tpu.memory_space<vmem>>) attributes {dimension_semantics = [#tpu.dimension_semantics<parallel>, #tpu.dimension_semantics<parallel>, #tpu.dimension_semantics<arbitrary>], iteration_bounds = array<i64: 2, 4, 1>, scalar_prefetch = 1 : i64, scratch_operands = 3 : i64, tpu.core_type = #tpu.core_type<tc>, window_params = [{transform_indices = @transform_0, window_bounds = array<i64: 1, 1, 8, 8>}, {transform_indices = @transform_1, window_bounds = array<i64: 1, 1, 8, 8>}, {transform_indices = @transform_2, window_bounds = array<i64: 1, 1, 8, 8>}, {transform_indices = @transform_3, window_bounds = array<i64: 1, 1, 8, 8>}]} {
    %0 = arith.index_cast %arg0 : i32 to index
    %1 = memref.load %arg3[%0] : memref<2xi32, #tpu.memory_space<smem>>
    %c0_i32 = arith.constant 0 : i32
    %2 = arith.cmpi eq, %arg2, %c0_i32 : i32
    %3 = arith.extui %2 : i1 to i32
    %c0_i32_0 = arith.constant 0 : i32
    %4 = arith.cmpi ne, %3, %c0_i32_0 : i32
    scf.if %4 {
      %cst_31 = arith.constant -1.000000e+09 : f32
      %51 = vector.broadcast %cst_31 : f32 to vector<8x1xf32>
      %c0_32 = arith.constant 0 : index
      %c0_33 = arith.constant 0 : index
      %52 = vector.load %arg8[%c0_32, %c0_33] : memref<8x1xf32, #tpu.memory_space<vmem>>, vector<8x1xf32>
      tpu.vector_store %arg8[%c0_32, %c0_33], %51 {strides = array<i32>} : memref<8x1xf32, #tpu.memory_space<vmem>>, vector<8x1xf32>,
      %cst_34 = arith.constant 0.000000e+00 : f32
      %53 = vector.broadcast %cst_34 : f32 to vector<8x1xf32>
      %c0_35 = arith.constant 0 : index
      %c0_36 = arith.constant 0 : index
      %54 = vector.load %arg9[%c0_35, %c0_36] : memref<8x1xf32, #tpu.memory_space<vmem>>, vector<8x1xf32>
      tpu.vector_store %arg9[%c0_35, %c0_36], %53 {strides = array<i32>} : memref<8x1xf32, #tpu.memory_space<vmem>>, vector<8x1xf32>,
      %cst_37 = arith.constant 0.000000e+00 : f32
      %55 = vector.broadcast %cst_37 : f32 to vector<8x8xf32>
      %c0_38 = arith.constant 0 : index
      %c0_39 = arith.constant 0 : index
      %56 = vector.load %arg10[%c0_38, %c0_39] : memref<8x8xf32, #tpu.memory_space<vmem>>, vector<8x8xf32>
      tpu.vector_store %arg10[%c0_38, %c0_39], %55 {strides = array<i32>} : memref<8x8xf32, #tpu.memory_space<vmem>>, vector<8x8xf32>,
    } else {
    }
    %c0 = arith.constant 0 : index
    %c0_1 = arith.constant 0 : index
    %c0_2 = arith.constant 0 : index
    %c0_3 = arith.constant 0 : index
    %5 = vector.load %arg4[%c0, %c0_1, %c0_2, %c0_3] : memref<1x1x8x8xbf16, #tpu.memory_space<vmem>>, vector<1x1x8x8xbf16>
    %6 = vector.shape_cast %5 : vector<1x1x8x8xbf16> to vector<8x8xbf16>
    %c0_4 = arith.constant 0 : index
    %c0_5 = arith.constant 0 : index
    %c0_6 = arith.constant 0 : index
    %c0_7 = arith.constant 0 : index
    %7 = vector.load %arg5[%c0_4, %c0_5, %c0_6, %c0_7] : memref<1x1x8x8xbf16, #tpu.memory_space<vmem>>, vector<1x1x8x8xbf16>
    %8 = vector.shape_cast %7 : vector<1x1x8x8xbf16> to vector<8x8xbf16>
    %c0_8 = arith.constant 0 : index
    %c0_9 = arith.constant 0 : index
    %c0_10 = arith.constant 0 : index
    %c0_11 = arith.constant 0 : index
    %9 = vector.load %arg6[%c0_8, %c0_9, %c0_10, %c0_11] : memref<1x1x8x8xbf16, #tpu.memory_space<vmem>>, vector<1x1x8x8xbf16>
    %10 = vector.shape_cast %9 : vector<1x1x8x8xbf16> to vector<8x8xbf16>
    %c8_i32 = arith.constant 8 : i32
    %11 = arith.muli %arg2, %c8_i32 : i32
    %12 = tpu.iota {dimensions = array<i32: 1>} : vector<8x8xi32>
    %13 = vector.broadcast %11 : i32 to vector<8x8xi32>
    %14 = arith.addi %13, %12 : vector<8x8xi32>
    %15 = vector.broadcast %1 : i32 to vector<8x8xi32>
    %16 = arith.cmpi slt, %14, %15 : vector<8x8xi32>
    %17 = tpu.iota {dimensions = array<i32: 0>} : vector<8x8xi32>
    %18 = arith.cmpi sle, %14, %17 : vector<8x8xi32>
    %19 = arith.andi %16, %18 : vector<8x8xi1>
    %cst = arith.constant dense<0.000000e+00> : vector<8x8xf32>
    %20 = tpu.matmul %6, %8, %cst {dimension_numbers = #tpu.dot_dimension_numbers<[1], [1], [0], [0], [0, 0, 1, 0], [], []>} : vector<8x8xbf16>, vector<8x8xbf16>, vector<8x8xf32> -> vector<8x8xf32>
    %cst_12 = arith.constant 0.353553385 : f32
    %21 = vector.broadcast %cst_12 : f32 to vector<8x8xf32>
    %22 = arith.mulf %20, %21 : vector<8x8xf32>
    %cst_13 = arith.constant -1.000000e+09 : f32
    %23 = vector.broadcast %cst_13 : f32 to vector<8x8xf32>
    %24 = arith.select %19, %22, %23 : vector<8x8xi1>, vector<8x8xf32>
    %c0_14 = arith.constant 0 : index
    %c0_15 = arith.constant 0 : index
    %25 = vector.load %arg8[%c0_14, %c0_15] : memref<8x1xf32, #tpu.memory_space<vmem>>, vector<8x1xf32>
    %cst_16 = arith.constant dense<0xFF800000> : vector<8xf32>
    %26 = vector.multi_reduction <maximumf>, %24, %cst_16 [1] : vector<8x8xf32> to vector<8xf32>
    %27 = vector.shape_cast %26 : vector<8xf32> to vector<8x1xf32>
    %28 = arith.maximumf %25, %27 : vector<8x1xf32>
    %29 = arith.subf %25, %28 : vector<8x1xf32>
    %30 = math.exp %29 : vector<8x1xf32>
    %31 = vector.broadcast %28 : vector<8x1xf32> to vector<8x8xf32>
    %32 = arith.subf %24, %31 : vector<8x8xf32>
    %33 = math.exp %32 : vector<8x8xf32>
    %c0_17 = arith.constant 0 : index
    %c0_18 = arith.constant 0 : index
    %34 = vector.load %arg9[%c0_17, %c0_18] : memref<8x1xf32, #tpu.memory_space<vmem>>, vector<8x1xf32>
    %35 = arith.mulf %30, %34 : vector<8x1xf32>
    %cst_19 = arith.constant dense<0.000000e+00> : vector<8xf32>
    %36 = vector.multi_reduction <add>, %33, %cst_19 [1] : vector<8x8xf32> to vector<8xf32>
    %37 = vector.shape_cast %36 : vector<8xf32> to vector<8x1xf32>
    %38 = arith.addf %35, %37 : vector<8x1xf32>
    %c0_20 = arith.constant 0 : index
    %c0_21 = arith.constant 0 : index
    %39 = vector.load %arg9[%c0_20, %c0_21] : memref<8x1xf32, #tpu.memory_space<vmem>>, vector<8x1xf32>
    tpu.vector_store %arg9[%c0_20, %c0_21], %38 {strides = array<i32>} : memref<8x1xf32, #tpu.memory_space<vmem>>, vector<8x1xf32>,
    %c0_22 = arith.constant 0 : index
    %c0_23 = arith.constant 0 : index
    %40 = vector.load %arg10[%c0_22, %c0_23] : memref<8x8xf32, #tpu.memory_space<vmem>>, vector<8x8xf32>
    %41 = vector.broadcast %30 : vector<8x1xf32> to vector<8x8xf32>
    %42 = arith.mulf %41, %40 : vector<8x8xf32>
    %43 = arith.truncf %33 : vector<8x8xf32> to vector<8x8xbf16>
    %cst_24 = arith.constant dense<0.000000e+00> : vector<8x8xf32>
    %44 = tpu.matmul %43, %10, %cst_24 {dimension_numbers = #tpu.dot_dimension_numbers<[1], [0], [0], [1], [0, 0, 1, 1], [], []>} : vector<8x8xbf16>, vector<8x8xbf16>, vector<8x8xf32> -> vector<8x8xf32>
    %45 = arith.addf %42, %44 : vector<8x8xf32>
    %c0_25 = arith.constant 0 : index
    %c0_26 = arith.constant 0 : index
    %46 = vector.load %arg10[%c0_25, %c0_26] : memref<8x8xf32, #tpu.memory_space<vmem>>, vector<8x8xf32>
    tpu.vector_store %arg10[%c0_25, %c0_26], %45 {strides = array<i32>} : memref<8x8xf32, #tpu.memory_space<vmem>>, vector<8x8xf32>,
    %c0_27 = arith.constant 0 : index
    %c0_28 = arith.constant 0 : index
    %47 = vector.load %arg8[%c0_27, %c0_28] : memref<8x1xf32, #tpu.memory_space<vmem>>, vector<8x1xf32>
    tpu.vector_store %arg8[%c0_27, %c0_28], %28 {strides = array<i32>} : memref<8x1xf32, #tpu.memory_space<vmem>>, vector<8x1xf32>,
    %c0_i32_29 = arith.constant 0 : i32
    %48 = arith.cmpi eq, %arg2, %c0_i32_29 : i32
    %49 = arith.extui %48 : i1 to i32
    %c0_i32_30 = arith.constant 0 : i32
    %50 = arith.cmpi ne, %49, %c0_i32_30 : i32
    scf.if %50 {
      %c0_31 = arith.constant 0 : index
      %c0_32 = arith.constant 0 : index
      %51 = vector.load %arg10[%c0_31, %c0_32] : memref<8x8xf32, #tpu.memory_space<vmem>>, vector<8x8xf32>
      %c0_33 = arith.constant 0 : index
      %c0_34 = arith.constant 0 : index
      %52 = vector.load %arg9[%c0_33, %c0_34] : memref<8x1xf32, #tpu.memory_space<vmem>>, vector<8x1xf32>
      %53 = vector.broadcast %52 : vector<8x1xf32> to vector<8x8xf32>
      %54 = arith.divf %51, %53 : vector<8x8xf32>
      %55 = arith.truncf %54 : vector<8x8xf32> to vector<8x8xbf16>
      %c0_35 = arith.constant 0 : index
      %c0_36 = arith.constant 0 : index
      %c0_37 = arith.constant 0 : index
      %c0_38 = arith.constant 0 : index
      %56 = vector.load %arg7[%c0_35, %c0_36, %c0_37, %c0_38] : memref<1x1x8x8xbf16, #tpu.memory_space<vmem>>, vector<1x1x8x8xbf16>
      %57 = vector.shape_cast %56 : vector<1x1x8x8xbf16> to vector<8x8xbf16>
      %58 = vector.shape_cast %55 : vector<8x8xbf16> to vector<1x1x8x8xbf16>
      tpu.vector_store %arg7[%c0_35, %c0_36, %c0_37, %c0_38], %58 {strides = array<i32>} : memref<1x1x8x8xbf16, #tpu.memory_space<vmem>>, vector<1x1x8x8xbf16>,
    } else {
    }
    return
  }
  func.func @transform_0(%arg0: i32, %arg1: i32, %arg2: i32, %arg3: memref<2xi32, #tpu.memory_space<smem>>) -> (i32, i32, i32, i32) {
    %c0_i32 = arith.constant 0 : i32
    %c0_i32_0 = arith.constant 0 : i32
    %c0_i32_1 = arith.constant 0 : i32
    return %arg0, %arg1, %c0_i32, %c0_i32_0 : i32, i32, i32, i32
  }
  func.func @transform_1(%arg0: i32, %arg1: i32, %arg2: i32, %arg3: memref<2xi32, #tpu.memory_space<smem>>) -> (i32, i32, i32, i32) {
    %c0_i32 = arith.constant 0 : i32
    %c0_i32_0 = arith.constant 0 : i32
    return %arg0, %arg1, %arg2, %c0_i32 : i32, i32, i32, i32
  }
  func.func @transform_2(%arg0: i32, %arg1: i32, %arg2: i32, %arg3: memref<2xi32, #tpu.memory_space<smem>>) -> (i32, i32, i32, i32) {
    %c0_i32 = arith.constant 0 : i32
    %c0_i32_0 = arith.constant 0 : i32
    return %arg0, %arg1, %arg2, %c0_i32 : i32, i32, i32, i32
  }
  func.func @transform_3(%arg0: i32, %arg1: i32, %arg2: i32, %arg3: memref<2xi32, #tpu.memory_space<smem>>) -> (i32, i32, i32, i32) {
    %c0_i32 = arith.constant 0 : i32
    %c0_i32_0 = arith.constant 0 : i32
    %c0_i32_1 = arith.constant 0 : i32
    return %arg0, %arg1, %c0_i32, %c0_i32_0 : i32, i32, i32, i32
  }
}

module attributes {stable_mosaic.version = 11 : i64} {
  func.func @_ln_matmul_kernel(%arg0: i32, %arg1: i32, %arg2: memref<16x32xbf16, #tpu.memory_space<vmem>>, %arg3: memref<1x32xf32, #tpu.memory_space<vmem>>, %arg4: memref<1x32xf32, #tpu.memory_space<vmem>>, %arg5: memref<32x32xbf16, #tpu.memory_space<vmem>>, %arg6: memref<1x32xf32, #tpu.memory_space<vmem>>, %arg7: memref<16x32xbf16, #tpu.memory_space<vmem>>, %arg8: memref<16x32xbf16, #tpu.memory_space<vmem>>) attributes {dimension_semantics = [#tpu.dimension_semantics<parallel>, #tpu.dimension_semantics<arbitrary>], iteration_bounds = array<i64: 1, 1>, scalar_prefetch = 0 : i64, scratch_operands = 1 : i64, tpu.core_type = #tpu.core_type<tc>, window_params = [{transform_indices = @transform_0, window_bounds = array<i64: 16, 32>}, {pipeline_mode = #tpu.pipeline_mode<synchronous>, transform_indices = @transform_1, window_bounds = array<i64: 1, 32>}, {pipeline_mode = #tpu.pipeline_mode<synchronous>, transform_indices = @transform_2, window_bounds = array<i64: 1, 32>}, {transform_indices = @transform_3, window_bounds = array<i64: 32, 32>}, {transform_indices = @transform_4, window_bounds = array<i64: 1, 32>}, {transform_indices = @transform_5, window_bounds = array<i64: 16, 32>}]} {
    %c0_i32 = arith.constant 0 : i32
    %0 = arith.cmpi eq, %arg1, %c0_i32 : i32
    %1 = arith.extui %0 : i1 to i32
    %c0_i32_0 = arith.constant 0 : i32
    %2 = arith.cmpi ne, %1, %c0_i32_0 : i32
    scf.if %2 {
      %c0_8 = arith.constant 0 : index
      %c0_9 = arith.constant 0 : index
      %11 = vector.load %arg2[%c0_8, %c0_9] : memref<16x32xbf16, #tpu.memory_space<vmem>>, vector<16x32xbf16>
      %12 = arith.extf %11 : vector<16x32xbf16> to vector<16x32xf32>
      %cst_10 = arith.constant dense<0.000000e+00> : vector<16xf32>
      %13 = vector.multi_reduction <add>, %12, %cst_10 [1] : vector<16x32xf32> to vector<16xf32>
      %14 = vector.shape_cast %13 : vector<16xf32> to vector<16x1xf32>
      %cst_11 = arith.constant 3.200000e+01 : f32
      %15 = vector.broadcast %cst_11 : f32 to vector<16x1xf32>
      %16 = arith.divf %14, %15 : vector<16x1xf32>
      %17 = vector.broadcast %16 : vector<16x1xf32> to vector<16x32xf32>
      %18 = arith.subf %12, %17 : vector<16x32xf32>
      %19 = arith.mulf %18, %18 : vector<16x32xf32>
      %cst_12 = arith.constant dense<0.000000e+00> : vector<16xf32>
      %20 = vector.multi_reduction <add>, %19, %cst_12 [1] : vector<16x32xf32> to vector<16xf32>
      %21 = vector.shape_cast %20 : vector<16xf32> to vector<16x1xf32>
      %cst_13 = arith.constant 3.200000e+01 : f32
      %22 = vector.broadcast %cst_13 : f32 to vector<16x1xf32>
      %23 = arith.divf %21, %22 : vector<16x1xf32>
      %24 = vector.broadcast %16 : vector<16x1xf32> to vector<16x32xf32>
      %25 = arith.subf %12, %24 : vector<16x32xf32>
      %cst_14 = arith.constant 9.99999974E-6 : f32
      %26 = vector.broadcast %cst_14 : f32 to vector<16x1xf32>
      %27 = arith.addf %23, %26 : vector<16x1xf32>
      %28 = math.rsqrt %27 : vector<16x1xf32>
      %29 = vector.broadcast %28 : vector<16x1xf32> to vector<16x32xf32>
      %30 = arith.mulf %25, %29 : vector<16x32xf32>
      %c0_15 = arith.constant 0 : index
      %c0_16 = arith.constant 0 : index
      %31 = vector.load %arg3[%c0_15, %c0_16] : memref<1x32xf32, #tpu.memory_space<vmem>>, vector<1x32xf32>
      %32 = vector.broadcast %31 : vector<1x32xf32> to vector<16x32xf32>
      %33 = arith.mulf %30, %32 : vector<16x32xf32>
      %c0_17 = arith.constant 0 : index
      %c0_18 = arith.constant 0 : index
      %34 = vector.load %arg4[%c0_17, %c0_18] : memref<1x32xf32, #tpu.memory_space<vmem>>, vector<1x32xf32>
      %35 = vector.broadcast %34 : vector<1x32xf32> to vector<16x32xf32>
      %36 = arith.addf %33, %35 : vector<16x32xf32>
      %37 = arith.truncf %36 : vector<16x32xf32> to vector<16x32xbf16>
      %c0_19 = arith.constant 0 : index
      %c0_20 = arith.constant 0 : index
      %38 = vector.load %arg8[%c0_19, %c0_20] : memref<16x32xbf16, #tpu.memory_space<vmem>>, vector<16x32xbf16>
      tpu.vector_store %arg8[%c0_19, %c0_20], %37 {strides = array<i32>} : memref<16x32xbf16, #tpu.memory_space<vmem>>, vector<16x32xbf16>,
    } else {
    }
    %c0 = arith.constant 0 : index
    %c0_1 = arith.constant 0 : index
    %3 = vector.load %arg8[%c0, %c0_1] : memref<16x32xbf16, #tpu.memory_space<vmem>>, vector<16x32xbf16>
    %c0_2 = arith.constant 0 : index
    %c0_3 = arith.constant 0 : index
    %4 = vector.load %arg5[%c0_2, %c0_3] : memref<32x32xbf16, #tpu.memory_space<vmem>>, vector<32x32xbf16>
    %cst = arith.constant dense<0.000000e+00> : vector<16x32xf32>
    %5 = tpu.matmul %3, %4, %cst {dimension_numbers = #tpu.dot_dimension_numbers<[1], [0], [0], [1], [0, 0, 1, 1], [], []>} : vector<16x32xbf16>, vector<32x32xbf16>, vector<16x32xf32> -> vector<16x32xf32>
    %c0_4 = arith.constant 0 : index
    %c0_5 = arith.constant 0 : index
    %6 = vector.load %arg6[%c0_4, %c0_5] : memref<1x32xf32, #tpu.memory_space<vmem>>, vector<1x32xf32>
    %7 = vector.broadcast %6 : vector<1x32xf32> to vector<16x32xf32>
    %8 = arith.addf %5, %7 : vector<16x32xf32>
    %9 = arith.truncf %8 : vector<16x32xf32> to vector<16x32xbf16>
    %c0_6 = arith.constant 0 : index
    %c0_7 = arith.constant 0 : index
    %10 = vector.load %arg7[%c0_6, %c0_7] : memref<16x32xbf16, #tpu.memory_space<vmem>>, vector<16x32xbf16>
    tpu.vector_store %arg7[%c0_6, %c0_7], %9 {strides = array<i32>} : memref<16x32xbf16, #tpu.memory_space<vmem>>, vector<16x32xbf16>,
    return
  }
  func.func @transform_0(%arg0: i32, %arg1: i32) -> (i32, i32) {
    %c0_i32 = arith.constant 0 : i32
    %c0_i32_0 = arith.constant 0 : i32
    return %arg0, %c0_i32 : i32, i32
  }
  func.func @transform_1(%arg0: i32, %arg1: i32) -> (i32, i32) {
    %c0_i32 = arith.constant 0 : i32
    %c0_i32_0 = arith.constant 0 : i32
    %c0_i32_1 = arith.constant 0 : i32
    return %c0_i32, %c0_i32_0 : i32, i32
  }
  func.func @transform_2(%arg0: i32, %arg1: i32) -> (i32, i32) {
    %c0_i32 = arith.constant 0 : i32
    %c0_i32_0 = arith.constant 0 : i32
    %c0_i32_1 = arith.constant 0 : i32
    return %c0_i32, %c0_i32_0 : i32, i32
  }
  func.func @transform_3(%arg0: i32, %arg1: i32) -> (i32, i32) {
    %c0_i32 = arith.constant 0 : i32
    %c0_i32_0 = arith.constant 0 : i32
    return %c0_i32, %arg1 : i32, i32
  }
  func.func @transform_4(%arg0: i32, %arg1: i32) -> (i32, i32) {
    %c0_i32 = arith.constant 0 : i32
    %c0_i32_0 = arith.constant 0 : i32
    return %c0_i32, %arg1 : i32, i32
  }
  func.func @transform_5(%arg0: i32, %arg1: i32) -> (i32, i32) {
    %c0_i32 = arith.constant 0 : i32
    return %arg0, %arg1 : i32, i32
  }
}

module attributes {stable_mosaic.version = 11 : i64} {
  func.func @_mha_kernel(%arg0: i32, %arg1: i32, %arg2: i32, %arg3: memref<2xi32, #tpu.memory_space<smem>>, %arg4: memref<1x1x8x8xbf16, #tpu.memory_space<vmem>>, %arg5: memref<1x1x7x8xbf16, #tpu.memory_space<vmem>>, %arg6: memref<1x1x7x8xbf16, #tpu.memory_space<vmem>>, %arg7: memref<1x1x8x8xbf16, #tpu.memory_space<vmem>>, %arg8: memref<8x1xf32, #tpu.memory_space<vmem>>, %arg9: memref<8x1xf32, #tpu.memory_space<vmem>>, %arg10: memref<8x8xf32, #tpu.memory_space<vmem>>) attributes {dimension_semantics = [#tpu.dimension_semantics<parallel>, #tpu.dimension_semantics<parallel>, #tpu.dimension_semantics<arbitrary>], iteration_bounds = array<i64: 2, 4, 1>, scalar_prefetch = 1 : i64, scratch_operands = 3 : i64, tpu.core_type = #tpu.core_type<tc>, window_params = [{transform_indices = @transform_0, window_bounds = array<i64: 1, 1, 8, 8>}, {transform_indices = @transform_1, window_bounds = array<i64: 1, 1, 7, 8>}, {transform_indices = @transform_2, window_bounds = array<i64: 1, 1, 7, 8>}, {transform_indices = @transform_3, window_bounds = array<i64: 1, 1, 8, 8>}]} {
    %0 = arith.index_cast %arg0 : i32 to index
    %1 = memref.load %arg3[%0] : memref<2xi32, #tpu.memory_space<smem>>
    %c0_i32 = arith.constant 0 : i32
    %2 = arith.cmpi eq, %arg2, %c0_i32 : i32
    %3 = arith.extui %2 : i1 to i32
    %c0_i32_0 = arith.constant 0 : i32
    %4 = arith.cmpi ne, %3, %c0_i32_0 : i32
    scf.if %4 {
      %cst_31 = arith.constant -1.000000e+09 : f32
      %48 = vector.broadcast %cst_31 : f32 to vector<8x1xf32>
      %c0_32 = arith.constant 0 : index
      %c0_33 = arith.constant 0 : index
      %49 = vector.load %arg8[%c0_32, %c0_33] : memref<8x1xf32, #tpu.memory_space<vmem>>, vector<8x1xf32>
      tpu.vector_store %arg8[%c0_32, %c0_33], %48 {strides = array<i32>} : memref<8x1xf32, #tpu.memory_space<vmem>>, vector<8x1xf32>,
      %cst_34 = arith.constant 0.000000e+00 : f32
      %50 = vector.broadcast %cst_34 : f32 to vector<8x1xf32>
      %c0_35 = arith.constant 0 : index
      %c0_36 = arith.constant 0 : index
      %51 = vector.load %arg9[%c0_35, %c0_36] : memref<8x1xf32, #tpu.memory_space<vmem>>, vector<8x1xf32>
      tpu.vector_store %arg9[%c0_35, %c0_36], %50 {strides = array<i32>} : memref<8x1xf32, #tpu.memory_space<vmem>>, vector<8x1xf32>,
      %cst_37 = arith.constant 0.000000e+00 : f32
      %52 = vector.broadcast %cst_37 : f32 to vector<8x8xf32>
      %c0_38 = arith.constant 0 : index
      %c0_39 = arith.constant 0 : index
      %53 = vector.load %arg10[%c0_38, %c0_39] : memref<8x8xf32, #tpu.memory_space<vmem>>, vector<8x8xf32>
      tpu.vector_store %arg10[%c0_38, %c0_39], %52 {strides = array<i32>} : memref<8x8xf32, #tpu.memory_space<vmem>>, vector<8x8xf32>,
    } else {
    }
    %c0 = arith.constant 0 : index
    %c0_1 = arith.constant 0 : index
    %c0_2 = arith.constant 0 : index
    %c0_3 = arith.constant 0 : index
    %5 = vector.load %arg4[%c0, %c0_1, %c0_2, %c0_3] : memref<1x1x8x8xbf16, #tpu.memory_space<vmem>>, vector<1x1x8x8xbf16>
    %6 = vector.shape_cast %5 : vector<1x1x8x8xbf16> to vector<8x8xbf16>
    %c0_4 = arith.constant 0 : index
    %c0_5 = arith.constant 0 : index
    %c0_6 = arith.constant 0 : index
    %c0_7 = arith.constant 0 : index
    %7 = vector.load %arg5[%c0_4, %c0_5, %c0_6, %c0_7] : memref<1x1x7x8xbf16, #tpu.memory_space<vmem>>, vector<1x1x7x8xbf16>
    %8 = vector.shape_cast %7 : vector<1x1x7x8xbf16> to vector<7x8xbf16>
    %c0_8 = arith.constant 0 : index
    %c0_9 = arith.constant 0 : index
    %c0_10 = arith.constant 0 : index
    %c0_11 = arith.constant 0 : index
    %9 = vector.load %arg6[%c0_8, %c0_9, %c0_10, %c0_11] : memref<1x1x7x8xbf16, #tpu.memory_space<vmem>>, vector<1x1x7x8xbf16>
    %10 = vector.shape_cast %9 : vector<1x1x7x8xbf16> to vector<7x8xbf16>
    %c7_i32 = arith.constant 7 : i32
    %11 = arith.muli %arg2, %c7_i32 : i32
    %12 = tpu.iota {dimensions = array<i32: 1>} : vector<8x7xi32>
    %13 = vector.broadcast %11 : i32 to vector<8x7xi32>
    %14 = arith.addi %13, %12 : vector<8x7xi32>
    %15 = vector.broadcast %1 : i32 to vector<8x7xi32>
    %16 = arith.cmpi slt, %14, %15 : vector<8x7xi32>
    %cst = arith.constant dense<0.000000e+00> : vector<8x7xf32>
    %17 = tpu.matmul %6, %8, %cst {dimension_numbers = #tpu.dot_dimension_numbers<[1], [1], [0], [0], [0, 0, 1, 0], [], []>} : vector<8x8xbf16>, vector<7x8xbf16>, vector<8x7xf32> -> vector<8x7xf32>
    %cst_12 = arith.constant 0.353553385 : f32
    %18 = vector.broadcast %cst_12 : f32 to vector<8x7xf32>
    %19 = arith.mulf %17, %18 : vector<8x7xf32>
    %cst_13 = arith.constant -1.000000e+09 : f32
    %20 = vector.broadcast %cst_13 : f32 to vector<8x7xf32>
    %21 = arith.select %16, %19, %20 : vector<8x7xi1>, vector<8x7xf32>
    %c0_14 = arith.constant 0 : index
    %c0_15 = arith.constant 0 : index
    %22 = vector.load %arg8[%c0_14, %c0_15] : memref<8x1xf32, #tpu.memory_space<vmem>>, vector<8x1xf32>
    %cst_16 = arith.constant dense<0xFF800000> : vector<8xf32>
    %23 = vector.multi_reduction <maximumf>, %21, %cst_16 [1] : vector<8x7xf32> to vector<8xf32>
    %24 = vector.shape_cast %23 : vector<8xf32> to vector<8x1xf32>
    %25 = arith.maximumf %22, %24 : vector<8x1xf32>
    %26 = arith.subf %22, %25 : vector<8x1xf32>
    %27 = math.exp %26 : vector<8x1xf32>
    %28 = vector.broadcast %25 : vector<8x1xf32> to vector<8x7xf32>
    %29 = arith.subf %21, %28 : vector<8x7xf32>
    %30 = math.exp %29 : vector<8x7xf32>
    %c0_17 = arith.constant 0 : index
    %c0_18 = arith.constant 0 : index
    %31 = vector.load %arg9[%c0_17, %c0_18] : memref<8x1xf32, #tpu.memory_space<vmem>>, vector<8x1xf32>
    %32 = arith.mulf %27, %31 : vector<8x1xf32>
    %cst_19 = arith.constant dense<0.000000e+00> : vector<8xf32>
    %33 = vector.multi_reduction <add>, %30, %cst_19 [1] : vector<8x7xf32> to vector<8xf32>
    %34 = vector.shape_cast %33 : vector<8xf32> to vector<8x1xf32>
    %35 = arith.addf %32, %34 : vector<8x1xf32>
    %c0_20 = arith.constant 0 : index
    %c0_21 = arith.constant 0 : index
    %36 = vector.load %arg9[%c0_20, %c0_21] : memref<8x1xf32, #tpu.memory_space<vmem>>, vector<8x1xf32>
    tpu.vector_store %arg9[%c0_20, %c0_21], %35 {strides = array<i32>} : memref<8x1xf32, #tpu.memory_space<vmem>>, vector<8x1xf32>,
    %c0_22 = arith.constant 0 : index
    %c0_23 = arith.constant 0 : index
    %37 = vector.load %arg10[%c0_22, %c0_23] : memref<8x8xf32, #tpu.memory_space<vmem>>, vector<8x8xf32>
    %38 = vector.broadcast %27 : vector<8x1xf32> to vector<8x8xf32>
    %39 = arith.mulf %38, %37 : vector<8x8xf32>
    %40 = arith.truncf %30 : vector<8x7xf32> to vector<8x7xbf16>
    %cst_24 = arith.constant dense<0.000000e+00> : vector<8x8xf32>
    %41 = tpu.matmul %40, %10, %cst_24 {dimension_numbers = #tpu.dot_dimension_numbers<[1], [0], [0], [1], [0, 0, 1, 1], [], []>} : vector<8x7xbf16>, vector<7x8xbf16>, vector<8x8xf32> -> vector<8x8xf32>
    %42 = arith.addf %39, %41 : vector<8x8xf32>
    %c0_25 = arith.constant 0 : index
    %c0_26 = arith.constant 0 : index
    %43 = vector.load %arg10[%c0_25, %c0_26] : memref<8x8xf32, #tpu.memory_space<vmem>>, vector<8x8xf32>
    tpu.vector_store %arg10[%c0_25, %c0_26], %42 {strides = array<i32>} : memref<8x8xf32, #tpu.memory_space<vmem>>, vector<8x8xf32>,
    %c0_27 = arith.constant 0 : index
    %c0_28 = arith.constant 0 : index
    %44 = vector.load %arg8[%c0_27, %c0_28] : memref<8x1xf32, #tpu.memory_space<vmem>>, vector<8x1xf32>
    tpu.vector_store %arg8[%c0_27, %c0_28], %25 {strides = array<i32>} : memref<8x1xf32, #tpu.memory_space<vmem>>, vector<8x1xf32>,
    %c0_i32_29 = arith.constant 0 : i32
    %45 = arith.cmpi eq, %arg2, %c0_i32_29 : i32
    %46 = arith.extui %45 : i1 to i32
    %c0_i32_30 = arith.constant 0 : i32
    %47 = arith.cmpi ne, %46, %c0_i32_30 : i32
    scf.if %47 {
      %c0_31 = arith.constant 0 : index
      %c0_32 = arith.constant 0 : index
      %48 = vector.load %arg10[%c0_31, %c0_32] : memref<8x8xf32, #tpu.memory_space<vmem>>, vector<8x8xf32>
      %c0_33 = arith.constant 0 : index
      %c0_34 = arith.constant 0 : index
      %49 = vector.load %arg9[%c0_33, %c0_34] : memref<8x1xf32, #tpu.memory_space<vmem>>, vector<8x1xf32>
      %50 = vector.broadcast %49 : vector<8x1xf32> to vector<8x8xf32>
      %51 = arith.divf %48, %50 : vector<8x8xf32>
      %52 = arith.truncf %51 : vector<8x8xf32> to vector<8x8xbf16>
      %c0_35 = arith.constant 0 : index
      %c0_36 = arith.constant 0 : index
      %c0_37 = arith.constant 0 : index
      %c0_38 = arith.constant 0 : index
      %53 = vector.load %arg7[%c0_35, %c0_36, %c0_37, %c0_38] : memref<1x1x8x8xbf16, #tpu.memory_space<vmem>>, vector<1x1x8x8xbf16>
      %54 = vector.shape_cast %53 : vector<1x1x8x8xbf16> to vector<8x8xbf16>
      %55 = vector.shape_cast %52 : vector<8x8xbf16> to vector<1x1x8x8xbf16>
      tpu.vector_store %arg7[%c0_35, %c0_36, %c0_37, %c0_38], %55 {strides = array<i32>} : memref<1x1x8x8xbf16, #tpu.memory_space<vmem>>, vector<1x1x8x8xbf16>,
    } else {
    }
    return
  }
  func.func @transform_0(%arg0: i32, %arg1: i32, %arg2: i32, %arg3: memref<2xi32, #tpu.memory_space<smem>>) -> (i32, i32, i32, i32) {
    %c0_i32 = arith.constant 0 : i32
    %c0_i32_0 = arith.constant 0 : i32
    %c0_i32_1 = arith.constant 0 : i32
    return %arg0, %arg1, %c0_i32, %c0_i32_0 : i32, i32, i32, i32
  }
  func.func @transform_1(%arg0: i32, %arg1: i32, %arg2: i32, %arg3: memref<2xi32, #tpu.memory_space<smem>>) -> (i32, i32, i32, i32) {
    %c0_i32 = arith.constant 0 : i32
    %c0_i32_0 = arith.constant 0 : i32
    return %arg0, %arg1, %arg2, %c0_i32 : i32, i32, i32, i32
  }
  func.func @transform_2(%arg0: i32, %arg1: i32, %arg2: i32, %arg3: memref<2xi32, #tpu.memory_space<smem>>) -> (i32, i32, i32, i32) {
    %c0_i32 = arith.constant 0 : i32
    %c0_i32_0 = arith.constant 0 : i32
    return %arg0, %arg1, %arg2, %c0_i32 : i32, i32, i32, i32
  }
  func.func @transform_3(%arg0: i32, %arg1: i32, %arg2: i32, %arg3: memref<2xi32, #tpu.memory_space<smem>>) -> (i32, i32, i32, i32) {
    %c0_i32 = arith.constant 0 : i32
    %c0_i32_0 = arith.constant 0 : i32
    %c0_i32_1 = arith.constant 0 : i32
    return %arg0, %arg1, %c0_i32, %c0_i32_0 : i32, i32, i32, i32
  }
}

module attributes {stable_mosaic.version = 11 : i64} {
  func.func @_ln_matmul_kernel(%arg0: i32, %arg1: i32, %arg2: memref<16x32xbf16, #tpu.memory_space<vmem>>, %arg3: memref<1x32xf32, #tpu.memory_space<vmem>>, %arg4: memref<1x32xf32, #tpu.memory_space<vmem>>, %arg5: memref<32x64xbf16, #tpu.memory_space<vmem>>, %arg6: memref<1x64xf32, #tpu.memory_space<vmem>>, %arg7: memref<16x64xbf16, #tpu.memory_space<vmem>>, %arg8: memref<16x32xbf16, #tpu.memory_space<vmem>>) attributes {dimension_semantics = [#tpu.dimension_semantics<parallel>, #tpu.dimension_semantics<arbitrary>], iteration_bounds = array<i64: 1, 1>, scalar_prefetch = 0 : i64, scratch_operands = 1 : i64, tpu.core_type = #tpu.core_type<tc>, window_params = [{transform_indices = @transform_0, window_bounds = array<i64: 16, 32>}, {pipeline_mode = #tpu.pipeline_mode<synchronous>, transform_indices = @transform_1, window_bounds = array<i64: 1, 32>}, {pipeline_mode = #tpu.pipeline_mode<synchronous>, transform_indices = @transform_2, window_bounds = array<i64: 1, 32>}, {transform_indices = @transform_3, window_bounds = array<i64: 32, 64>}, {transform_indices = @transform_4, window_bounds = array<i64: 1, 64>}, {transform_indices = @transform_5, window_bounds = array<i64: 16, 64>}]} {
    %c0_i32 = arith.constant 0 : i32
    %0 = arith.cmpi eq, %arg1, %c0_i32 : i32
    %1 = arith.extui %0 : i1 to i32
    %c0_i32_0 = arith.constant 0 : i32
    %2 = arith.cmpi ne, %1, %c0_i32_0 : i32
    scf.if %2 {
      %c0_9 = arith.constant 0 : index
      %c0_10 = arith.constant 0 : index
      %13 = vector.load %arg2[%c0_9, %c0_10] : memref<16x32xbf16, #tpu.memory_space<vmem>>, vector<16x32xbf16>
      %14 = arith.extf %13 : vector<16x32xbf16> to vector<16x32xf32>
      %cst_11 = arith.constant dense<0.000000e+00> : vector<16xf32>
      %15 = vector.multi_reduction <add>, %14, %cst_11 [1] : vector<16x32xf32> to vector<16xf32>
      %16 = vector.shape_cast %15 : vector<16xf32> to vector<16x1xf32>
      %cst_12 = arith.constant 3.200000e+01 : f32
      %17 = vector.broadcast %cst_12 : f32 to vector<16x1xf32>
      %18 = arith.divf %16, %17 : vector<16x1xf32>
      %19 = vector.broadcast %18 : vector<16x1xf32> to vector<16x32xf32>
      %20 = arith.subf %14, %19 : vector<16x32xf32>
      %21 = arith.mulf %20, %20 : vector<16x32xf32>
      %cst_13 = arith.constant dense<0.000000e+00> : vector<16xf32>
      %22 = vector.multi_reduction <add>, %21, %cst_13 [1] : vector<16x32xf32> to vector<16xf32>
      %23 = vector.shape_cast %22 : vector<16xf32> to vector<16x1xf32>
      %cst_14 = arith.constant 3.200000e+01 : f32
      %24 = vector.broadcast %cst_14 : f32 to vector<16x1xf32>
      %25 = arith.divf %23, %24 : vector<16x1xf32>
      %26 = vector.broadcast %18 : vector<16x1xf32> to vector<16x32xf32>
      %27 = arith.subf %14, %26 : vector<16x32xf32>
      %cst_15 = arith.constant 9.99999974E-6 : f32
      %28 = vector.broadcast %cst_15 : f32 to vector<16x1xf32>
      %29 = arith.addf %25, %28 : vector<16x1xf32>
      %30 = math.rsqrt %29 : vector<16x1xf32>
      %31 = vector.broadcast %30 : vector<16x1xf32> to vector<16x32xf32>
      %32 = arith.mulf %27, %31 : vector<16x32xf32>
      %c0_16 = arith.constant 0 : index
      %c0_17 = arith.constant 0 : index
      %33 = vector.load %arg3[%c0_16, %c0_17] : memref<1x32xf32, #tpu.memory_space<vmem>>, vector<1x32xf32>
      %34 = vector.broadcast %33 : vector<1x32xf32> to vector<16x32xf32>
      %35 = arith.mulf %32, %34 : vector<16x32xf32>
      %c0_18 = arith.constant 0 : index
      %c0_19 = arith.constant 0 : index
      %36 = vector.load %arg4[%c0_18, %c0_19] : memref<1x32xf32, #tpu.memory_space<vmem>>, vector<1x32xf32>
      %37 = vector.broadcast %36 : vector<1x32xf32> to vector<16x32xf32>
      %38 = arith.addf %35, %37 : vector<16x32xf32>
      %39 = arith.truncf %38 : vector<16x32xf32> to vector<16x32xbf16>
      %c0_20 = arith.constant 0 : index
      %c0_21 = arith.constant 0 : index
      %40 = vector.load %arg8[%c0_20, %c0_21] : memref<16x32xbf16, #tpu.memory_space<vmem>>, vector<16x32xbf16>
      tpu.vector_store %arg8[%c0_20, %c0_21], %39 {strides = array<i32>} : memref<16x32xbf16, #tpu.memory_space<vmem>>, vector<16x32xbf16>,
    } else {
    }
    %c0 = arith.constant 0 : index
    %c0_1 = arith.constant 0 : index
    %3 = vector.load %arg8[%c0, %c0_1] : memref<16x32xbf16, #tpu.memory_space<vmem>>, vector<16x32xbf16>
    %c0_2 = arith.constant 0 : index
    %c0_3 = arith.constant 0 : index
    %4 = vector.load %arg5[%c0_2, %c0_3] : memref<32x64xbf16, #tpu.memory_space<vmem>>, vector<32x64xbf16>
    %cst = arith.constant dense<0.000000e+00> : vector<16x64xf32>
    %5 = tpu.matmul %3, %4, %cst {dimension_numbers = #tpu.dot_dimension_numbers<[1], [0], [0], [1], [0, 0, 1, 1], [], []>} : vector<16x32xbf16>, vector<32x64xbf16>, vector<16x64xf32> -> vector<16x64xf32>
    %c0_4 = arith.constant 0 : index
    %c0_5 = arith.constant 0 : index
    %6 = vector.load %arg6[%c0_4, %c0_5] : memref<1x64xf32, #tpu.memory_space<vmem>>, vector<1x64xf32>
    %7 = vector.broadcast %6 : vector<1x64xf32> to vector<16x64xf32>
    %8 = arith.addf %5, %7 : vector<16x64xf32>
    %cst_6 = arith.constant 0.000000e+00 : f32
    %9 = vector.broadcast %cst_6 : f32 to vector<16x64xf32>
    %10 = arith.maximumf %8, %9 : vector<16x64xf32>
    %11 = arith.truncf %10 : vector<16x64xf32> to vector<16x64xbf16>
    %c0_7 = arith.constant 0 : index
    %c0_8 = arith.constant 0 : index
    %12 = vector.load %arg7[%c0_7, %c0_8] : memref<16x64xbf16, #tpu.memory_space<vmem>>, vector<16x64xbf16>
    tpu.vector_store %arg7[%c0_7, %c0_8], %11 {strides = array<i32>} : memref<16x64xbf16, #tpu.memory_space<vmem>>, vector<16x64xbf16>,
    return
  }
  func.func @transform_0(%arg0: i32, %arg1: i32) -> (i32, i32) {
    %c0_i32 = arith.constant 0 : i32
    %c0_i32_0 = arith.constant 0 : i32
    return %arg0, %c0_i32 : i32, i32
  }
  func.func @transform_1(%arg0: i32, %arg1: i32) -> (i32, i32) {
    %c0_i32 = arith.constant 0 : i32
    %c0_i32_0 = arith.constant 0 : i32
    %c0_i32_1 = arith.constant 0 : i32
    return %c0_i32, %c0_i32_0 : i32, i32
  }
  func.func @transform_2(%arg0: i32, %arg1: i32) -> (i32, i32) {
    %c0_i32 = arith.constant 0 : i32
    %c0_i32_0 = arith.constant 0 : i32
    %c0_i32_1 = arith.constant 0 : i32
    return %c0_i32, %c0_i32_0 : i32, i32
  }
  func.func @transform_3(%arg0: i32, %arg1: i32) -> (i32, i32) {
    %c0_i32 = arith.constant 0 : i32
    %c0_i32_0 = arith.constant 0 : i32
    return %c0_i32, %arg1 : i32, i32
  }
  func.func @transform_4(%arg0: i32, %arg1: i32) -> (i32, i32) {
    %c0_i32 = arith.constant 0 : i32
    %c0_i32_0 = arith.constant 0 : i32
    return %c0_i32, %arg1 : i32, i32
  }
  func.func @transform_5(%arg0: i32, %arg1: i32) -> (i32, i32) {
    %c0_i32 = arith.constant 0 : i32
    return %arg0, %arg1 : i32, i32
  }
}

module attributes {stable_mosaic.version = 11 : i64} {
  func.func @_matmul_kernel(%arg0: i32, %arg1: i32, %arg2: i32, %arg3: memref<16x64xbf16, #tpu.memory_space<vmem>>, %arg4: memref<64x32xbf16, #tpu.memory_space<vmem>>, %arg5: memref<1x32xf32, #tpu.memory_space<vmem>>, %arg6: memref<16x32xbf16, #tpu.memory_space<vmem>>, %arg7: memref<16x32xbf16, #tpu.memory_space<vmem>>, %arg8: memref<16x32xf32, #tpu.memory_space<vmem>>) attributes {dimension_semantics = [#tpu.dimension_semantics<parallel>, #tpu.dimension_semantics<parallel>, #tpu.dimension_semantics<arbitrary>], iteration_bounds = array<i64: 1, 1, 1>, scalar_prefetch = 0 : i64, scratch_operands = 1 : i64, tpu.core_type = #tpu.core_type<tc>, window_params = [{transform_indices = @transform_0, window_bounds = array<i64: 16, 64>}, {transform_indices = @transform_1, window_bounds = array<i64: 64, 32>}, {transform_indices = @transform_2, window_bounds = array<i64: 1, 32>}, {transform_indices = @transform_3, window_bounds = array<i64: 16, 32>}, {transform_indices = @transform_4, window_bounds = array<i64: 16, 32>}]} {
    %c0_i32 = arith.constant 0 : i32
    %0 = arith.cmpi eq, %arg2, %c0_i32 : i32
    %1 = arith.extui %0 : i1 to i32
    %c0_i32_0 = arith.constant 0 : i32
    %2 = arith.cmpi ne, %1, %c0_i32_0 : i32
    scf.if %2 {
      %cst_10 = arith.constant 0.000000e+00 : f32
      %12 = vector.broadcast %cst_10 : f32 to vector<16x32xf32>
      %c0_11 = arith.constant 0 : index
      %c0_12 = arith.constant 0 : index
      %13 = vector.load %arg8[%c0_11, %c0_12] : memref<16x32xf32, #tpu.memory_space<vmem>>, vector<16x32xf32>
      tpu.vector_store %arg8[%c0_11, %c0_12], %12 {strides = array<i32>} : memref<16x32xf32, #tpu.memory_space<vmem>>, vector<16x32xf32>,
    } else {
    }
    %c0 = arith.constant 0 : index
    %c0_1 = arith.constant 0 : index
    %3 = vector.load %arg8[%c0, %c0_1] : memref<16x32xf32, #tpu.memory_space<vmem>>, vector<16x32xf32>
    %c0_2 = arith.constant 0 : index
    %c0_3 = arith.constant 0 : index
    %4 = vector.load %arg3[%c0_2, %c0_3] : memref<16x64xbf16, #tpu.memory_space<vmem>>, vector<16x64xbf16>
    %c0_4 = arith.constant 0 : index
    %c0_5 = arith.constant 0 : index
    %5 = vector.load %arg4[%c0_4, %c0_5] : memref<64x32xbf16, #tpu.memory_space<vmem>>, vector<64x32xbf16>
    %cst = arith.constant dense<0.000000e+00> : vector<16x32xf32>
    %6 = tpu.matmul %4, %5, %cst {dimension_numbers = #tpu.dot_dimension_numbers<[1], [0], [0], [1], [0, 0, 1, 1], [], []>} : vector<16x64xbf16>, vector<64x32xbf16>, vector<16x32xf32> -> vector<16x32xf32>
    %7 = arith.addf %3, %6 : vector<16x32xf32>
    %c0_6 = arith.constant 0 : index
    %c0_7 = arith.constant 0 : index
    %8 = vector.load %arg8[%c0_6, %c0_7] : memref<16x32xf32, #tpu.memory_space<vmem>>, vector<16x32xf32>
    tpu.vector_store %arg8[%c0_6, %c0_7], %7 {strides = array<i32>} : memref<16x32xf32, #tpu.memory_space<vmem>>, vector<16x32xf32>,
    %c0_i32_8 = arith.constant 0 : i32
    %9 = arith.cmpi eq, %arg2, %c0_i32_8 : i32
    %10 = arith.extui %9 : i1 to i32
    %c0_i32_9 = arith.constant 0 : i32
    %11 = arith.cmpi ne, %10, %c0_i32_9 : i32
    scf.if %11 {
      %c0_10 = arith.constant 0 : index
      %c0_11 = arith.constant 0 : index
      %12 = vector.load %arg8[%c0_10, %c0_11] : memref<16x32xf32, #tpu.memory_space<vmem>>, vector<16x32xf32>
      %c0_12 = arith.constant 0 : index
      %c0_13 = arith.constant 0 : index
      %13 = vector.load %arg5[%c0_12, %c0_13] : memref<1x32xf32, #tpu.memory_space<vmem>>, vector<1x32xf32>
      %14 = vector.broadcast %13 : vector<1x32xf32> to vector<16x32xf32>
      %15 = arith.addf %12, %14 : vector<16x32xf32>
      %c0_14 = arith.constant 0 : index
      %c0_15 = arith.constant 0 : index
      %16 = vector.load %arg6[%c0_14, %c0_15] : memref<16x32xbf16, #tpu.memory_space<vmem>>, vector<16x32xbf16>
      %17 = arith.extf %16 : vector<16x32xbf16> to vector<16x32xf32>
      %18 = arith.addf %15, %17 : vector<16x32xf32>
      %19 = arith.truncf %18 : vector<16x32xf32> to vector<16x32xbf16>
      %c0_16 = arith.constant 0 : index
      %c0_17 = arith.constant 0 : index
      %20 = vector.load %arg7[%c0_16, %c0_17] : memref<16x32xbf16, #tpu.memory_space<vmem>>, vector<16x32xbf16>
      tpu.vector_store %arg7[%c0_16, %c0_17], %19 {strides = array<i32>} : memref<16x32xbf16, #tpu.memory_space<vmem>>, vector<16x32xbf16>,
    } else {
    }
    return
  }
  func.func @transform_0(%arg0: i32, %arg1: i32, %arg2: i32) -> (i32, i32) {
    %c0_i32 = arith.constant 0 : i32
    return %arg0, %arg2 : i32, i32
  }
  func.func @transform_1(%arg0: i32, %arg1: i32, %arg2: i32) -> (i32, i32) {
    %c0_i32 = arith.constant 0 : i32
    return %arg2, %arg1 : i32, i32
  }
  func.func @transform_2(%arg0: i32, %arg1: i32, %arg2: i32) -> (i32, i32) {
    %c0_i32 = arith.constant 0 : i32
    %c0_i32_0 = arith.constant 0 : i32
    return %c0_i32, %arg1 : i32, i32
  }
  func.func @transform_3(%arg0: i32, %arg1: i32, %arg2: i32) -> (i32, i32) {
    %c0_i32 = arith.constant 0 : i32
    return %arg0, %arg1 : i32, i32
  }
  func.func @transform_4(%arg0: i32, %arg1: i32, %arg2: i32) -> (i32, i32) {
    %c0_i32 = arith.constant 0 : i32
    return %arg0, %arg1 : i32, i32
  }
}

module attributes {stable_mosaic.version = 11 : i64} {
  func.func @_ln_matmul_kernel(%arg0: i32, %arg1: i32, %arg2: memref<16x32xbf16, #tpu.memory_space<vmem>>, %arg3: memref<1x32xf32, #tpu.memory_space<vmem>>, %arg4: memref<1x32xf32, #tpu.memory_space<vmem>>, %arg5: memref<32x16xbf16, #tpu.memory_space<vmem>>, %arg6: memref<1x16xf32, #tpu.memory_space<vmem>>, %arg7: memref<16x16xf32, #tpu.memory_space<vmem>>, %arg8: memref<16x32xbf16, #tpu.memory_space<vmem>>) attributes {dimension_semantics = [#tpu.dimension_semantics<parallel>, #tpu.dimension_semantics<arbitrary>], iteration_bounds = array<i64: 1, 1>, scalar_prefetch = 0 : i64, scratch_operands = 1 : i64, tpu.core_type = #tpu.core_type<tc>, window_params = [{transform_indices = @transform_0, window_bounds = array<i64: 16, 32>}, {pipeline_mode = #tpu.pipeline_mode<synchronous>, transform_indices = @transform_1, window_bounds = array<i64: 1, 32>}, {pipeline_mode = #tpu.pipeline_mode<synchronous>, transform_indices = @transform_2, window_bounds = array<i64: 1, 32>}, {transform_indices = @transform_3, window_bounds = array<i64: 32, 16>}, {transform_indices = @transform_4, window_bounds = array<i64: 1, 16>}, {transform_indices = @transform_5, window_bounds = array<i64: 16, 16>}]} {
    %c0_i32 = arith.constant 0 : i32
    %0 = arith.cmpi eq, %arg1, %c0_i32 : i32
    %1 = arith.extui %0 : i1 to i32
    %c0_i32_0 = arith.constant 0 : i32
    %2 = arith.cmpi ne, %1, %c0_i32_0 : i32
    scf.if %2 {
      %c0_8 = arith.constant 0 : index
      %c0_9 = arith.constant 0 : index
      %10 = vector.load %arg2[%c0_8, %c0_9] : memref<16x32xbf16, #tpu.memory_space<vmem>>, vector<16x32xbf16>
      %11 = arith.extf %10 : vector<16x32xbf16> to vector<16x32xf32>
      %cst_10 = arith.constant dense<0.000000e+00> : vector<16xf32>
      %12 = vector.multi_reduction <add>, %11, %cst_10 [1] : vector<16x32xf32> to vector<16xf32>
      %13 = vector.shape_cast %12 : vector<16xf32> to vector<16x1xf32>
      %cst_11 = arith.constant 3.200000e+01 : f32
      %14 = vector.broadcast %cst_11 : f32 to vector<16x1xf32>
      %15 = arith.divf %13, %14 : vector<16x1xf32>
      %16 = vector.broadcast %15 : vector<16x1xf32> to vector<16x32xf32>
      %17 = arith.subf %11, %16 : vector<16x32xf32>
      %18 = arith.mulf %17, %17 : vector<16x32xf32>
      %cst_12 = arith.constant dense<0.000000e+00> : vector<16xf32>
      %19 = vector.multi_reduction <add>, %18, %cst_12 [1] : vector<16x32xf32> to vector<16xf32>
      %20 = vector.shape_cast %19 : vector<16xf32> to vector<16x1xf32>
      %cst_13 = arith.constant 3.200000e+01 : f32
      %21 = vector.broadcast %cst_13 : f32 to vector<16x1xf32>
      %22 = arith.divf %20, %21 : vector<16x1xf32>
      %23 = vector.broadcast %15 : vector<16x1xf32> to vector<16x32xf32>
      %24 = arith.subf %11, %23 : vector<16x32xf32>
      %cst_14 = arith.constant 9.99999974E-6 : f32
      %25 = vector.broadcast %cst_14 : f32 to vector<16x1xf32>
      %26 = arith.addf %22, %25 : vector<16x1xf32>
      %27 = math.rsqrt %26 : vector<16x1xf32>
      %28 = vector.broadcast %27 : vector<16x1xf32> to vector<16x32xf32>
      %29 = arith.mulf %24, %28 : vector<16x32xf32>
      %c0_15 = arith.constant 0 : index
      %c0_16 = arith.constant 0 : index
      %30 = vector.load %arg3[%c0_15, %c0_16] : memref<1x32xf32, #tpu.memory_space<vmem>>, vector<1x32xf32>
      %31 = vector.broadcast %30 : vector<1x32xf32> to vector<16x32xf32>
      %32 = arith.mulf %29, %31 : vector<16x32xf32>
      %c0_17 = arith.constant 0 : index
      %c0_18 = arith.constant 0 : index
      %33 = vector.load %arg4[%c0_17, %c0_18] : memref<1x32xf32, #tpu.memory_space<vmem>>, vector<1x32xf32>
      %34 = vector.broadcast %33 : vector<1x32xf32> to vector<16x32xf32>
      %35 = arith.addf %32, %34 : vector<16x32xf32>
      %36 = arith.truncf %35 : vector<16x32xf32> to vector<16x32xbf16>
      %c0_19 = arith.constant 0 : index
      %c0_20 = arith.constant 0 : index
      %37 = vector.load %arg8[%c0_19, %c0_20] : memref<16x32xbf16, #tpu.memory_space<vmem>>, vector<16x32xbf16>
      tpu.vector_store %arg8[%c0_19, %c0_20], %36 {strides = array<i32>} : memref<16x32xbf16, #tpu.memory_space<vmem>>, vector<16x32xbf16>,
    } else {
    }
    %c0 = arith.constant 0 : index
    %c0_1 = arith.constant 0 : index
    %3 = vector.load %arg8[%c0, %c0_1] : memref<16x32xbf16, #tpu.memory_space<vmem>>, vector<16x32xbf16>
    %c0_2 = arith.constant 0 : index
    %c0_3 = arith.constant 0 : index
    %4 = vector.load %arg5[%c0_2, %c0_3] : memref<32x16xbf16, #tpu.memory_space<vmem>>, vector<32x16xbf16>
    %cst = arith.constant dense<0.000000e+00> : vector<16x16xf32>
    %5 = tpu.matmul %3, %4, %cst {dimension_numbers = #tpu.dot_dimension_numbers<[1], [0], [0], [1], [0, 0, 1, 1], [], []>} : vector<16x32xbf16>, vector<32x16xbf16>, vector<16x16xf32> -> vector<16x16xf32>
    %c0_4 = arith.constant 0 : index
    %c0_5 = arith.constant 0 : index
    %6 = vector.load %arg6[%c0_4, %c0_5] : memref<1x16xf32, #tpu.memory_space<vmem>>, vector<1x16xf32>
    %7 = vector.broadcast %6 : vector<1x16xf32> to vector<16x16xf32>
    %8 = arith.addf %5, %7 : vector<16x16xf32>
    %c0_6 = arith.constant 0 : index
    %c0_7 = arith.constant 0 : index
    %9 = vector.load %arg7[%c0_6, %c0_7] : memref<16x16xf32, #tpu.memory_space<vmem>>, vector<16x16xf32>
    tpu.vector_store %arg7[%c0_6, %c0_7], %8 {strides = array<i32>} : memref<16x16xf32, #tpu.memory_space<vmem>>, vector<16x16xf32>,
    return
  }
  func.func @transform_0(%arg0: i32, %arg1: i32) -> (i32, i32) {
    %c0_i32 = arith.constant 0 : i32
    %c0_i32_0 = arith.constant 0 : i32
    return %arg0, %c0_i32 : i32, i32
  }
  func.func @transform_1(%arg0: i32, %arg1: i32) -> (i32, i32) {
    %c0_i32 = arith.constant 0 : i32
    %c0_i32_0 = arith.constant 0 : i32
    %c0_i32_1 = arith.constant 0 : i32
    return %c0_i32, %c0_i32_0 : i32, i32
  }
  func.func @transform_2(%arg0: i32, %arg1: i32) -> (i32, i32) {
    %c0_i32 = arith.constant 0 : i32
    %c0_i32_0 = arith.constant 0 : i32
    %c0_i32_1 = arith.constant 0 : i32
    return %c0_i32, %c0_i32_0 : i32, i32
  }
  func.func @transform_3(%arg0: i32, %arg1: i32) -> (i32, i32) {
    %c0_i32 = arith.constant 0 : i32
    %c0_i32_0 = arith.constant 0 : i32
    return %c0_i32, %arg1 : i32, i32
  }
  func.func @transform_4(%arg0: i32, %arg1: i32) -> (i32, i32) {
    %c0_i32 = arith.constant 0 : i32
    %c0_i32_0 = arith.constant 0 : i32
    return %c0_i32, %arg1 : i32, i32
  }
  func.func @transform_5(%arg0: i32, %arg1: i32) -> (i32, i32) {
    %c0_i32 = arith.constant 0 : i32
    return %arg0, %arg1 : i32, i32
  }
}

</mosaic_0001>

<bundles_post_ra>
// kernel: conformer_forward.42
= control target key start
LH: loop header
LB: loop body
LE: loop exit
PB: predicated region body
PF: predicated region fallthrough
CT: control target
= control target key end

     0   :  { %vm219_vm0 = vcmask 1043456   ;;  %vm220_vm1 = vcmask 1044480   ;;  %vm176_vm2 = vcmask 72704   ;;  %v805_v1 = vmov 65535   ;;  %s1080_s1 = inlined_call_operand.vmem [shape: bf16[9,32], index: 1, kind: input, shape index: {}]   ;;  %s1081_s0 = inlined_call_operand.vmem [shape: bf16[216,9], index: 0, kind: input, shape index: {}]   ;;  %s1082_s2 = inlined_call_operand.vmem [shape: f32[1,32], index: 2, kind: input, shape index: {}]   ;;  %s1083_s3 = inlined_call_operand.vmem [shape: bf16[216,32], index: 3, kind: output, shape index: {}]  }
   0x1   :  { %v790_v0 = vld [vmem:[%s1080_s1] sm:$0x1f]   ;;  %v221_v2 = vsel %vm219_vm0, 4294967295, %v805_v1  ;;  %vm19_vm3 = vcmask 261120   ;;  %v792_v7 = vld [vmem:[%s1081_s0 + $0x8] sm:$0xff]   ;;  %v806_v9 = vmov 0.0  }
   0x2   :  { %v791_v3 = vld [vmem:[%s1081_s0] sm:$0xff]   ;;  %v222_v4 = vsel %vm220_vm1, %v221_v2, 0  ;;  %v794_v8 = vld [vmem:[%s1081_s0 + $0x48] sm:$0xff]   ;;  %22 = vst.msk [vmem:[#allocation2 + $0x10] sm:$0xff] %vm19_vm3, %v806_v9  ;;  %20 = vst.msk [vmem:[#allocation2] sm:$0xff] %vm19_vm3, %v806_v9  ;;  %vm625_vm4 = vcmask 257024  }
   0x3   :  { %v224_v5 = vand.u32 %v790_v0, %v222_v4  ;;  %758 = vmatprep.mubr.msk.bf16.mxu0 %vm176_vm2, %v791_v3  ;;  %v793_v6 = vld [vmem:[%s1081_s0 + $0x40] sm:$0xff]   ;;  %21 = vst.msk [vmem:[#allocation2 + $0x8] sm:$0xff] %vm19_vm3, %v806_v9  ;;  %23 = vst.msk [vmem:[#allocation2 + $0x18] sm:$0xff] %vm19_vm3, %v806_v9  ;;  %v795_v10 = vld [vmem:[%s1081_s0 + $0x10] sm:$0xff]  }
   0x4   :  { %24 = vst.msk [vmem:[#allocation2 + $0x20] sm:$0xff] %vm19_vm3, %v806_v9  ;;  %25 = vst.msk [vmem:[#allocation2 + $0x28] sm:$0xff] %vm19_vm3, %v806_v9  ;;  %774 = vmatprep.mubr.msk.bf16.mxu1 %vm176_vm2, %v793_v6  ;;  %v797_v11 = vld [vmem:[%s1081_s0 + $0x50] sm:$0xff]   ;;  %v796_v12 = vld [vmem:[%s1081_s0 + $0x18] sm:$0xff]  }
   0x5   :  { %756 = vmatprep.subr.bf16.mxu0 %v224_v5  ;;  %786 = vmatprep.subr.bf16.mxu1 %v224_v5  ;;  %26 = vst.msk [vmem:[#allocation2 + $0x30] sm:$0xff] %vm19_vm3, %v806_v9  ;;  %27 = vst.msk [vmem:[#allocation2 + $0x38] sm:$0xff] %vm19_vm3, %v806_v9  ;;  %v798_v13 = vld [vmem:[%s1081_s0 + $0x58] sm:$0xff]   ;;  %v799_v14 = vld [vmem:[%s1081_s0 + $0x20] sm:$0xff]  }
   0x6   :  { %28 = vst.msk [vmem:[#allocation2 + $0x40] sm:$0xff] %vm19_vm3, %v806_v9  ;;  %29 = vst.msk [vmem:[#allocation2 + $0x48] sm:$0xff] %vm19_vm3, %v806_v9  ;;  %757 = vmatpush3.bf16.msra.mxu0 %v224_v5  ;;  %787 = vmatpush3.bf16.msra.mxu1 %v224_v5  ;;  %v801_v15 = vld [vmem:[%s1081_s0 + $0x60] sm:$0xff]   ;;  %v800_v16 = vld [vmem:[%s1081_s0 + $0x28] sm:$0xff]  }
   0x7   :  { %30 = vst.msk [vmem:[#allocation2 + $0x50] sm:$0xff] %vm19_vm3, %v806_v9  ;;  %31 = vst.msk [vmem:[#allocation2 + $0x58] sm:$0xff] %vm19_vm3, %v806_v9  ;;  %v802_v17 = vld [vmem:[%s1081_s0 + $0x68] ss:$0 sps:$4 sm:$0xff]   ;;  %v803_v18 = vld [vmem:[%s1081_s0 + $0x30] sm:$0xff]  }
   0x8   :  { %32 = vst.msk [vmem:[#allocation2 + $0x60] sm:$0xff] %vm19_vm3, %v806_v9  ;;  %33 = vst.msk [vmem:[#allocation2 + $0x68] sm:$0xff] %vm19_vm3, %v806_v9  ;;  %v804_v19 = vld [vmem:[%s1081_s0 + $0x38] sm:$0xff]   ;;  %v924_v48 = vld [vmem:[%s1082_s2] ss:$0 sm:$0xff] }
   0x9   :  { %34 = vst.msk [vmem:[#allocation2 + $0x70] sm:$0xff] %vm19_vm3, %v806_v9  ;;  %35 = vst.msk [vmem:[#allocation2 + $0x78] sm:$0xff] %vm19_vm3, %v806_v9  ;;  %759 = vmatmul.mubr.msk.bf16.vlgmr.msra.gmra.mrb[0].mxu0 %vm176_vm2, %v792_v7  ;;  %775 = vmatmul.mubr.msk.bf16.vlgmr.msra.gmra.mrb[0].mxu1 %vm176_vm2, %v794_v8  ;;  %v49_v20 = vld [vmem:[#allocation2 + $0x10] sm:$0xff]  ;;  %v47_v22 = vld [vmem:[#allocation2] sm:$0xff] }
   0xa   :  { %36 = vst.msk [vmem:[#allocation2 + $0x80] sm:$0xff] %vm19_vm3, %v806_v9  ;;  %37 = vst.msk [vmem:[#allocation2 + $0x88] sm:$0xff] %vm19_vm3, %v806_v9  ;;  %762 = vmatprep.mubr.msk.bf16.mxu0 %vm176_vm2, %v795_v10  ;;  %778 = vmatprep.mubr.msk.bf16.mxu1 %vm176_vm2, %v797_v11  ;;  %v50_v25 = vld [vmem:[#allocation2 + $0x18] sm:$0xff]  ;;  %v48_v30 = vld [vmem:[#allocation2 + $0x8] sm:$0xff] }
   0xb   :  { %38 = vst.msk [vmem:[#allocation2 + $0x90] sm:$0xff] %vm19_vm3, %v806_v9  ;;  %39 = vst.msk [vmem:[#allocation2 + $0x98] sm:$0xff] %vm19_vm3, %v806_v9  ;;  %v51_v46 = vld [vmem:[#allocation2 + $0x20] sm:$0xff]  ;;  %v52_v55 = vld [vmem:[#allocation2 + $0x28] sm:$0xff] }
   0xc   :  { %40 = vst.msk [vmem:[#allocation2 + $0xa0] sm:$0xff] %vm19_vm3, %v806_v9  ;;  %41 = vst.msk [vmem:[#allocation2 + $0xa8] sm:$0xff] %vm19_vm3, %v806_v9  ;;  %v53_v44 = vld [vmem:[#allocation2 + $0x30] sm:$0xff]  ;;  %v54_v50 = vld [vmem:[#allocation2 + $0x38] sm:$0xff] }
   0xd   :  { %42 = vst.msk [vmem:[#allocation2 + $0xb0] sm:$0xff] %vm19_vm3, %v806_v9  ;;  %43 = vst.msk [vmem:[#allocation2 + $0xb8] sm:$0xff] %vm19_vm3, %v806_v9 }
   0xe   :  { %44 = vst.msk [vmem:[#allocation2 + $0xc0] sm:$0xff] %vm19_vm3, %v806_v9  ;;  %45 = vst.msk [vmem:[#allocation2 + $0xc8] sm:$0xff] %vm19_vm3, %v806_v9 }
   0xf   :  { %46 = vst.msk [vmem:[#allocation2 + $0xd0] sm:$0xff] %vm19_vm3, %v806_v9 }
  0x11   :  { %763 = vmatmul.mubr.msk.bf16.gmra.mrb[4].mxu0 %vm176_vm2, %v796_v12  ;;  %779 = vmatmul.mubr.msk.bf16.gmra.mrb[4].mxu1 %vm176_vm2, %v798_v13  ;;  %v63_v23 = vld [vmem:[#allocation2 + $0x80] sm:$0xff]  ;;  %v64_v33 = vld [vmem:[#allocation2 + $0x88] sm:$0xff] }
  0x12   :  { %766 = vmatprep.mubr.msk.bf16.mxu0 %vm176_vm2, %v799_v14  ;;  %782 = vmatprep.mubr.msk.bf16.mxu1 %vm176_vm2, %v801_v15  ;;  %v65_v21 = vld [vmem:[#allocation2 + $0x90] sm:$0xff]  ;;  %v66_v27 = vld [vmem:[#allocation2 + $0x98] sm:$0xff] }
  0x13   :  { %v67_v47 = vld [vmem:[#allocation2 + $0xa0] sm:$0xff]  ;;  %v68_v58 = vld [vmem:[#allocation2 + $0xa8] sm:$0xff] }
  0x14   :  { %v69_v45 = vld [vmem:[#allocation2 + $0xb0] sm:$0xff]  ;;  %v70_v52 = vld [vmem:[#allocation2 + $0xb8] sm:$0xff] }
  0x19   :  { %767 = vmatmul.mubr.msk.bf16.gmra.mrb[8].mxu0 %vm176_vm2, %v800_v16  ;;  %783 = vmatmul.mubr.msk.bf16.gmra.mrb[8].mxu1 %vm176_vm2, %v802_v17 }
  0x1a   :  { %770 = vmatprep.mubr.msk.bf16.mxu0 %vm176_vm2, %v803_v18 }
  0x21   :  { %771 = vmatmul.mubr.msk.bf16.gmra.mrb[12].mxu0 %vm176_vm2, %v804_v19 }
  0xdc   :  { %v760_v24 = vpop.f32.mrb[0].mxu0  ;;  %v776_v26 = vpop.f32.mrb[0].mxu1 }
  0xdd   :  { %v372_v28 = vadd.f32 %v760_v24, %v49_v20  ;;  %v260_v29 = vpop.f32.mrb[1].mxu0  ;;  %v388_v31 = vadd.f32 %v776_v26, %v65_v21  ;;  %v324_v32 = vpop.f32.mrb[1].mxu1  ;;  %v73_v26 = vld [vmem:[#allocation2 + $0xd0] sm:$0xff] }
  0xde   :  { %v370_v34 = vadd.f32 %v260_v29, %v47_v22  ;;  %v761_v35 = vpop.f32.mrb[2].mxu0  ;;  %v386_v36 = vadd.f32 %v324_v32, %v63_v23  ;;  %v777_v37 = vpop.f32.mrb[2].mxu1  ;;  %v71_v32 = vld [vmem:[#allocation2 + $0xc0] sm:$0xff] }
  0xdf   :  { %400 = vst.msk [vmem:[#allocation2 + $0x10] sm:$0xff] %vm19_vm3, %v372_v28  ;;  %v373_v38 = vadd.f32 %v761_v35, %v50_v25  ;;  %v263_v39 = vpop.f32.mrb[3].mxu0  ;;  %416 = vst.msk [vmem:[#allocation2 + $0x90] sm:$0xff] %vm19_vm3, %v388_v31  ;;  %v389_v40 = vadd.f32 %v777_v37, %v66_v27  ;;  %v327_v41 = vpop.f32.mrb[3].mxu1  ;;  %v57_v25 = vld [vmem:[#allocation2 + $0x50] sm:$0xff]  ;;  %v55_v31 = vld [vmem:[#allocation2 + $0x40] sm:$0xff] }
  0xe0   :  { %398 = vst.msk [vmem:[#allocation2] sm:$0xff] %vm19_vm3, %v370_v34  ;;  %v371_v42 = vadd.f32 %v263_v39, %v48_v30  ;;  %414 = vst.msk [vmem:[#allocation2 + $0x80] sm:$0xff] %vm19_vm3, %v386_v36  ;;  %v387_v43 = vadd.f32 %v327_v41, %v64_v33 }
  0xe1   :  { %401 = vst.msk [vmem:[#allocation2 + $0x18] sm:$0xff] %vm19_vm3, %v373_v38  ;;  %417 = vst.msk [vmem:[#allocation2 + $0x98] sm:$0xff] %vm19_vm3, %v389_v40  ;;  %v58_v38 = vld [vmem:[#allocation2 + $0x58] sm:$0xff] }
  0xe2   :  { %399 = vst.msk [vmem:[#allocation2 + $0x8] sm:$0xff] %vm19_vm3, %v371_v42  ;;  %415 = vst.msk [vmem:[#allocation2 + $0x88] sm:$0xff] %vm19_vm3, %v387_v43 }
  0xe4   :  { %v764_v49 = vpop.f32.mrb[4].mxu0  ;;  %v780_v51 = vpop.f32.mrb[4].mxu1 }
  0xe5   :  { %v376_v53 = vadd.f32 %v764_v49, %v53_v44  ;;  %v276_v54 = vpop.f32.mrb[5].mxu0  ;;  %v392_v56 = vadd.f32 %v780_v51, %v69_v45  ;;  %v340_v57 = vpop.f32.mrb[5].mxu1  ;;  %v56_v44 = vld [vmem:[#allocation2 + $0x48] sm:$0xff] }
  0xe6   :  { %v430_v59 = vld [vmem:[#allocation2 + $0x10] sm:$0xff]  ;;  %v374_v61 = vadd.f32 %v276_v54, %v51_v46  ;;  %v765_v62 = vpop.f32.mrb[6].mxu0  ;;  %v390_v63 = vadd.f32 %v340_v57, %v67_v47  ;;  %v781_v0 = vpop.f32.mrb[6].mxu1  ;;  %v72_v47 = vld [vmem:[#allocation2 + $0xc8] sm:$0xff] }
  0xe7   :  { %v446_v60 = vld [vmem:[#allocation2 + $0x90] sm:$0xff]  ;;  %v464_v1 = vadd.f32 %v924_v48, %v430_v59  ;;  %v428_v2 = vld [vmem:[#allocation2] sm:$0xff]  ;;  %404 = vst.msk [vmem:[#allocation2 + $0x30] sm:$0xff] %vm19_vm3, %v376_v53  ;;  %v377_v5 = vadd.f32 %v765_v62, %v54_v50  ;;  %v279_v6 = vpop.f32.mrb[7].mxu0  ;;  %420 = vst.msk [vmem:[#allocation2 + $0xb0] sm:$0xff] %vm19_vm3, %v392_v56  ;;  %v393_v7 = vadd.f32 %v781_v0, %v70_v52  ;;  %v343_v8 = vpop.f32.mrb[7].mxu1 }
  0xe8   :  { %v480_v3 = vadd.f32 %v924_v48, %v446_v60  ;;  %v444_v4 = vld [vmem:[#allocation2 + $0x80] sm:$0xff]  ;;  %v462_v9 = vadd.f32 %v924_v48, %v428_v2  ;;  %v431_v10 = vld [vmem:[#allocation2 + $0x18] sm:$0xff]  ;;  %402 = vst.msk [vmem:[#allocation2 + $0x20] sm:$0xff] %vm19_vm3, %v374_v61  ;;  %v375_v13 = vadd.f32 %v279_v6, %v52_v55  ;;  %418 = vst.msk [vmem:[#allocation2 + $0xa0] sm:$0xff] %vm19_vm3, %v390_v63 }
  0xe9   :  { %v478_v11 = vadd.f32 %v924_v48, %v444_v4  ;;  %v447_v12 = vld [vmem:[#allocation2 + $0x98] sm:$0xff]  ;;  %v391_v14 = vadd.f32 %v343_v8, %v68_v58  ;;  %v491_v15 = vmax.f32 %v464_v1, 0.0  ;;  %v465_v16 = vadd.f32 %v924_v48, %v431_v10  ;;  %v429_v17 = vld [vmem:[#allocation2 + $0x8] sm:$0xff]  ;;  %405 = vst.msk [vmem:[#allocation2 + $0x38] sm:$0xff] %vm19_vm3, %v377_v5  ;;  %421 = vst.msk [vmem:[#allocation2 + $0xb8] sm:$0xff] %vm19_vm3, %v393_v7 }
  0xea   :  { %v507_v18 = vmax.f32 %v480_v3, 0.0  ;;  %v481_v19 = vadd.f32 %v924_v48, %v447_v12  ;;  %v445_v20 = vld [vmem:[#allocation2 + $0x88] sm:$0xff]  ;;  %v489_v21 = vmax.f32 %v462_v9, 0.0  ;;  %v463_v22 = vadd.f32 %v924_v48, %v429_v17  ;;  %403 = vst.msk [vmem:[#allocation2 + $0x28] sm:$0xff] %vm19_vm3, %v375_v13 }
  0xeb   :  { %v505_v23 = vmax.f32 %v478_v11, 0.0  ;;  %v479_v24 = vadd.f32 %v924_v48, %v445_v20  ;;  %419 = vst.msk [vmem:[#allocation2 + $0xa8] sm:$0xff] %vm19_vm3, %v391_v14  ;;  %v716_v27 = vpack.c.bf16 %v491_v15, %v491_v15  ;;  %v492_v28 = vmax.f32 %v465_v16, 0.0  ;;  %v61_v16 = vld [vmem:[#allocation2 + $0x70] sm:$0xff] }
  0xec   :  { %v732_v29 = vpack.c.bf16 %v507_v18, %v507_v18  ;;  %v508_v30 = vmax.f32 %v481_v19, 0.0  ;;  %v714_v33 = vpack.c.bf16 %v489_v21, %v489_v21  ;;  %v490_v34 = vmax.f32 %v463_v22, 0.0  ;;  %v768_v37 = vpop.f32.mrb[8].mxu0  ;;  %v784_v39 = vpop.f32.mrb[8].mxu1  ;;  %v59_v21 = vld [vmem:[#allocation2 + $0x60] sm:$0xff] }
  0xed   :  { %v730_v35 = vpack.c.bf16 %v505_v23, %v505_v23  ;;  %v506_v36 = vmax.f32 %v479_v24, 0.0  ;;  %628 = vst.msk [vmem:[%s1083_s3 + $0x8] sm:$0xf] %vm625_vm4, %v716_v27  ;;  %v717_v40 = vpack.c.bf16 %v492_v28, %v492_v28  ;;  %v380_v42 = vadd.f32 %v768_v37, %v57_v25  ;;  %v292_v43 = vpop.f32.mrb[9].mxu0  ;;  %v356_v46 = vpop.f32.mrb[9].mxu1  ;;  %v62_v27 = vld [vmem:[#allocation2 + $0x78] sm:$0xff] }
  0xee   :  { %644 = vst.msk [vmem:[%s1083_s3 + $0x48] sm:$0xf] %vm625_vm4, %v732_v29  ;;  %v733_v41 = vpack.c.bf16 %v508_v30, %v508_v30  ;;  %v396_v45 = vadd.f32 %v784_v39, %v73_v26  ;;  %626 = vst.msk [vmem:[%s1083_s3] sm:$0xf] %vm625_vm4, %v714_v33  ;;  %v715_v49 = vpack.c.bf16 %v490_v34, %v490_v34  ;;  %v434_v50 = vld [vmem:[#allocation2 + $0x30] sm:$0xff]  ;;  %v769_v54 = vpop.f32.mrb[10].mxu0 }
  0xef   :  { %642 = vst.msk [vmem:[%s1083_s3 + $0x40] sm:$0xf] %vm625_vm4, %v730_v35  ;;  %v731_v51 = vpack.c.bf16 %v506_v36, %v506_v36  ;;  %v450_v52 = vld [vmem:[#allocation2 + $0xb0] sm:$0xff]  ;;  %v378_v53 = vadd.f32 %v292_v43, %v55_v31  ;;  %v394_v55 = vadd.f32 %v356_v46, %v71_v32  ;;  %v785_v56 = vpop.f32.mrb[10].mxu1  ;;  %629 = vst.msk [vmem:[%s1083_s3 + $0xc] sm:$0xf] %vm625_vm4, %v717_v40 }
  0xf0   :  { %645 = vst.msk [vmem:[%s1083_s3 + $0x4c] sm:$0xf] %vm625_vm4, %v733_v41  ;;  %v468_v57 = vadd.f32 %v924_v48, %v434_v50  ;;  %v432_v58 = vld [vmem:[#allocation2 + $0x20] sm:$0xff]  ;;  %v484_v59 = vadd.f32 %v924_v48, %v450_v52  ;;  %v381_v61 = vadd.f32 %v769_v54, %v58_v38  ;;  %v295_v62 = vpop.f32.mrb[11].mxu0  ;;  %v359_v63 = vpop.f32.mrb[11].mxu1  ;;  %v435_v1 = vld [vmem:[#allocation2 + $0x38] sm:$0xff] }
  0xf1   :  { %v448_v60 = vld [vmem:[#allocation2 + $0xa0] sm:$0xff]  ;;  %408 = vst.msk [vmem:[#allocation2 + $0x50] sm:$0xff] %vm19_vm3, %v380_v42  ;;  %424 = vst.msk [vmem:[#allocation2 + $0xd0] sm:$0xff] %vm19_vm3, %v396_v45  ;;  %v466_v0 = vadd.f32 %v924_v48, %v432_v58  ;;  %v451_v3 = vld [vmem:[#allocation2 + $0xb8] sm:$0xff]  ;;  %v379_v4 = vadd.f32 %v295_v62, %v56_v44  ;;  %v395_v5 = vadd.f32 %v359_v63, %v72_v47 }
  0xf2   :  { %627 = vst.msk [vmem:[%s1083_s3 + $0x4] sm:$0xf] %vm625_vm4, %v715_v49  ;;  %643 = vst.msk [vmem:[%s1083_s3 + $0x44] sm:$0xf] %vm625_vm4, %v731_v51  ;;  %v482_v2 = vadd.f32 %v924_v48, %v448_v60  ;;  %v495_v6 = vmax.f32 %v468_v57, 0.0  ;;  %v469_v7 = vadd.f32 %v924_v48, %v435_v1  ;;  %v433_v8 = vld [vmem:[#allocation2 + $0x28] sm:$0xff]  ;;  %v485_v10 = vadd.f32 %v924_v48, %v451_v3 }
  0xf3   :  { %406 = vst.msk [vmem:[#allocation2 + $0x40] sm:$0xff] %vm19_vm3, %v378_v53  ;;  %422 = vst.msk [vmem:[#allocation2 + $0xc0] sm:$0xff] %vm19_vm3, %v394_v55  ;;  %v511_v9 = vmax.f32 %v484_v59, 0.0  ;;  %v449_v11 = vld [vmem:[#allocation2 + $0xa8] sm:$0xff]  ;;  %v493_v12 = vmax.f32 %v466_v0, 0.0  ;;  %v467_v13 = vadd.f32 %v924_v48, %v433_v8 }
  0xf4   :  { %409 = vst.msk [vmem:[#allocation2 + $0x58] sm:$0xff] %vm19_vm3, %v381_v61  ;;  %v509_v14 = vmax.f32 %v482_v2, 0.0  ;;  %v483_v15 = vadd.f32 %v924_v48, %v449_v11  ;;  %407 = vst.msk [vmem:[#allocation2 + $0x48] sm:$0xff] %vm19_vm3, %v379_v4  ;;  %v720_v17 = vpack.c.bf16 %v495_v6, %v495_v6  ;;  %v496_v18 = vmax.f32 %v469_v7, 0.0  ;;  %v772_v26 = vpop.f32.mrb[12].mxu0  ;;  %v60_v32 = vld [vmem:[#allocation2 + $0x68] sm:$0xff] }
  0xf5   :  { %423 = vst.msk [vmem:[#allocation2 + $0xc8] sm:$0xff] %vm19_vm3, %v395_v5  ;;  %v736_v19 = vpack.c.bf16 %v511_v9, %v511_v9  ;;  %v512_v20 = vmax.f32 %v485_v10, 0.0  ;;  %v718_v22 = vpack.c.bf16 %v493_v12, %v493_v12  ;;  %v494_v23 = vmax.f32 %v467_v13, 0.0  ;;  %v308_v31 = vpop.f32.mrb[13].mxu0 }
  0xf6   :  { %v734_v24 = vpack.c.bf16 %v509_v14, %v509_v14  ;;  %v510_v25 = vmax.f32 %v483_v15, 0.0  ;;  %632 = vst.msk [vmem:[%s1083_s3 + $0x18] sm:$0xf] %vm625_vm4, %v720_v17  ;;  %v721_v28 = vpack.c.bf16 %v496_v18, %v496_v18  ;;  %v384_v30 = vadd.f32 %v772_v26, %v61_v16  ;;  %v773_v38 = vpop.f32.mrb[14].mxu0 }
  0xf7   :  { %648 = vst.msk [vmem:[%s1083_s3 + $0x58] sm:$0xf] %vm625_vm4, %v736_v19  ;;  %v737_v29 = vpack.c.bf16 %v512_v20, %v512_v20  ;;  %630 = vst.msk [vmem:[%s1083_s3 + $0x10] sm:$0xf] %vm625_vm4, %v718_v22  ;;  %v719_v33 = vpack.c.bf16 %v494_v23, %v494_v23  ;;  %v382_v37 = vadd.f32 %v308_v31, %v59_v21  ;;  %v311_v44 = vpop.f32.mrb[15].mxu0 }
  0xf8   :  { %646 = vst.msk [vmem:[%s1083_s3 + $0x50] sm:$0xf] %vm625_vm4, %v734_v24  ;;  %v438_v34 = vld [vmem:[#allocation2 + $0x50] sm:$0xff]  ;;  %v735_v35 = vpack.c.bf16 %v510_v25, %v510_v25  ;;  %633 = vst.msk [vmem:[%s1083_s3 + $0x1c] sm:$0xf] %vm625_vm4, %v721_v28  ;;  %v385_v43 = vadd.f32 %v773_v38, %v62_v27  ;;  %v383_v49 = vadd.f32 %v311_v44, %v60_v32 }
  0xf9   :  { %v454_v36 = vld [vmem:[#allocation2 + $0xd0] sm:$0xff]  ;;  %649 = vst.msk [vmem:[%s1083_s3 + $0x5c] sm:$0xf] %vm625_vm4, %v737_v29  ;;  %v472_v39 = vadd.f32 %v924_v48, %v438_v34  ;;  %631 = vst.msk [vmem:[%s1083_s3 + $0x14] sm:$0xf] %vm625_vm4, %v719_v33 }
  0xfa   :  { %v436_v40 = vld [vmem:[#allocation2 + $0x40] sm:$0xff]  ;;  %v488_v41 = vadd.f32 %v924_v48, %v454_v36  ;;  %412 = vst.msk [vmem:[#allocation2 + $0x70] sm:$0xff] %vm19_vm3, %v384_v30  ;;  %410 = vst.msk [vmem:[#allocation2 + $0x60] sm:$0xff] %vm19_vm3, %v382_v37 }
  0xfb   :  { %v452_v42 = vld [vmem:[#allocation2 + $0xc0] sm:$0xff]  ;;  %647 = vst.msk [vmem:[%s1083_s3 + $0x54] sm:$0xf] %vm625_vm4, %v735_v35  ;;  %v470_v45 = vadd.f32 %v924_v48, %v436_v40  ;;  %v439_v46 = vld [vmem:[#allocation2 + $0x58] sm:$0xff]  ;;  %v499_v50 = vmax.f32 %v472_v39, 0.0  ;;  %v437_v52 = vld [vmem:[#allocation2 + $0x48] sm:$0xff] }
  0xfc   :  { %v486_v47 = vadd.f32 %v924_v48, %v452_v42  ;;  %v473_v51 = vadd.f32 %v924_v48, %v439_v46  ;;  %v515_v53 = vmax.f32 %v488_v41, 0.0  ;;  %v453_v54 = vld [vmem:[#allocation2 + $0xc8] sm:$0xff]  ;;  %413 = vst.msk [vmem:[#allocation2 + $0x78] sm:$0xff] %vm19_vm3, %v385_v43  ;;  %v471_v56 = vadd.f32 %v924_v48, %v437_v52  ;;  %411 = vst.msk [vmem:[#allocation2 + $0x68] sm:$0xff] %vm19_vm3, %v383_v49 }
  0xfd   :  { %v497_v55 = vmax.f32 %v470_v45, 0.0  ;;  %v487_v58 = vadd.f32 %v924_v48, %v453_v54  ;;  %v724_v59 = vpack.c.bf16 %v499_v50, %v499_v50 }
  0xfe   :  { %v513_v57 = vmax.f32 %v486_v47, 0.0  ;;  %v500_v60 = vmax.f32 %v473_v51, 0.0  ;;  %v740_v61 = vpack.c.bf16 %v515_v53, %v515_v53  ;;  %v498_v63 = vmax.f32 %v471_v56, 0.0 }
  0xff   :  { %v722_v62 = vpack.c.bf16 %v497_v55, %v497_v55  ;;  %v514_v1 = vmax.f32 %v487_v58, 0.0  ;;  %636 = vst.msk [vmem:[%s1083_s3 + $0x28] sm:$0xf] %vm625_vm4, %v724_v59 }
 0x100   :  { %v738_v0 = vpack.c.bf16 %v513_v57, %v513_v57  ;;  %v725_v2 = vpack.c.bf16 %v500_v60, %v500_v60  ;;  %652 = vst.msk [vmem:[%s1083_s3 + $0x68] sm:$0xf] %vm625_vm4, %v740_v61  ;;  %v723_v3 = vpack.c.bf16 %v498_v63, %v498_v63 }
 0x101   :  { %634 = vst.msk [vmem:[%s1083_s3 + $0x20] sm:$0xf] %vm625_vm4, %v722_v62  ;;  %v442_v4 = vld [vmem:[#allocation2 + $0x70] sm:$0xff]  ;;  %v739_v5 = vpack.c.bf16 %v514_v1, %v514_v1  ;;  %v440_v7 = vld [vmem:[#allocation2 + $0x60] sm:$0xff] }
 0x102   :  { %650 = vst.msk [vmem:[%s1083_s3 + $0x60] sm:$0xf] %vm625_vm4, %v738_v0  ;;  %637 = vst.msk [vmem:[%s1083_s3 + $0x2c] sm:$0xf] %vm625_vm4, %v725_v2  ;;  %v476_v6 = vadd.f32 %v924_v48, %v442_v4  ;;  %v474_v8 = vadd.f32 %v924_v48, %v440_v7 }
 0x103   :  { %635 = vst.msk [vmem:[%s1083_s3 + $0x24] sm:$0xf] %vm625_vm4, %v723_v3  ;;  %651 = vst.msk [vmem:[%s1083_s3 + $0x64] sm:$0xf] %vm625_vm4, %v739_v5  ;;  %v443_v9 = vld [vmem:[#allocation2 + $0x78] sm:$0xff]  ;;  %v441_v12 = vld [vmem:[#allocation2 + $0x68] sm:$0xff] }
 0x104   :  { %v503_v10 = vmax.f32 %v476_v6, 0.0  ;;  %v477_v11 = vadd.f32 %v924_v48, %v443_v9  ;;  %v501_v13 = vmax.f32 %v474_v8, 0.0  ;;  %v475_v14 = vadd.f32 %v924_v48, %v441_v12 }
 0x106   :  { %v728_v15 = vpack.c.bf16 %v503_v10, %v503_v10  ;;  %v504_v16 = vmax.f32 %v477_v11, 0.0  ;;  %v726_v17 = vpack.c.bf16 %v501_v13, %v501_v13  ;;  %v502_v18 = vmax.f32 %v475_v14, 0.0 }
 0x108   :  { %640 = vst.msk [vmem:[%s1083_s3 + $0x38] sm:$0xf] %vm625_vm4, %v728_v15  ;;  %v729_v19 = vpack.c.bf16 %v504_v16, %v504_v16  ;;  %638 = vst.msk [vmem:[%s1083_s3 + $0x30] sm:$0xf] %vm625_vm4, %v726_v17  ;;  %v727_v20 = vpack.c.bf16 %v502_v18, %v502_v18 }
 0x10a   :  { %641 = vst.msk [vmem:[%s1083_s3 + $0x3c] sm:$0xf] %vm625_vm4, %v729_v19  ;;  %639 = vst.msk [vmem:[%s1083_s3 + $0x34] sm:$0xf] %vm625_vm4, %v727_v20 }

// kernel: conformer_forward.43
= control target key start
LH: loop header
LB: loop body
LE: loop exit
PB: predicated region body
PF: predicated region fallthrough
CT: control target
= control target key end

     0   :  { %vm19_vm0 = vcmask 261120   ;;  %v562_v1 = vmov 0.0   ;;  %vm563_vm1 = vmmov 0   ;;  %vm421_vm2 = vcmask 257024   ;;  %s710_s1 = inlined_call_operand.vmem [shape: bf16[288,32], index: 1, kind: input, shape index: {}]   ;;  %s711_s0 = inlined_call_operand.vmem [shape: bf16[48,288], index: 0, kind: input, shape index: {}]   ;;  %s712_s2 = inlined_call_operand.vmem [shape: f32[1,32], index: 2, kind: input, shape index: {}]   ;;  %s713_s3 = inlined_call_operand.vmem [shape: bf16[48,32], index: 3, kind: output, shape index: {}]  }
   0x1   :  { %v532_v0 = vld [vmem:[%s710_s1 + $0x40] sm:$0xff]   ;;  %514 = vmatprep.subr.bf16.mxu1 %v562_v1  ;;  %518 = vmatprep.mubr.msk.bf16.mxu1 %vm563_vm1, %v562_v1  ;;  %20 = vst.msk [vmem:[#allocation2] sm:$0xff] %vm19_vm0, %v562_v1  ;;  %21 = vst.msk [vmem:[#allocation2 + $0x8] sm:$0xff] %vm19_vm0, %v562_v1  ;;  %v534_v3 = vld [vmem:[%s710_s1 + $0x48] sm:$0xff]  }
   0x2   :  { %22 = vst.msk [vmem:[#allocation2 + $0x10] sm:$0xff] %vm19_vm0, %v562_v1  ;;  %23 = vst.msk [vmem:[#allocation2 + $0x18] sm:$0xff] %vm19_vm0, %v562_v1  ;;  %v533_v2 = vld [vmem:[%s710_s1] sm:$0xff]   ;;  %475 = vmatprep.subr.bf16.mxu0 %v532_v0  ;;  %v535_v4 = vld [vmem:[%s710_s1 + $0x8] sm:$0xff]  }
   0x3   :  { %24 = vst.msk [vmem:[#allocation2 + $0x20] sm:$0xff] %vm19_vm0, %v562_v1  ;;  %25 = vst.msk [vmem:[#allocation2 + $0x28] sm:$0xff] %vm19_vm0, %v562_v1  ;;  %476 = vmatpush3.bf16.msra.mxu0 %v533_v2  ;;  %v536_v5 = vld [vmem:[%s710_s1 + $0x50] sm:$0xff]   ;;  %v538_v7 = vld [vmem:[%s710_s1 + $0x58] sm:$0xff]  }
   0x4   :  { %477 = vmatprep.subr.bf16.mxu0 %v534_v3  ;;  %v537_v6 = vld [vmem:[%s710_s1 + $0x10] sm:$0xff]   ;;  %v539_v8 = vld [vmem:[%s710_s1 + $0x18] sm:$0xff]   ;;  %v540_v9 = vld [vmem:[%s710_s1 + $0x60] sm:$0xff]  }
   0x5   :  { %v546_v10 = vld [vmem:[%s710_s1 + $0x80] sm:$0xff]   ;;  %v542_v12 = vld [vmem:[%s710_s1 + $0x68] sm:$0xff]   ;;  %v544_v15 = vld [vmem:[%s710_s1 + $0x70] sm:$0xff]  }
   0x6   :  { %v541_v11 = vld [vmem:[%s710_s1 + $0x20] sm:$0xff]   ;;  %515 = vmatpush3.bf16.msra.mxu1 %v546_v10  ;;  %v543_v13 = vld [vmem:[%s710_s1 + $0x28] sm:$0xff]   ;;  %v545_v18 = vld [vmem:[%s710_s1 + $0x30] sm:$0xff]  }
   0x7   :  { %478 = vmatpush3.bf16.msra.mxu0 %v535_v4  ;;  %516 = vmatprep.subr.bf16.mxu1 %v562_v1  ;;  %v549_v14 = vld [vmem:[%s710_s1 + $0x88] sm:$0xff]   ;;  %v552_v16 = vld [vmem:[%s711_s0 + $0x4] ss:$12 sps:$4 sm:$0xff]   ;;  %v547_v19 = vld [vmem:[%s710_s1 + $0x78] sm:$0xff]  }
   0x8   :  { %479 = vmatprep.subr.bf16.mxu0 %v536_v5  ;;  %v553_v17 = vld [vmem:[%s711_s0 + $0x8] ss:$12 sps:$4 sm:$0xff]   ;;  %275 = vmatprep.mubr.bf16.mxu0 %v552_v16  ;;  %v548_v20 = vld [vmem:[%s710_s1 + $0x38] sm:$0xff]   ;;  %v557_v21 = vld [vmem:[%s711_s0 + $0x20] ss:$12 sps:$4 sm:$0xff]  }
   0x9   :  { %v550_v22 = vld [vmem:[%s711_s0] ss:$12 sps:$4 sm:$0xff]   ;;  %v554_v23 = vld [vmem:[%s711_s0 + $0x1c] ss:$12 sps:$4 sm:$0xff]   ;;  %v561_v24 = vld [vmem:[%s711_s0 + $0x38] ss:$12 sps:$4 sm:$0xff]  }
   0xa   :  { %517 = vmatpush3.bf16.msra.mxu1 %v549_v14  ;;  %v556_v25 = vld [vmem:[%s711_s0 + $0x18] ss:$12 sps:$4 sm:$0xff]   ;;  %v558_v26 = vld [vmem:[%s711_s0 + $0x34] ss:$12 sps:$4 sm:$0xff]   ;;  %v560_v27 = vld [vmem:[%s711_s0 + $0x30] ss:$12 sps:$4 sm:$0xff]  }
   0xb   :  { %480 = vmatpush3.bf16.msra.mxu0 %v537_v6  ;;  %v26_v40 = vld [vmem:[#allocation2] sm:$0xff]  ;;  %v27_v44 = vld [vmem:[#allocation2 + $0x8] sm:$0xff]  ;;  %v28_v56 = vld [vmem:[#allocation2 + $0x10] sm:$0xff] }
   0xc   :  { %481 = vmatprep.subr.bf16.mxu0 %v538_v7  ;;  %v462_v60 = vld [vmem:[%s712_s2] ss:$0 sm:$0xff]  ;;  %v29_v61 = vld [vmem:[#allocation2 + $0x18] sm:$0xff]  ;;  %v31_v16 = vld [vmem:[#allocation2 + $0x28] sm:$0xff] }
   0xd   :  { %519 = vmatmul.mubr.msk.bf16.vlgmr.msra.gmra.mrb[0].mxu1 %vm19_vm0, %v553_v17  ;;  %v30_v10 = vld [vmem:[#allocation2 + $0x20] sm:$0xff] }
   0xe   :  { %522 = vmatprep.mubr.msk.bf16.mxu1 %vm563_vm1, %v562_v1 }
   0xf   :  { %482 = vmatpush3.bf16.msra.mxu0 %v539_v8 }
  0x10   :  { %483 = vmatprep.subr.bf16.mxu0 %v540_v9 }
  0x13   :  { %484 = vmatpush3.bf16.msra.mxu0 %v541_v11 }
  0x14   :  { %485 = vmatprep.subr.bf16.mxu0 %v542_v12 }
  0x15   :  { %523 = vmatmul.mubr.msk.bf16.gmra.mrb[4].mxu1 %vm19_vm0, %v557_v21 }
  0x16   :  { %526 = vmatprep.mubr.msk.bf16.mxu1 %vm563_vm1, %v562_v1 }
  0x17   :  { %486 = vmatpush3.bf16.msra.mxu0 %v543_v13 }
  0x18   :  { %487 = vmatprep.subr.bf16.mxu0 %v544_v15 }
  0x1b   :  { %488 = vmatpush3.bf16.msra.mxu0 %v545_v18 }
  0x1c   :  { %489 = vmatprep.subr.bf16.mxu0 %v547_v19 }
  0x1d   :  { %527 = vmatmul.mubr.msk.bf16.gmra.mrb[8].mxu1 %vm19_vm0, %v561_v24 }
  0x1f   :  { %490 = vmatpush3.bf16.msra.mxu0 %v548_v20 }
  0x22   :  { %276 = vmatmul.mubr.bf16.vlgmr.msra.gmra.mrb[0].mxu0 %v550_v22 }
  0x23   :  { %283 = vmatprep.mubr.bf16.mxu0 %v554_v23 }
  0x2a   :  { %284 = vmatmul.mubr.bf16.gmra.mrb[4].mxu0 %v556_v25 }
  0x2b   :  { %291 = vmatprep.mubr.bf16.mxu0 %v558_v26 }
  0x32   :  { %292 = vmatmul.mubr.bf16.gmra.mrb[8].mxu0 %v560_v27 }
  0xe0   :  { %v334_v28 = vpop.f32.mrb[0].mxu1 }
  0xe1   :  { %v520_v29 = vpop.f32.mrb[1].mxu1 }
  0xe2   :  { %v337_v30 = vpop.f32.mrb[2].mxu1 }
  0xe3   :  { %v521_v31 = vpop.f32.mrb[3].mxu1 }
  0xe8   :  { %v342_v32 = vpop.f32.mrb[4].mxu1 }
  0xe9   :  { %v524_v33 = vpop.f32.mrb[5].mxu1 }
  0xea   :  { %v345_v34 = vpop.f32.mrb[6].mxu1 }
  0xeb   :  { %v525_v36 = vpop.f32.mrb[7].mxu1 }
  0xf0   :  { %v350_v45 = vpop.f32.mrb[8].mxu1 }
  0xf1   :  { %v528_v48 = vpop.f32.mrb[9].mxu1 }
  0xf2   :  { %v353_v49 = vpop.f32.mrb[10].mxu1 }
  0xf3   :  { %v529_v52 = vpop.f32.mrb[11].mxu1 }
  0xf5   :  { %v491_v35 = vpop.f32.mrb[0].mxu0 }
  0xf6   :  { %v492_v37 = vpop.f32.mrb[1].mxu0 }
  0xf7   :  { %v493_v38 = vadd.f32 %v492_v37, %v491_v35  ;;  %v494_v39 = vpop.f32.mrb[2].mxu0 }
  0xf8   :  { %v495_v41 = vpop.f32.mrb[3].mxu0 }
  0xf9   :  { %v335_v42 = vadd.f32 %v493_v38, %v334_v28  ;;  %v496_v43 = vadd.f32 %v495_v41, %v494_v39 }
  0xfb   :  { %v357_v46 = vadd.f32 %v335_v42, %v26_v40  ;;  %v338_v47 = vadd.f32 %v496_v43, %v337_v30 }
  0xfd   :  { %363 = vst.msk [vmem:[#allocation2] sm:$0xff] %vm19_vm0, %v357_v46  ;;  %v358_v50 = vadd.f32 %v338_v47, %v27_v44  ;;  %v497_v51 = vpop.f32.mrb[4].mxu0 }
  0xfe   :  { %v498_v53 = vpop.f32.mrb[5].mxu0 }
  0xff   :  { %364 = vst.msk [vmem:[#allocation2 + $0x8] sm:$0xff] %vm19_vm0, %v358_v50  ;;  %v499_v54 = vadd.f32 %v498_v53, %v497_v51  ;;  %v500_v55 = vpop.f32.mrb[6].mxu0 }
 0x100   :  { %v501_v57 = vpop.f32.mrb[7].mxu0 }
 0x101   :  { %v343_v58 = vadd.f32 %v499_v54, %v342_v32  ;;  %v502_v59 = vadd.f32 %v501_v57, %v500_v55 }
 0x103   :  { %v359_v62 = vadd.f32 %v343_v58, %v28_v56  ;;  %v346_v63 = vadd.f32 %v502_v59, %v345_v34 }
 0x104   :  { %v372_v0 = vld [vmem:[#allocation2] sm:$0xff] }
 0x105   :  { %v385_v1 = vadd.f32 %v462_v60, %v372_v0  ;;  %365 = vst.msk [vmem:[#allocation2 + $0x10] sm:$0xff] %vm19_vm0, %v359_v62  ;;  %v360_v2 = vadd.f32 %v346_v63, %v29_v61  ;;  %v503_v3 = vpop.f32.mrb[8].mxu0 }
 0x106   :  { %v373_v4 = vld [vmem:[#allocation2 + $0x8] sm:$0xff]  ;;  %v504_v5 = vpop.f32.mrb[9].mxu0 }
 0x107   :  { %v391_v6 = vmax.f32 %v385_v1, 0.0  ;;  %v386_v7 = vadd.f32 %v462_v60, %v373_v4  ;;  %366 = vst.msk [vmem:[#allocation2 + $0x18] sm:$0xff] %vm19_vm0, %v360_v2  ;;  %v505_v8 = vadd.f32 %v504_v5, %v503_v3  ;;  %v506_v9 = vpop.f32.mrb[10].mxu0 }
 0x108   :  { %v507_v11 = vpop.f32.mrb[11].mxu0 }
 0x109   :  { %v469_v12 = vpack.c.bf16 %v391_v6, %v391_v6  ;;  %v392_v13 = vmax.f32 %v386_v7, 0.0  ;;  %v351_v14 = vadd.f32 %v505_v8, %v350_v45  ;;  %v508_v15 = vadd.f32 %v507_v11, %v506_v9 }
 0x10b   :  { %422 = vst.msk [vmem:[%s713_s3] sm:$0xf] %vm421_vm2, %v469_v12  ;;  %v470_v17 = vpack.c.bf16 %v392_v13, %v392_v13  ;;  %v361_v18 = vadd.f32 %v351_v14, %v30_v10  ;;  %v354_v19 = vadd.f32 %v508_v15, %v353_v49 }
 0x10c   :  { %v374_v20 = vld [vmem:[#allocation2 + $0x10] sm:$0xff] }
 0x10d   :  { %423 = vst.msk [vmem:[%s713_s3 + $0x4] sm:$0xf] %vm421_vm2, %v470_v17  ;;  %v387_v21 = vadd.f32 %v462_v60, %v374_v20  ;;  %v362_v22 = vadd.f32 %v354_v19, %v31_v16 }
 0x10e   :  { %367 = vst.msk [vmem:[#allocation2 + $0x20] sm:$0xff] %vm19_vm0, %v361_v18  ;;  %v375_v23 = vld [vmem:[#allocation2 + $0x18] sm:$0xff] }
 0x10f   :  { %v393_v24 = vmax.f32 %v387_v21, 0.0  ;;  %v388_v25 = vadd.f32 %v462_v60, %v375_v23  ;;  %368 = vst.msk [vmem:[#allocation2 + $0x28] sm:$0xff] %vm19_vm0, %v362_v22 }
 0x111   :  { %v471_v26 = vpack.c.bf16 %v393_v24, %v393_v24  ;;  %v394_v27 = vmax.f32 %v388_v25, 0.0 }
 0x113   :  { %424 = vst.msk [vmem:[%s713_s3 + $0x8] sm:$0xf] %vm421_vm2, %v471_v26  ;;  %v472_v28 = vpack.c.bf16 %v394_v27, %v394_v27 }
 0x115   :  { %v376_v29 = vld [vmem:[#allocation2 + $0x20] sm:$0xff]  ;;  %425 = vst.msk [vmem:[%s713_s3 + $0xc] sm:$0xf] %vm421_vm2, %v472_v28 }
 0x116   :  { %v389_v30 = vadd.f32 %v462_v60, %v376_v29  ;;  %v377_v31 = vld [vmem:[#allocation2 + $0x28] sm:$0xff] }
 0x117   :  { %v390_v33 = vadd.f32 %v462_v60, %v377_v31 }
 0x118   :  { %v395_v32 = vmax.f32 %v389_v30, 0.0 }
 0x119   :  { %v396_v35 = vmax.f32 %v390_v33, 0.0 }
 0x11a   :  { %v473_v34 = vpack.c.bf16 %v395_v32, %v395_v32 }
 0x11b   :  { %v474_v36 = vpack.c.bf16 %v396_v35, %v396_v35 }
 0x11c   :  { %426 = vst.msk [vmem:[%s713_s3 + $0x10] sm:$0xf] %vm421_vm2, %v473_v34 }
 0x11d   :  { %427 = vst.msk [vmem:[%s713_s3 + $0x14] sm:$0xf] %vm421_vm2, %v474_v36 }

// kernel: conformer_forward.44
= control target key start
LH: loop header
LB: loop body
LE: loop exit
PB: predicated region body
PF: predicated region fallthrough
CT: control target
= control target key end

     0   :  { %vm19_vm0 = vcmask 261120   ;;  %v203_v0 = vmov 0.0   ;;  %vm204_vm1 = vmmov 0   ;;  %vm79_vm2 = vcmask 785408   ;;  %s259_s1 = inlined_call_operand.vmem [shape: bf16[96,32], index: 1, kind: input, shape index: {}]   ;;  %s260_s0 = inlined_call_operand.vmem [shape: bf16[16,96], index: 0, kind: input, shape index: {}]   ;;  %s261_s2 = inlined_call_operand.vmem [shape: f32[1,32], index: 2, kind: input, shape index: {}]   ;;  %s262_s3 = inlined_call_operand.vmem [shape: bf16[16,32], index: 3, kind: output, shape index: {}]  }
   0x1   :  { %178 = vmatprep.subr.bf16.mxu0 %v203_v0  ;;  %v196_v1 = vld [vmem:[%s259_s1] sm:$0xff]   ;;  %190 = vmatprep.mubr.msk.bf16.mxu0 %vm204_vm1, %v203_v0  ;;  %20 = vst.msk [vmem:[#allocation2] sm:$0xff] %vm19_vm0, %v203_v0  ;;  %21 = vst.msk [vmem:[#allocation2 + $0x8] sm:$0xff] %vm19_vm0, %v203_v0  ;;  %v197_v2 = vld [vmem:[%s259_s1 + $0x8] sm:$0xff]   ;;  %vm151_vm3 = vcmask 257024  }
   0x2   :  { %179 = vmatpush3.bf16.msra.mxu0 %v196_v1  ;;  %v198_v3 = vld [vmem:[%s259_s1 + $0x10] sm:$0xff]   ;;  %v199_v4 = vld [vmem:[%s259_s1 + $0x18] sm:$0xff]   ;;  %v200_v5 = vld [vmem:[%s259_s1 + $0x20] sm:$0xff]  }
   0x3   :  { %180 = vmatprep.subr.bf16.mxu0 %v203_v0  ;;  %v201_v6 = vld [vmem:[%s259_s1 + $0x28] sm:$0xff]   ;;  %v202_v7 = vld [vmem:[%s260_s0] sm:$0xff]  }
   0x4   :  { %v166_v16 = vld [vmem:[%s261_s2] ss:$0 sm:$0xff] }
   0x6   :  { %181 = vmatpush3.bf16.msra.mxu0 %v197_v2 }
   0x7   :  { %182 = vmatprep.subr.bf16.mxu0 %v203_v0 }
   0x8   :  { %v22_v8 = vld [vmem:[#allocation2] sm:$0xff]  ;;  %v23_v10 = vld [vmem:[#allocation2 + $0x8] sm:$0xff] }
   0xa   :  { %183 = vmatpush3.bf16.msra.mxu0 %v198_v3 }
   0xb   :  { %184 = vmatprep.subr.bf16.mxu0 %v203_v0 }
   0xe   :  { %185 = vmatpush3.bf16.msra.mxu0 %v199_v4 }
   0xf   :  { %186 = vmatprep.subr.bf16.mxu0 %v203_v0 }
  0x12   :  { %187 = vmatpush3.bf16.msra.mxu0 %v200_v5 }
  0x13   :  { %188 = vmatprep.subr.bf16.mxu0 %v203_v0 }
  0x16   :  { %189 = vmatpush3.bf16.msra.mxu0 %v201_v6 }
  0x19   :  { %191 = vmatmul.mubr.msk.bf16.vlgmr.msra.gmra.mrb[0].mxu0 %vm79_vm2, %v202_v7 }
  0xec   :  { %v117_v9 = vpop.f32.mrb[0].mxu0 }
  0xed   :  { %v124_v11 = vadd.f32 %v117_v9, %v22_v8  ;;  %v192_v12 = vpop.f32.mrb[1].mxu0 }
  0xee   :  { %v120_v13 = vpop.f32.mrb[2].mxu0 }
  0xef   :  { %127 = vst.msk [vmem:[#allocation2] sm:$0xff] %vm19_vm0, %v124_v11  ;;  %v125_v14 = vadd.f32 %v120_v13, %v23_v10  ;;  %v193_v15 = vpop.f32.mrb[3].mxu0 }
  0xf1   :  { %128 = vst.msk [vmem:[#allocation2 + $0x8] sm:$0xff] %vm19_vm0, %v125_v14 }
  0xf6   :  { %v132_v17 = vld [vmem:[#allocation2] sm:$0xff] }
  0xf7   :  { %v141_v18 = vadd.f32 %v166_v16, %v132_v17 }
  0xf8   :  { %v133_v19 = vld [vmem:[#allocation2 + $0x8] sm:$0xff] }
  0xf9   :  { %v169_v20 = vpack.c.bf16 %v141_v18, %v141_v18  ;;  %v142_v21 = vadd.f32 %v166_v16, %v133_v19 }
  0xfb   :  { %152 = vst.msk [vmem:[%s262_s3] sm:$0xf] %vm151_vm3, %v169_v20  ;;  %v170_v22 = vpack.c.bf16 %v142_v21, %v142_v21 }
  0xfd   :  { %153 = vst.msk [vmem:[%s262_s3 + $0x4] sm:$0xf] %vm151_vm3, %v170_v22 }

// kernel: conformer_forward.45
= control target key start
LH: loop header
LB: loop body
LE: loop exit
PB: predicated region body
PF: predicated region fallthrough
CT: control target
= control target key end

     0   :  { %vm29_vm0 = vcmask 261120   ;;  %v222_v16 = vmov 0.0   ;;  %vm223_vm1 = vmmov 0   ;;  %s281_s0 = inlined_call_operand.vmem [shape: bf16[16,32], index: 0, kind: input, shape index: {}]   ;;  %s282_s3 = inlined_call_operand.vmem [shape: bf16[32,128], index: 3, kind: input, shape index: {}]   ;;  %s283_s1 = inlined_call_operand.vmem [shape: f32[1,32], index: 1, kind: input, shape index: {}]   ;;  %s284_s2 = inlined_call_operand.vmem [shape: f32[1,32], index: 2, kind: input, shape index: {}]   ;;  %s285_s4 = inlined_call_operand.vmem [shape: f32[1,128], index: 4, kind: input, shape index: {}]   ;;  %s286_s5 = inlined_call_operand.vmem [shape: bf16[16,128], index: 5, kind: output, shape index: {}]  }
   0x1   :  { %v187_v0 = vld [vmem:[%s281_s0] sm:$0xff]   ;;  %198 = vmatprep.subr.bf16.mxu0 %v222_v16  ;;  %v209_v17 = vld [vmem:[%s282_s3 + $0x8] sm:$0xff]   ;;  %202 = vmatprep.mubr.msk.bf16.mxu0 %vm223_vm1, %v222_v16 }
   0x2   :  { %v188_v1 = vunpack.c.l.bf16 %v187_v0  ;;  %v189_v2 = vunpack.c.h.bf16 %v187_v0  ;;  %v208_v15 = vld [vmem:[%s282_s3] sm:$0xff]  }
   0x3   :  { %199 = vmatpush3.bf16.msra.mxu0 %v208_v15  ;;  %v174_v26 = vld [vmem:[%s283_s1] ss:$0 sm:$0xff] }
   0x4   :  { %v30_v3 = vsel %vm29_vm0, %v188_v1, 0.0  ;;  %v33_v4 = vsel %vm29_vm0, %v189_v2, 0.0  ;;  %200 = vmatprep.subr.bf16.mxu0 %v222_v16  ;;  %v175_v30 = vld [vmem:[%s284_s2] ss:$0 sm:$0xff] }
   0x5   :  { %31 = vadd.xlane.f32.xlu0 %v30_v3  ;;  %v176_v36 = vld [vmem:[%s285_s4] ss:$0 sm:$0xff] }
   0x7   :  { %201 = vmatpush3.bf16.msra.mxu0 %v209_v17 }
   0x9   :  { %34 = vadd.xlane.f32.xlu0 %v33_v4 }
  0x92   :  { %v32_v5 = vpop.xlane.xlu0 %31 }
  0x93   :  { %v37_v6 = vmul.f32 0.03125, %v32_v5 }
  0x95   :  { %v39_v7 = vsub.f32 %v188_v1, %v37_v6 }
  0x96   :  { %v35_v8 = vpop.xlane.xlu0 %34 }
  0x97   :  { %v38_v9 = vmul.f32 0.03125, %v35_v8  ;;  %v41_v10 = vmul.f32 %v39_v7, %v39_v7 }
  0x99   :  { %v40_v11 = vsub.f32 %v189_v2, %v38_v9  ;;  %v43_v12 = vsel %vm29_vm0, %v41_v10, 0.0 }
  0x9a   :  { %44 = vadd.xlane.f32.xlu1 %v43_v12 }
  0x9b   :  { %v42_v13 = vmul.f32 %v40_v11, %v40_v11 }
  0x9d   :  { %v46_v14 = vsel %vm29_vm0, %v42_v13, 0.0 }
  0x9e   :  { %47 = vadd.xlane.f32.xlu1 %v46_v14 }
 0x127   :  { %v45_v18 = vpop.xlane.xlu1 %44 }
 0x128   :  { %v49_v19 = vmul.f32 0.03125, %v45_v18 }
 0x12a   :  { %v51_v20 = vadd.f32 1e-05, %v49_v19 }
 0x12b   :  { %v48_v21 = vpop.xlane.xlu1 %47 }
 0x12c   :  { %210 = vrsqrt.f32 %v51_v20  ;;  %v50_v22 = vmul.f32 0.03125, %v48_v21 }
 0x12e   :  { %v52_v23 = vadd.f32 1e-05, %v50_v22 }
 0x130   :  { %212 = vrsqrt.f32 %v52_v23 }
 0x136   :  { %v211_v24 = vpop.eup %210 }
 0x137   :  { %v55_v25 = vmul.f32 %v211_v24, %v39_v7 }
 0x139   :  { %v64_v28 = vmul.f32 %v174_v26, %v55_v25 }
 0x13a   :  { %v213_v27 = vpop.eup %212 }
 0x13b   :  { %v56_v29 = vmul.f32 %v213_v27, %v40_v11  ;;  %v73_v32 = vadd.f32 %v175_v30, %v64_v28 }
 0x13d   :  { %v65_v31 = vmul.f32 %v174_v26, %v56_v29 }
 0x13f   :  { %v74_v33 = vadd.f32 %v175_v30, %v65_v31 }
 0x141   :  { %v75_v34 = vpack.c.bf16 %v74_v33, %v73_v32 }
 0x143   :  { %76 = vst.msk [vmem:[#allocation2] sm:$0xff] %vm29_vm0, %v75_v34 }
 0x14a   :  { %v77_v35 = vld [vmem:[#allocation2] sm:$0xff] }
 0x14b   :  { %203 = vmatmul.mubr.msk.bf16.vlgmr.msra.gmra.mrb[0].mxu0 %vm29_vm0, %v77_v35 }
 0x21e   :  { %v139_v37 = vpop.f32.mrb[0].mxu0 }
 0x21f   :  { %v140_v38 = vadd.f32 %v176_v36, %v139_v37  ;;  %v204_v39 = vpop.f32.mrb[1].mxu0 }
 0x220   :  { %v142_v40 = vpop.f32.mrb[2].mxu0 }
 0x221   :  { %v180_v41 = vmul.f32 -1.442695, %v140_v38  ;;  %v143_v42 = vadd.f32 %v176_v36, %v142_v40  ;;  %v205_v43 = vpop.f32.mrb[3].mxu0 }
 0x223   :  { %214 = vpow2.f32 %v180_v41  ;;  %v181_v44 = vmul.f32 -1.442695, %v143_v42 }
 0x225   :  { %216 = vpow2.f32 %v181_v44 }
 0x22d   :  { %v215_v45 = vpop.eup %214 }
 0x22e   :  { %v152_v46 = vadd.f32 1.0, %v215_v45 }
 0x22f   :  { %v217_v47 = vpop.eup %216 }
 0x230   :  { %218 = vrcp.f32 %v152_v46  ;;  %v153_v48 = vadd.f32 1.0, %v217_v47 }
 0x232   :  { %220 = vrcp.f32 %v153_v48 }
 0x23a   :  { %v219_v49 = vpop.eup %218 }
 0x23b   :  { %v158_v51 = vmul.f32 %v219_v49, %v140_v38 }
 0x23c   :  { %v221_v50 = vpop.eup %220 }
 0x23d   :  { %v159_v52 = vmul.f32 %v221_v50, %v143_v42 }
 0x23f   :  { %v193_v53 = vpack.c.bf16 %v159_v52, %v158_v51 }
 0x241   :  { %194 = vst [vmem:[%s286_s5] sm:$0xff] %v193_v53  }

// kernel: conformer_forward.46
= control target key start
LH: loop header
LB: loop body
LE: loop exit
PB: predicated region body
PF: predicated region fallthrough
CT: control target
= control target key end

     0   :  { %vm22_vm0 = vcmask 261120   ;;  %v240_v0 = vmov 0.0   ;;  %vm241_vm1 = vmmov 0   ;;  %vm175_vm2 = vcmask 257024   ;;  %s310_s1 = inlined_call_operand.vmem [shape: bf16[128,32], index: 1, kind: input, shape index: {}]   ;;  %s311_s0 = inlined_call_operand.vmem [shape: bf16[16,128], index: 0, kind: input, shape index: {}]   ;;  %s312_s2 = inlined_call_operand.vmem [shape: f32[1,32], index: 2, kind: input, shape index: {}]   ;;  %s313_s3 = inlined_call_operand.vmem [shape: bf16[16,32], index: 3, kind: input, shape index: {}]   ;;  %s314_s4 = inlined_call_operand.vmem [shape: bf16[16,32], index: 4, kind: output, shape index: {}]  }
   0x1   :  { %209 = vmatprep.subr.bf16.mxu0 %v240_v0  ;;  %v231_v1 = vld [vmem:[%s310_s1] sm:$0xff]   ;;  %225 = vmatprep.mubr.msk.bf16.mxu0 %vm241_vm1, %v240_v0  ;;  %23 = vst.msk [vmem:[#allocation2] sm:$0xff] %vm22_vm0, %v240_v0  ;;  %24 = vst.msk [vmem:[#allocation2 + $0x8] sm:$0xff] %vm22_vm0, %v240_v0  ;;  %v232_v2 = vld [vmem:[%s310_s1 + $0x8] sm:$0xff]  }
   0x2   :  { %210 = vmatpush3.bf16.msra.mxu0 %v231_v1  ;;  %v233_v3 = vld [vmem:[%s310_s1 + $0x10] sm:$0xff]   ;;  %v234_v4 = vld [vmem:[%s310_s1 + $0x18] sm:$0xff]   ;;  %v235_v5 = vld [vmem:[%s310_s1 + $0x20] sm:$0xff]  }
   0x3   :  { %211 = vmatprep.subr.bf16.mxu0 %v240_v0  ;;  %v236_v6 = vld [vmem:[%s310_s1 + $0x28] sm:$0xff]   ;;  %v237_v7 = vld [vmem:[%s310_s1 + $0x30] sm:$0xff]   ;;  %v238_v8 = vld [vmem:[%s310_s1 + $0x38] sm:$0xff]  }
   0x4   :  { %v239_v9 = vld [vmem:[%s311_s0] sm:$0xff]  }
   0x5   :  { %v191_v18 = vld [vmem:[%s312_s2] ss:$0 sm:$0xff] }
   0x6   :  { %212 = vmatpush3.bf16.msra.mxu0 %v232_v2  ;;  %v197_v19 = vld [vmem:[%s313_s3] sm:$0xff]  }
   0x7   :  { %213 = vmatprep.subr.bf16.mxu0 %v240_v0  ;;  %v198_v22 = vunpack.c.l.bf16 %v197_v19  ;;  %v199_v26 = vunpack.c.h.bf16 %v197_v19 }
   0x8   :  { %v25_v10 = vld [vmem:[#allocation2] sm:$0xff]  ;;  %v26_v12 = vld [vmem:[#allocation2 + $0x8] sm:$0xff] }
   0xa   :  { %214 = vmatpush3.bf16.msra.mxu0 %v233_v3 }
   0xb   :  { %215 = vmatprep.subr.bf16.mxu0 %v240_v0 }
   0xe   :  { %216 = vmatpush3.bf16.msra.mxu0 %v234_v4 }
   0xf   :  { %217 = vmatprep.subr.bf16.mxu0 %v240_v0 }
  0x12   :  { %218 = vmatpush3.bf16.msra.mxu0 %v235_v5 }
  0x13   :  { %219 = vmatprep.subr.bf16.mxu0 %v240_v0 }
  0x16   :  { %220 = vmatpush3.bf16.msra.mxu0 %v236_v6 }
  0x17   :  { %221 = vmatprep.subr.bf16.mxu0 %v240_v0 }
  0x1a   :  { %222 = vmatpush3.bf16.msra.mxu0 %v237_v7 }
  0x1b   :  { %223 = vmatprep.subr.bf16.mxu0 %v240_v0 }
  0x1e   :  { %224 = vmatpush3.bf16.msra.mxu0 %v238_v8 }
  0x21   :  { %226 = vmatmul.mubr.bf16.vlgmr.msra.gmra.mrb[0].mxu0 %v239_v9 }
  0xf4   :  { %v133_v11 = vpop.f32.mrb[0].mxu0 }
  0xf5   :  { %v140_v13 = vadd.f32 %v133_v11, %v25_v10  ;;  %v227_v14 = vpop.f32.mrb[1].mxu0 }
  0xf6   :  { %v136_v15 = vpop.f32.mrb[2].mxu0 }
  0xf7   :  { %143 = vst.msk [vmem:[#allocation2] sm:$0xff] %vm22_vm0, %v140_v13  ;;  %v141_v16 = vadd.f32 %v136_v15, %v26_v12  ;;  %v228_v17 = vpop.f32.mrb[3].mxu0 }
  0xf9   :  { %144 = vst.msk [vmem:[#allocation2 + $0x8] sm:$0xff] %vm22_vm0, %v141_v16 }
  0xfe   :  { %v148_v20 = vld [vmem:[#allocation2] sm:$0xff] }
  0xff   :  { %v157_v21 = vadd.f32 %v191_v18, %v148_v20 }
 0x100   :  { %v149_v23 = vld [vmem:[#allocation2 + $0x8] sm:$0xff] }
 0x101   :  { %v159_v24 = vmul.f32 0.5, %v157_v21  ;;  %v158_v25 = vadd.f32 %v191_v18, %v149_v23 }
 0x103   :  { %v165_v27 = vadd.f32 %v198_v22, %v159_v24  ;;  %v160_v28 = vmul.f32 0.5, %v158_v25 }
 0x105   :  { %v194_v29 = vpack.c.bf16 %v165_v27, %v165_v27  ;;  %v166_v30 = vadd.f32 %v199_v26, %v160_v28 }
 0x107   :  { %176 = vst.msk [vmem:[%s314_s4] sm:$0xf] %vm175_vm2, %v194_v29  ;;  %v195_v31 = vpack.c.bf16 %v166_v30, %v166_v30 }
 0x109   :  { %177 = vst.msk [vmem:[%s314_s4 + $0x4] sm:$0xf] %vm175_vm2, %v195_v31 }

// kernel: conformer_forward.47
= control target key start
LH: loop header
LB: loop body
LE: loop exit
PB: predicated region body
PF: predicated region fallthrough
CT: control target
= control target key end

     0   :  { %vm29_vm0 = vcmask 261120   ;;  %v194_v16 = vmov 0.0   ;;  %vm195_vm1 = vmmov 0   ;;  %vm154_vm2 = vcmask 781312   ;;  %s256_s0 = inlined_call_operand.vmem [shape: bf16[16,32], index: 0, kind: input, shape index: {}]   ;;  %s257_s3 = inlined_call_operand.vmem [shape: bf16[32,96], index: 3, kind: input, shape index: {}]   ;;  %s258_s1 = inlined_call_operand.vmem [shape: f32[1,32], index: 1, kind: input, shape index: {}]   ;;  %s259_s2 = inlined_call_operand.vmem [shape: f32[1,32], index: 2, kind: input, shape index: {}]   ;;  %s260_s4 = inlined_call_operand.vmem [shape: f32[1,96], index: 4, kind: input, shape index: {}]   ;;  %s261_s5 = inlined_call_operand.vmem [shape: bf16[16,96], index: 5, kind: output, shape index: {}]  }
   0x1   :  { %v172_v0 = vld [vmem:[%s256_s0] sm:$0xff]   ;;  %178 = vmatprep.subr.bf16.mxu0 %v194_v16  ;;  %v189_v17 = vld [vmem:[%s257_s3 + $0x8] sm:$0xff]   ;;  %182 = vmatprep.mubr.msk.bf16.mxu0 %vm195_vm1, %v194_v16 }
   0x2   :  { %v173_v1 = vunpack.c.l.bf16 %v172_v0  ;;  %v174_v2 = vunpack.c.h.bf16 %v172_v0  ;;  %v188_v15 = vld [vmem:[%s257_s3] sm:$0xff]  }
   0x3   :  { %179 = vmatpush3.bf16.msra.mxu0 %v188_v15  ;;  %v161_v26 = vld [vmem:[%s258_s1] ss:$0 sm:$0xff] }
   0x4   :  { %v30_v3 = vsel %vm29_vm0, %v173_v1, 0.0  ;;  %v33_v4 = vsel %vm29_vm0, %v174_v2, 0.0  ;;  %180 = vmatprep.subr.bf16.mxu0 %v194_v16  ;;  %v162_v30 = vld [vmem:[%s259_s2] ss:$0 sm:$0xff] }
   0x5   :  { %31 = vadd.xlane.f32.xlu0 %v30_v3  ;;  %v163_v36 = vld [vmem:[%s260_s4] ss:$0 sm:$0xff] }
   0x7   :  { %181 = vmatpush3.bf16.msra.mxu0 %v189_v17 }
   0x9   :  { %34 = vadd.xlane.f32.xlu0 %v33_v4 }
  0x92   :  { %v32_v5 = vpop.xlane.xlu0 %31 }
  0x93   :  { %v37_v6 = vmul.f32 0.03125, %v32_v5 }
  0x95   :  { %v39_v7 = vsub.f32 %v173_v1, %v37_v6 }
  0x96   :  { %v35_v8 = vpop.xlane.xlu0 %34 }
  0x97   :  { %v38_v9 = vmul.f32 0.03125, %v35_v8  ;;  %v41_v10 = vmul.f32 %v39_v7, %v39_v7 }
  0x99   :  { %v40_v11 = vsub.f32 %v174_v2, %v38_v9  ;;  %v43_v12 = vsel %vm29_vm0, %v41_v10, 0.0 }
  0x9a   :  { %44 = vadd.xlane.f32.xlu1 %v43_v12 }
  0x9b   :  { %v42_v13 = vmul.f32 %v40_v11, %v40_v11 }
  0x9d   :  { %v46_v14 = vsel %vm29_vm0, %v42_v13, 0.0 }
  0x9e   :  { %47 = vadd.xlane.f32.xlu1 %v46_v14 }
 0x127   :  { %v45_v18 = vpop.xlane.xlu1 %44 }
 0x128   :  { %v49_v19 = vmul.f32 0.03125, %v45_v18 }
 0x12a   :  { %v51_v20 = vadd.f32 1e-05, %v49_v19 }
 0x12b   :  { %v48_v21 = vpop.xlane.xlu1 %47 }
 0x12c   :  { %190 = vrsqrt.f32 %v51_v20  ;;  %v50_v22 = vmul.f32 0.03125, %v48_v21 }
 0x12e   :  { %v52_v23 = vadd.f32 1e-05, %v50_v22 }
 0x130   :  { %192 = vrsqrt.f32 %v52_v23 }
 0x136   :  { %v191_v24 = vpop.eup %190 }
 0x137   :  { %v55_v25 = vmul.f32 %v191_v24, %v39_v7 }
 0x139   :  { %v64_v28 = vmul.f32 %v161_v26, %v55_v25 }
 0x13a   :  { %v193_v27 = vpop.eup %192 }
 0x13b   :  { %v56_v29 = vmul.f32 %v193_v27, %v40_v11  ;;  %v73_v32 = vadd.f32 %v162_v30, %v64_v28 }
 0x13d   :  { %v65_v31 = vmul.f32 %v161_v26, %v56_v29 }
 0x13f   :  { %v74_v33 = vadd.f32 %v162_v30, %v65_v31 }
 0x141   :  { %v75_v34 = vpack.c.bf16 %v74_v33, %v73_v32 }
 0x143   :  { %76 = vst.msk [vmem:[#allocation2] sm:$0xff] %vm29_vm0, %v75_v34 }
 0x14a   :  { %v77_v35 = vld [vmem:[#allocation2] sm:$0xff] }
 0x14b   :  { %183 = vmatmul.mubr.msk.bf16.vlgmr.msra.gmra.mrb[0].mxu0 %vm29_vm0, %v77_v35 }
 0x21e   :  { %v139_v37 = vpop.f32.mrb[0].mxu0 }
 0x21f   :  { %v140_v38 = vadd.f32 %v163_v36, %v139_v37  ;;  %v184_v39 = vpop.f32.mrb[1].mxu0 }
 0x220   :  { %v142_v40 = vpop.f32.mrb[2].mxu0 }
 0x221   :  { %v169_v41 = vpack.c.bf16 %v140_v38, %v140_v38  ;;  %v143_v42 = vadd.f32 %v163_v36, %v142_v40  ;;  %v185_v43 = vpop.f32.mrb[3].mxu0 }
 0x223   :  { %155 = vst.msk [vmem:[%s261_s5] sm:$0xf] %vm154_vm2, %v169_v41  ;;  %v170_v44 = vpack.c.bf16 %v143_v42, %v143_v42 }
 0x225   :  { %156 = vst.msk [vmem:[%s261_s5 + $0x4] sm:$0xf] %vm154_vm2, %v170_v44 }

// kernel: conformer_forward.48
= control target key start
LH: loop header
LB: loop body
LE: loop exit
PB: predicated region body
PF: predicated region fallthrough
CT: control target
= control target key end

     0   :  { %s859_s0 = inlined_call_operand.vmem [shape: s32[2], index: 0, kind: input, shape index: {}]   ;;  %s860_s1 = inlined_call_operand.vmem [shape: bf16[2,4,7,8], index: 1, kind: input, shape index: {}]   ;;  %s861_s2 = inlined_call_operand.vmem [shape: bf16[2,4,7,8], index: 2, kind: input, shape index: {}]   ;;  %s862_s3 = inlined_call_operand.vmem [shape: bf16[2,4,7,8], index: 3, kind: input, shape index: {}]   ;;  %s863_s4 = inlined_call_operand.vmem [shape: bf16[2,4,7,8], index: 4, kind: output, shape index: {}]  }
   0x1   :  { %s9_s17 = sshll.u32 %s859_s0, 4  ;;  %s10_s17 = int_to_ptr.vmem [resolvable:$true] %s9_s17 }
   0x2   :  { %s695_s18 = scalar_lea.vmem %s10_s17, 16  ;;  %p700_p1 = scmp.lt.s32.totalorder %s10_s17, %s10_s17 }
   0x3   :  { %p696_p0 = scmp.ne.s32.totalorder %s10_s17, %s695_s18  ;;  %p701_p2 = scmp.lt.s32.totalorder %s695_s18, %s695_s18 }
   0x5   :  { %p702_p3 = por %p701_p2, %p700_p1 }
   0x7   :  { %p703_p4 = pnand %p702_p3, %p696_p0 }
   0x9   :  { %706 = shalt.err (!%p703_p4)  }
   0xa   :  { %s749_s19 = smov [#allocation6]  }
   0xb   :  { %12 = dma.vmem_to_smem %s10_s17, 16, %s749_s19, [#allocation5] }
   0xc   :  { %727 = dma.done.wait [#allocation5], 16 }
   0xd   :  { %728 = vsyncadd [#allocation5], 4294967280 }
   0xe   :  { %14 = sfence }
   0xf   :  { %s783_s20 = smov 0   ;;  %s785_s21 = smov 0  }
  0x10   :  { %s787_s22 = smov 0   ;;  %s789_s0 = smov 0  }
  0x11   :  { %s791_s23 = smov 0  }
  0x12 LB: > { %s35_s24 = sadd.s32 1, %s739_s22  ;;  %s39_s25 = sadd.s32 1, %s743_s0  ;;  %s747_s23 = sphi %s791_s23, %s20_s23   ;;  %s743_s0 = sphi %s789_s0, %s867_s0   ;;  %s739_s22 = sphi %s787_s22, %s866_s22   ;;  %s735_s21 = sphi %s785_s21, %s865_s21   ;;  %s731_s20 = sphi %s783_s20, %s864_s20  }
  0x13   : > { %p37_p5 = scmp.ge.s32.totalorder %s35_s24, 4  ;;  %p612_p6 = scmp.ge.s32.totalorder %s747_s23, 1 }
  0x14   : > { %p210_p7 = scmp.lt.s32.totalorder %s747_s23, 9 }
  0x15   : > { %s869_s24 = smov (%p37_p5, %s35_s24), 0  ;;  %s871_s25 = smov (!%p37_p5, %s39_s25), %s743_s0 }
  0x16   : > { %p211_p8 = pnand %p612_p6, %p210_p7  ;;  %p41_p9 = scmp.ge.s32.totalorder %s871_s25, 2 }
  0x17   : > { %vm309_vm0 = vcmask (!%p211_p8), 63488   ;;  %p262_p10 = scmp.lt.s32.totalorder (!%p211_p8), %s735_s21, 1  ;;  %p264_p11 = scmp.lt.s32.totalorder (!%p211_p8), %s731_s20, 3  ;;  %v750_v0 = vmov (!%p211_p8), 0.0   ;;  %vm751_vm1 = vmmov (!%p211_p8), 0   ;;  %vm321_vm2 = vcmask (!%p211_p8), 64512  }
  0x18   : > { %s873_s25 = smov (%p41_p9, %s871_s25), 0  ;;  %214 = sbr.rel (%p211_p8) target bundleno = 847 (0x34f), region = 32 }
  0x19   : > { %310 = vst.msk [vmem:[#allocation4] sm:$0x7f] (!%p211_p8), %vm309_vm0, %v750_v0  ;;  %629 = vmatprep.subr.bf16.mxu0 (!%p211_p8), %v750_v0  ;;  %631 = vmatprep.mubr.msk.bf16.mxu0 (!%p211_p8), %vm751_vm1, %v750_v0  ;;  %vm306_vm3 = vcmask (!%p211_p8), 6144   ;;  %v752_v4 = vmov (!%p211_p8), -1e+09   ;;  %s301_s10 = sld [smem:[#allocation6 + %s735_s21]] (!%p211_p8)  ;;  %v315_v5 = vlaneseq (!%p211_p8) }
  0x1a   : > { %635 = vmatprep.subr.bf16.mxu1 (!%p211_p8), %v750_v0  ;;  %637 = vmatprep.mubr.msk.bf16.mxu1 (!%p211_p8), %vm751_vm1, %v750_v0  ;;  %307 = vst.msk [vmem:[#allocation2] sm:$0x7f] (!%p211_p8), %vm306_vm3, %v752_v4  ;;  %308 = vst.msk [vmem:[#allocation3] sm:$0x7f] (!%p211_p8), %vm306_vm3, %v750_v0  ;;  %vm371_vm5 = vcmask (!%p211_p8), 55296   ;;  %v753_v15 = vmov (!%p211_p8), 0  }
  0x1b   : > { %v316_v6 = vand.u32 (!%p211_p8), 127, %v315_v5  ;;  %687 = vset.pattern.permute.xlu0 (!%p211_p8), %v753_v15  ;;  %688 = vset.pattern.permute.xlu1 (!%p211_p8), %v753_v15  ;;  %vm407_vm6 = vcmask (!%p211_p8), 1042432   ;;  %vm408_vm7 = vcmask (!%p211_p8), 1043456   ;;  %v754_v21 = vmov (!%p211_p8), 65535  }
  0x1c   : > { %v409_v22 = vsel (!%p211_p8), %vm407_vm6, 4294967295, %v754_v21  ;;  %vm403_vm8 = vcmask (!%p211_p8), 56320   ;;  %vm471_vm9 = vcmask (!%p211_p8), 60416   ;;  %vm472_vm10 = vsmask.f32 (!%p211_p8), 3328 }
  0x1d   : > { %v410_v23 = vsel (!%p211_p8), %vm408_vm7, %v409_v22, 0  ;;  %vm473_vm11 = vmand (!%p211_p8), %vm471_vm9, %vm472_vm10 }
  0x1f   : > { %s263_s26 = scalar_select %p262_p10, %s735_s21, 1  ;;  %v319_v7 = vstv %s301_s10 }
  0x20   : > { %s875_s20 = smov (!%p264_p11, %s731_s20), 3  ;;  %vm320_vm4 = vcmp.lt.s32.totalorder %v316_v6, %v319_v7  ;;  %v395_v38 = vld [vmem:[#allocation4] sm:$0x7f] }
  0x21   : > { %s613_s27 = sshll.u32 %s263_s26, 2  ;;  %v370_v16 = vld [vmem:[#allocation2] sm:$0x7f]  ;;  %v387_v33 = vld [vmem:[#allocation3] sm:$0x7f] }
  0x22   : > { %s267_s28 = sadd.s32 %s613_s27, %s875_s20 }
  0x23   : > { %s818_s29 = sshll.u32 %s267_s28, 2 }
  0x24   : > { %s280_s6 = scalar_lea.vmem %s861_s2, %s818_s29  ;;  %s269_s9 = scalar_lea.vmem %s860_s1, %s818_s29 }
  0x25   : > { %v312_v1 = vld [vmem:[%s280_s6] sm:$0xf]  ;;  %s291_s13 = scalar_lea.vmem %s862_s3, %s818_s29  ;;  %s299_s16 = scalar_lea.vmem %s863_s4, %s818_s29 }
  0x26   : > { %v326_v2 = vsel %vm321_vm2, %v312_v1, 0  ;;  %v311_v3 = vld [vmem:[%s269_s9] sm:$0xf] }
  0x27   : > { %630 = vmatpush3.bf16.xpose.msra.mxu0 %v326_v2  ;;  %v313_v20 = vld [vmem:[%s291_s13] sm:$0xf] }
  0x28   : > { %v412_v24 = vand.u32 %v410_v23, %v313_v20  ;;  %v474_v50 = vld [vmem:[%s299_s16] sm:$0xf] }
  0x2a   : > { %636 = vmatpush3.bf16.msra.mxu1 %v412_v24 }
  0x2e   : > { %632 = vmatmul.mubr.msk.bf16.vlgmr.msra.gmra.mrb[0].mxu0 %vm321_vm2, %v311_v3 }
 0x101   : > { %v362_v8 = vpop.f32.mrb[0].mxu0 }
 0x102   : > { %v368_v9 = vmul.f32 0.35355338, %v362_v8  ;;  %v633_v10 = vpop.f32.mrb[1].mxu0 }
 0x103   : > { %v365_v11 = vpop.f32.mrb[2].mxu0 }
 0x104   : > { %v634_v12 = vpop.f32.mrb[3].mxu0  ;;  %v369_v13 = vsel %vm320_vm4, %v368_v9, -1e+09 }
 0x105   : > { %v372_v14 = vsel %vm371_vm5, %v369_v13, -inf }
 0x106   : > { %373 = vmax.xlane.f32.xlu0 %v372_v14 }
 0x193   : > { %v374_v17 = vpop.xlane.xlu0 %373 }
 0x194   : > { %v375_v18 = vmax.f32 %v370_v16, %v374_v17 }
 0x196   : > { %v376_v19 = vsub.f32 %v370_v16, %v375_v18  ;;  %457 = vst.msk [vmem:[#allocation2] sm:$0x7f] %vm306_vm3, %v375_v18  ;;  %381 = vperm.xlu0 %687, %v375_v18  }
 0x198   : > { %v377_v31 = vmul.f32 1.442695, %v376_v19 }
 0x215   : > { %v382_v25 = vpop.permute.xlu0 %381 }
 0x216   : > { %v384_v26 = vsub.f32 %v369_v13, %v382_v25 }
 0x218   : > { %v385_v27 = vmul.f32 1.442695, %v384_v26 }
 0x21a   : > { %689 = vpow2.f32 %v385_v27 }
 0x21b   : > { %691 = vpow2.f32 %v377_v31 }
 0x224   : > { %v690_v28 = vpop.eup %689 }
 0x225   : > { %v389_v29 = vsel %vm371_vm5, %v690_v28, 0.0  ;;  %v402_v30 = vpack.c.bf16 %v690_v28, %v690_v28  ;;  %v692_v32 = vpop.eup %691 }
 0x226   : > { %390 = vadd.xlane.f32.xlu1 %v389_v29  ;;  %v388_v34 = vmul.f32 %v692_v32, %v387_v33 }
 0x227   : > { %638 = vmatmul.mubr.msk.bf16.vlgmr.msra.gmra.mrb[0].mxu1 %vm403_vm8, %v402_v30 }
 0x237   : > { %398 = vperm.xlu1 %688, %v692_v32  }
 0x2b3   : > { %v391_v35 = vpop.xlane.xlu1 %390 }
 0x2b4   : > { %v392_v36 = vadd.f32 %v391_v35, %v388_v34 }
 0x2b6   : > { %394 = vst.msk [vmem:[#allocation3] sm:$0x7f] %vm306_vm3, %v392_v36 }
 0x2b7   : > { %v399_v39 = vpop.permute.xlu1 %398 }
 0x2b8   : > { %v401_v40 = vmul.f32 %v399_v39, %v395_v38 }
 0x2bd   : > { %v462_v37 = vld [vmem:[#allocation3] sm:$0x7f] }
 0x2be   : > { %465 = vperm.xlu1 %688, %v462_v37  }
 0x2fa   : > { %v448_v41 = vpop.f32.mrb[0].mxu1 }
 0x2fb   : > { %v454_v42 = vadd.f32 %v448_v41, %v401_v40  ;;  %v639_v43 = vpop.f32.mrb[1].mxu1 }
 0x2fc   : > { %v451_v44 = vpop.f32.mrb[2].mxu1 }
 0x2fd   : > { %456 = vst.msk [vmem:[#allocation4] sm:$0x7f] %vm309_vm0, %v454_v42  ;;  %v640_v45 = vpop.f32.mrb[3].mxu1 }
 0x304   : > { %v461_v48 = vld [vmem:[#allocation4] sm:$0x7f] }
 0x33d   : > { %v466_v46 = vpop.permute.xlu1 %465 }
 0x33e   : > { %693 = vrcp.f32 %v466_v46 }
 0x348   : > { %v694_v47 = vpop.eup %693 }
 0x349   : > { %v469_v49 = vmul.f32 %v694_v47, %v461_v48 }
 0x34b   : > { %v470_v51 = vpack.c.bf16 %v469_v49, %v469_v49 }
 0x34d   : > { %v475_v52 = vsel %vm473_vm11, %v470_v51, %v474_v50 }
 0x34e   : > { %476 = vst [vmem:[%s299_s16] sm:$0xf] %v475_v52 }
 0x34f PF: > { %s20_s23 = sadd.s32 1, %s747_s23   ;;  %s864_s20 = smov %s739_s22 }
 0x350   : > { %p17_p12 = scmp.ge.s32.totalorder %s20_s23, 10   ;;  %s865_s21 = smov %s743_s0 }
 0x351   : > { %s866_s22 = smov %s869_s24  ;;  %s867_s0 = smov %s873_s25 }
 0x352   :  { %19 = sbr.rel (!%p17_p12) target bundleno = 18 (0x12), region = 76 }

// kernel: conformer_forward.49
= control target key start
LH: loop header
LB: loop body
LE: loop exit
PB: predicated region body
PF: predicated region fallthrough
CT: control target
= control target key end

     0   :  { %vm22_vm0 = vcmask 261120   ;;  %v163_v0 = vmov 0.0   ;;  %vm164_vm1 = vmmov 0   ;;  %vm127_vm2 = vcmask 257024   ;;  %s216_s1 = inlined_call_operand.vmem [shape: bf16[32,32], index: 1, kind: input, shape index: {}]   ;;  %s217_s0 = inlined_call_operand.vmem [shape: bf16[16,32], index: 0, kind: input, shape index: {}]   ;;  %s218_s3 = inlined_call_operand.vmem [shape: bf16[16,32], index: 3, kind: input, shape index: {}]   ;;  %s219_s2 = inlined_call_operand.vmem [shape: f32[1,32], index: 2, kind: input, shape index: {}]   ;;  %s220_s4 = inlined_call_operand.vmem [shape: bf16[16,32], index: 4, kind: output, shape index: {}]  }
   0x1   :  { %150 = vmatprep.subr.bf16.mxu0 %v163_v0  ;;  %v160_v1 = vld [vmem:[%s216_s1] sm:$0xff]   ;;  %154 = vmatprep.mubr.msk.bf16.mxu0 %vm164_vm1, %v163_v0  ;;  %23 = vst.msk [vmem:[#allocation2] sm:$0xff] %vm22_vm0, %v163_v0  ;;  %24 = vst.msk [vmem:[#allocation2 + $0x8] sm:$0xff] %vm22_vm0, %v163_v0  ;;  %v161_v2 = vld [vmem:[%s216_s1 + $0x8] sm:$0xff]  }
   0x2   :  { %151 = vmatpush3.bf16.msra.mxu0 %v160_v1  ;;  %v162_v3 = vld [vmem:[%s217_s0] sm:$0xff]  }
   0x3   :  { %152 = vmatprep.subr.bf16.mxu0 %v163_v0  ;;  %v144_v12 = vld [vmem:[%s218_s3] sm:$0xff]  }
   0x4   :  { %v138_v13 = vld [vmem:[%s219_s2] ss:$0 sm:$0xff]  ;;  %v145_v14 = vunpack.c.l.bf16 %v144_v12  ;;  %v146_v17 = vunpack.c.h.bf16 %v144_v12 }
   0x6   :  { %153 = vmatpush3.bf16.msra.mxu0 %v161_v2 }
   0x8   :  { %v25_v4 = vld [vmem:[#allocation2] sm:$0xff]  ;;  %v26_v6 = vld [vmem:[#allocation2 + $0x8] sm:$0xff] }
   0x9   :  { %155 = vmatmul.mubr.msk.bf16.vlgmr.msra.gmra.mrb[0].mxu0 %vm22_vm0, %v162_v3 }
  0xdc   :  { %v88_v5 = vpop.f32.mrb[0].mxu0 }
  0xdd   :  { %v95_v7 = vadd.f32 %v88_v5, %v25_v4  ;;  %v156_v8 = vpop.f32.mrb[1].mxu0 }
  0xde   :  { %v91_v9 = vpop.f32.mrb[2].mxu0 }
  0xdf   :  { %97 = vst.msk [vmem:[#allocation2] sm:$0xff] %vm22_vm0, %v95_v7  ;;  %v96_v10 = vadd.f32 %v91_v9, %v26_v6  ;;  %v157_v11 = vpop.f32.mrb[3].mxu0 }
  0xe1   :  { %98 = vst.msk [vmem:[#allocation2 + $0x8] sm:$0xff] %vm22_vm0, %v96_v10 }
  0xe6   :  { %v102_v15 = vld [vmem:[#allocation2] sm:$0xff] }
  0xe7   :  { %v111_v16 = vadd.f32 %v138_v13, %v102_v15 }
  0xe8   :  { %v103_v18 = vld [vmem:[#allocation2 + $0x8] sm:$0xff] }
  0xe9   :  { %v117_v19 = vadd.f32 %v145_v14, %v111_v16  ;;  %v112_v20 = vadd.f32 %v138_v13, %v103_v18 }
  0xeb   :  { %v141_v21 = vpack.c.bf16 %v117_v19, %v117_v19  ;;  %v118_v22 = vadd.f32 %v146_v17, %v112_v20 }
  0xed   :  { %128 = vst.msk [vmem:[%s220_s4] sm:$0xf] %vm127_vm2, %v141_v21  ;;  %v142_v23 = vpack.c.bf16 %v118_v22, %v118_v22 }
  0xef   :  { %129 = vst.msk [vmem:[%s220_s4 + $0x4] sm:$0xf] %vm127_vm2, %v142_v23 }

// kernel: conformer_forward.50
= control target key start
LH: loop header
LB: loop body
LE: loop exit
PB: predicated region body
PF: predicated region fallthrough
CT: control target
= control target key end

     0   :  { %vm35_vm0 = vcmask 261120   ;;  %v305_v16 = vmov 0.0   ;;  %vm306_vm1 = vmmov 0   ;;  %vm238_vm2 = vcmask 257024   ;;  %s387_s0 = inlined_call_operand.vmem [shape: bf16[16,32], index: 0, kind: input, shape index: {}]   ;;  %s388_s3 = inlined_call_operand.vmem [shape: bf16[32,32], index: 3, kind: input, shape index: {}]   ;;  %s389_s4 = inlined_call_operand.vmem [shape: bf16[32,32], index: 4, kind: input, shape index: {}]   ;;  %s390_s1 = inlined_call_operand.vmem [shape: f32[1,32], index: 1, kind: input, shape index: {}]   ;;  %s391_s2 = inlined_call_operand.vmem [shape: f32[1,32], index: 2, kind: input, shape index: {}]   ;;  %s392_s6 = inlined_call_operand.vmem [shape: f32[1,32], index: 6, kind: input, shape index: {}]   ;;  %s393_s5 = inlined_call_operand.vmem [shape: f32[1,32], index: 5, kind: input, shape index: {}]   ;;  %s394_s7 = inlined_call_operand.vmem [shape: bf16[16,32], index: 7, kind: output, shape index: {}]  }
   0x1   :  { %v262_v0 = vld [vmem:[%s387_s0] sm:$0xff]   ;;  %271 = vmatprep.subr.bf16.mxu0 %v305_v16  ;;  %279 = vmatprep.subr.bf16.mxu1 %v305_v16  ;;  %v291_v18 = vld [vmem:[%s388_s3 + $0x8] sm:$0xff]  }
   0x2   :  { %v263_v1 = vunpack.c.l.bf16 %v262_v0  ;;  %v264_v2 = vunpack.c.h.bf16 %v262_v0  ;;  %v289_v15 = vld [vmem:[%s388_s3] sm:$0xff]   ;;  %275 = vmatprep.mubr.msk.bf16.mxu0 %vm306_vm1, %v305_v16  ;;  %v292_v19 = vld [vmem:[%s389_s4 + $0x8] sm:$0xff]   ;;  %283 = vmatprep.mubr.msk.bf16.mxu1 %vm306_vm1, %v305_v16 }
   0x3   :  { %v290_v17 = vld [vmem:[%s389_s4] sm:$0xff]   ;;  %272 = vmatpush3.bf16.msra.mxu0 %v289_v15 }
   0x4   :  { %v36_v3 = vsel %vm35_vm0, %v263_v1, 0.0  ;;  %v39_v4 = vsel %vm35_vm0, %v264_v2, 0.0  ;;  %280 = vmatpush3.bf16.msra.mxu1 %v290_v17  ;;  %273 = vmatprep.subr.bf16.mxu0 %v305_v16  ;;  %v245_v28 = vld [vmem:[%s390_s1] ss:$0 sm:$0xff] }
   0x5   :  { %37 = vadd.xlane.f32.xlu0 %v36_v3  ;;  %281 = vmatprep.subr.bf16.mxu1 %v305_v16  ;;  %v246_v32 = vld [vmem:[%s391_s2] ss:$0 sm:$0xff] }
   0x6   :  { %v251_v38 = vld [vmem:[%s392_s6] ss:$0 sm:$0xff] }
   0x7   :  { %274 = vmatpush3.bf16.msra.mxu0 %v291_v18  ;;  %v247_v55 = vld [vmem:[%s393_s5] ss:$0 sm:$0xff] }
   0x8   :  { %282 = vmatpush3.bf16.msra.mxu1 %v292_v19 }
   0x9   :  { %40 = vadd.xlane.f32.xlu0 %v39_v4 }
  0x92   :  { %v38_v5 = vpop.xlane.xlu0 %37 }
  0x93   :  { %v43_v6 = vmul.f32 0.03125, %v38_v5 }
  0x95   :  { %v45_v7 = vsub.f32 %v263_v1, %v43_v6 }
  0x96   :  { %v41_v8 = vpop.xlane.xlu0 %40 }
  0x97   :  { %v44_v9 = vmul.f32 0.03125, %v41_v8  ;;  %v47_v10 = vmul.f32 %v45_v7, %v45_v7 }
  0x99   :  { %v46_v11 = vsub.f32 %v264_v2, %v44_v9  ;;  %v49_v12 = vsel %vm35_vm0, %v47_v10, 0.0 }
  0x9a   :  { %50 = vadd.xlane.f32.xlu1 %v49_v12 }
  0x9b   :  { %v48_v13 = vmul.f32 %v46_v11, %v46_v11 }
  0x9d   :  { %v52_v14 = vsel %vm35_vm0, %v48_v13, 0.0 }
  0x9e   :  { %53 = vadd.xlane.f32.xlu1 %v52_v14 }
 0x127   :  { %v51_v20 = vpop.xlane.xlu1 %50 }
 0x128   :  { %v55_v21 = vmul.f32 0.03125, %v51_v20 }
 0x12a   :  { %v57_v22 = vadd.f32 1e-05, %v55_v21 }
 0x12b   :  { %v54_v23 = vpop.xlane.xlu1 %53 }
 0x12c   :  { %293 = vrsqrt.f32 %v57_v22  ;;  %v56_v24 = vmul.f32 0.03125, %v54_v23 }
 0x12e   :  { %v58_v25 = vadd.f32 1e-05, %v56_v24 }
 0x130   :  { %295 = vrsqrt.f32 %v58_v25 }
 0x136   :  { %v294_v26 = vpop.eup %293 }
 0x137   :  { %v61_v27 = vmul.f32 %v294_v26, %v45_v7 }
 0x139   :  { %v70_v30 = vmul.f32 %v245_v28, %v61_v27 }
 0x13a   :  { %v296_v29 = vpop.eup %295 }
 0x13b   :  { %v62_v31 = vmul.f32 %v296_v29, %v46_v11  ;;  %v79_v34 = vadd.f32 %v246_v32, %v70_v30 }
 0x13d   :  { %v71_v33 = vmul.f32 %v245_v28, %v62_v31 }
 0x13f   :  { %v80_v35 = vadd.f32 %v246_v32, %v71_v33 }
 0x141   :  { %v81_v36 = vpack.c.bf16 %v80_v35, %v79_v34 }
 0x143   :  { %82 = vst.msk [vmem:[#allocation2] sm:$0xff] %vm35_vm0, %v81_v36 }
 0x14a   :  { %v83_v37 = vld [vmem:[#allocation2] sm:$0xff] }
 0x14b   :  { %276 = vmatmul.mubr.msk.bf16.vlgmr.msra.gmra.mrb[0].mxu0 %vm35_vm0, %v83_v37  ;;  %284 = vmatmul.mubr.msk.bf16.vlgmr.msra.gmra.mrb[0].mxu1 %vm35_vm0, %v83_v37 }
 0x21e   :  { %v145_v39 = vpop.f32.mrb[0].mxu0  ;;  %v209_v40 = vpop.f32.mrb[0].mxu1 }
 0x21f   :  { %v210_v41 = vadd.f32 %v251_v38, %v209_v40  ;;  %v277_v42 = vpop.f32.mrb[1].mxu0  ;;  %v285_v43 = vpop.f32.mrb[1].mxu1  ;;  %v146_v56 = vadd.f32 %v247_v55, %v145_v39 }
 0x220   :  { %v148_v44 = vpop.f32.mrb[2].mxu0  ;;  %v212_v45 = vpop.f32.mrb[2].mxu1 }
 0x221   :  { %v255_v46 = vmul.f32 -1.442695, %v210_v41  ;;  %v213_v47 = vadd.f32 %v251_v38, %v212_v45  ;;  %v278_v48 = vpop.f32.mrb[3].mxu0  ;;  %v286_v49 = vpop.f32.mrb[3].mxu1  ;;  %v149_v59 = vadd.f32 %v247_v55, %v148_v44 }
 0x223   :  { %297 = vpow2.f32 %v255_v46  ;;  %v256_v50 = vmul.f32 -1.442695, %v213_v47 }
 0x225   :  { %299 = vpow2.f32 %v256_v50 }
 0x22d   :  { %v298_v51 = vpop.eup %297 }
 0x22e   :  { %v222_v52 = vadd.f32 1.0, %v298_v51 }
 0x22f   :  { %v300_v53 = vpop.eup %299 }
 0x230   :  { %301 = vrcp.f32 %v222_v52  ;;  %v223_v54 = vadd.f32 1.0, %v300_v53 }
 0x232   :  { %303 = vrcp.f32 %v223_v54 }
 0x23a   :  { %v302_v57 = vpop.eup %301 }
 0x23b   :  { %v228_v58 = vmul.f32 %v302_v57, %v146_v56 }
 0x23c   :  { %v304_v60 = vpop.eup %303 }
 0x23d   :  { %v259_v61 = vpack.c.bf16 %v228_v58, %v228_v58  ;;  %v229_v62 = vmul.f32 %v304_v60, %v149_v59 }
 0x23f   :  { %239 = vst.msk [vmem:[%s394_s7] sm:$0xf] %vm238_vm2, %v259_v61  ;;  %v260_v63 = vpack.c.bf16 %v229_v62, %v229_v62 }
 0x241   :  { %240 = vst.msk [vmem:[%s394_s7 + $0x4] sm:$0xf] %vm238_vm2, %v260_v63 }

// kernel: conformer_forward.51
= control target key start
LH: loop header
LB: loop body
LE: loop exit
PB: predicated region body
PF: predicated region fallthrough
CT: control target
= control target key end

     0   :  { %s657_s18 = smov 0   ;;  %s659_s19 = smov 0   ;;  %s711_s0 = inlined_call_operand.vmem [shape: bf16[2,16,32], index: 0, kind: input, shape index: {}]   ;;  %s712_s1 = inlined_call_operand.vmem [shape: f32[7,32], index: 1, kind: input, shape index: {}]   ;;  %s713_s2 = inlined_call_operand.vmem [shape: f32[1,32], index: 2, kind: input, shape index: {}]   ;;  %s714_s3 = inlined_call_operand.vmem [shape: f32[1,32], index: 3, kind: input, shape index: {}]   ;;  %s715_s4 = inlined_call_operand.vmem [shape: f32[1,32], index: 4, kind: input, shape index: {}]   ;;  %s716_s5 = inlined_call_operand.vmem [shape: bf16[2,7,32], index: 5, kind: output, shape index: {}]  }
   0x1   :  { %s661_s20 = smov 0  }
   0x2 LB: > { %s27_s21 = sadd.s32 1, %s621_s19  ;;  %p560_p0 = scmp.ge.s32.totalorder %s625_s20, 1  ;;  %s625_s20 = sphi %s661_s20, %s15_s20   ;;  %s621_s19 = sphi %s659_s19, %s718_s19   ;;  %s617_s18 = sphi %s657_s18, %s717_s18  }
   0x3   : > { %p29_p1 = scmp.ge.s32.totalorder %s27_s21, 2  ;;  %p239_p2 = scmp.lt.s32.totalorder %s625_s20, 3 }
   0x5   : > { %s720_s21 = smov (%p29_p1, %s27_s21), 0  ;;  %p240_p3 = pnand %p560_p0, %p239_p2 }
   0x6   : > { %p285_p4 = scmp.lt.s32.totalorder (!%p240_p3), %s617_s18, 1  ;;  %v318_v0 = vlaneseq (!%p240_p3)  ;;  %v317_v2 = vld [vmem:[%s712_s1] sm:$0x7f] (!%p240_p3)  ;;  %vm417_vm6 = vcmask (!%p240_p3), 257024   ;;  %vm418_vm7 = vsmask.f32 (!%p240_p3), 3328 }
   0x7   : > { %243 = sbr.rel (%p240_p3) target bundleno = 75 (0x4b), region = 40  ;;  %v564_v50 = vld [vmem:[%s713_s2] ss:$0 sm:$0xff] (!%p240_p3)  ;;  %vm419_vm8 = vmand (!%p240_p3), %vm417_vm6, %vm418_vm7 }
   0x8   : > { %v319_v1 = vshrl.u32 (!%p240_p3), %v318_v0, 7  ;;  %v565_v52 = vld [vmem:[%s714_s3] ss:$0 sm:$0xff] (!%p240_p3) }
   0x9   : > { %v566_v54 = vld [vmem:[%s715_s4] ss:$0 sm:$0xff] (!%p240_p3) }
   0xa   : > { %v320_v3 = vsub.s32 (!%p240_p3), 0, %v319_v1  ;;  %v331_v4 = vsub.s32 (!%p240_p3), 1, %v319_v1  ;;  %vm327_vm0 = vcmp.lt.s32.totalorder (!%p240_p3), %v319_v1, 7  ;;  %vm337_vm1 = vcmp.lt.s32.totalorder (!%p240_p3), %v319_v1, 6 }
   0xb   : > { %v341_v5 = vsub.s32 (!%p240_p3), 2, %v319_v1  ;;  %v351_v6 = vsub.s32 (!%p240_p3), 3, %v319_v1  ;;  %vm347_vm2 = vcmp.lt.s32.totalorder (!%p240_p3), %v319_v1, 5  ;;  %vm357_vm3 = vcmp.lt.s32.totalorder (!%p240_p3), %v319_v1, 4 }
   0xc   : > { %v321_v8 = vrot.slane (!%p240_p3), %v317_v2, %v320_v3  ;;  %v361_v9 = vsub.s32 (!%p240_p3), 4, %v319_v1  ;;  %v332_v12 = vrot.slane (!%p240_p3), %v317_v2, %v331_v4  ;;  %vm367_vm4 = vcmp.lt.s32.totalorder (!%p240_p3), %v319_v1, 3 }
   0xd   : > { %v342_v13 = vrot.slane (!%p240_p3), %v317_v2, %v341_v5  ;;  %v352_v14 = vrot.slane (!%p240_p3), %v317_v2, %v351_v6  ;;  %v371_v16 = vsub.s32 (!%p240_p3), 5, %v319_v1  ;;  %v381_v32 = vsub.s32 (!%p240_p3), 6, %v319_v1 }
   0xe   : > { %s722_s18 = smov (!%p285_p4, %s617_s18), 1  ;;  %v362_v15 = vrot.slane %v317_v2, %v361_v9  ;;  %vm377_vm5 = vcmp.lt.s32.totalorder %v319_v1, 2 }
   0xf   : > { %s570_s24 = sshll.u32 %s722_s18, 3  ;;  %v372_v37 = vrot.slane %v317_v2, %v371_v16  ;;  %v382_v43 = vrot.slane %v317_v2, %v381_v32  ;;  %s563_s9 = sshll.u32 %s722_s18, 2 }
  0x10   : > { %s292_s27 = scalar_lea.vmem %s711_s0, %s570_s24  ;;  %s312_s12 = scalar_lea.vmem %s716_s5, %s563_s9 }
  0x11   : > { %v572_v7 = vld [vmem:[%s292_s27] sm:$0xff]  }
  0x12   : > { %v573_v10 = vunpack.c.l.bf16 %v572_v7  ;;  %v574_v11 = vunpack.c.h.bf16 %v572_v7  ;;  %v420_v62 = vld [vmem:[%s312_s12] sm:$0xf] }
  0x14   : > { %v322_v17 = vmul.f32 %v573_v10, %v321_v8  ;;  %v323_v18 = vrot.slane %v573_v10, 1  ;;  %v324_v19 = vrot.slane %v574_v11, 1  ;;  %v335_v20 = vrot.slane %v573_v10, 2 }
  0x15   : > { %v336_v21 = vrot.slane %v574_v11, 2  ;;  %v345_v22 = vrot.slane %v573_v10, 3  ;;  %v346_v23 = vrot.slane %v574_v11, 3  ;;  %v355_v24 = vrot.slane %v573_v10, 4 }
  0x16   : > { %v328_v25 = vsel %vm327_vm0, %v323_v18, %v324_v19  ;;  %v356_v26 = vrot.slane %v574_v11, 4  ;;  %v365_v27 = vrot.slane %v573_v10, 5  ;;  %v366_v28 = vrot.slane %v574_v11, 5 }
  0x17   : > { %v333_v29 = vmul.f32 %v332_v12, %v328_v25  ;;  %v338_v30 = vsel %vm337_vm1, %v335_v20, %v336_v21  ;;  %v348_v31 = vsel %vm347_vm2, %v345_v22, %v346_v23  ;;  %v375_v38 = vrot.slane %v573_v10, 6 }
  0x18   : > { %v343_v33 = vmul.f32 %v342_v13, %v338_v30  ;;  %v358_v34 = vsel %vm357_vm3, %v355_v24, %v356_v26  ;;  %v353_v36 = vmul.f32 %v352_v14, %v348_v31  ;;  %v368_v39 = vsel %vm367_vm4, %v365_v27, %v366_v28 }
  0x19   : > { %v334_v35 = vadd.f32 %v333_v29, %v322_v17  ;;  %v376_v40 = vrot.slane %v574_v11, 6  ;;  %v363_v42 = vmul.f32 %v362_v15, %v358_v34  ;;  %v373_v46 = vmul.f32 %v372_v37, %v368_v39 }
  0x1b   : > { %v344_v41 = vadd.f32 %v343_v33, %v334_v35  ;;  %v378_v44 = vsel %vm377_vm5, %v375_v38, %v376_v40 }
  0x1c   : > { %v383_v48 = vmul.f32 %v382_v43, %v378_v44 }
  0x1d   : > { %v354_v45 = vadd.f32 %v353_v36, %v344_v41 }
  0x1f   : > { %v364_v47 = vadd.f32 %v363_v42, %v354_v45 }
  0x21   : > { %v374_v49 = vadd.f32 %v373_v46, %v364_v47 }
  0x23   : > { %v384_v51 = vadd.f32 %v383_v48, %v374_v49 }
  0x25   : > { %v392_v53 = vadd.f32 %v564_v50, %v384_v51 }
  0x27   : > { %v400_v55 = vmul.f32 %v565_v52, %v392_v53 }
  0x29   : > { %v408_v56 = vadd.f32 %v566_v54, %v400_v55 }
  0x2b   : > { %v567_v57 = vmul.f32 -1.442695, %v408_v56 }
  0x2d   : > { %599 = vpow2.f32 %v567_v57 }
  0x37   : > { %v600_v58 = vpop.eup %599 }
  0x38   : > { %v412_v59 = vadd.f32 1.0, %v600_v58 }
  0x3a   : > { %601 = vrcp.f32 %v412_v59 }
  0x44   : > { %v602_v60 = vpop.eup %601 }
  0x45   : > { %v415_v61 = vmul.f32 %v602_v60, %v408_v56 }
  0x47   : > { %v416_v63 = vpack.c.bf16 %v415_v61, %v415_v61 }
  0x49   : > { %v421_v0 = vsel %vm419_vm8, %v416_v63, %v420_v62 }
  0x4a   : > { %422 = vst [vmem:[%s312_s12] sm:$0xf] %v421_v0 }
  0x4b PF: > { %s15_s20 = sadd.s32 1, %s625_s20   ;;  %s717_s18 = smov %s621_s19 }
  0x4c   : > { %p12_p5 = scmp.ge.s32.totalorder %s15_s20, 4   ;;  %s718_s19 = smov %s720_s21 }
  0x4e   :  { %14 = sbr.rel (!%p12_p5) target bundleno = 2 (0x2), region = 82 }

// kernel: conformer_forward.54
= control target key start
LH: loop header
LB: loop body
LE: loop exit
PB: predicated region body
PF: predicated region fallthrough
CT: control target
= control target key end

     0   :  { %vm28_vm0 = vcmask 261120   ;;  %v297_v0 = vmov 0.0   ;;  %vm298_vm1 = vmmov 0   ;;  %vm226_vm2 = vcmask 257024   ;;  %s387_s1 = inlined_call_operand.vmem [shape: bf16[128,32], index: 1, kind: input, shape index: {}]   ;;  %s388_s0 = inlined_call_operand.vmem [shape: bf16[16,128], index: 0, kind: input, shape index: {}]   ;;  %s389_s2 = inlined_call_operand.vmem [shape: f32[1,32], index: 2, kind: input, shape index: {}]   ;;  %s390_s3 = inlined_call_operand.vmem [shape: bf16[16,32], index: 3, kind: input, shape index: {}]   ;;  %s391_s4 = inlined_call_operand.vmem [shape: f32[1,32], index: 4, kind: input, shape index: {}]   ;;  %s392_s5 = inlined_call_operand.vmem [shape: f32[1,32], index: 5, kind: input, shape index: {}]   ;;  %s393_s6 = inlined_call_operand.vmem [shape: bf16[16,32], index: 6, kind: output, shape index: {}]  }
   0x1   :  { %262 = vmatprep.subr.bf16.mxu0 %v297_v0  ;;  %v284_v1 = vld [vmem:[%s387_s1] sm:$0xff]   ;;  %278 = vmatprep.mubr.msk.bf16.mxu0 %vm298_vm1, %v297_v0  ;;  %29 = vst.msk [vmem:[#allocation2] sm:$0xff] %vm28_vm0, %v297_v0  ;;  %30 = vst.msk [vmem:[#allocation2 + $0x8] sm:$0xff] %vm28_vm0, %v297_v0  ;;  %v285_v2 = vld [vmem:[%s387_s1 + $0x8] sm:$0xff]  }
   0x2   :  { %263 = vmatpush3.bf16.msra.mxu0 %v284_v1  ;;  %v286_v3 = vld [vmem:[%s387_s1 + $0x10] sm:$0xff]   ;;  %v287_v4 = vld [vmem:[%s387_s1 + $0x18] sm:$0xff]   ;;  %v288_v5 = vld [vmem:[%s387_s1 + $0x20] sm:$0xff]  }
   0x3   :  { %264 = vmatprep.subr.bf16.mxu0 %v297_v0  ;;  %v289_v6 = vld [vmem:[%s387_s1 + $0x28] sm:$0xff]   ;;  %v290_v7 = vld [vmem:[%s387_s1 + $0x30] sm:$0xff]   ;;  %v291_v8 = vld [vmem:[%s387_s1 + $0x38] sm:$0xff]  }
   0x4   :  { %v292_v9 = vld [vmem:[%s388_s0] sm:$0xff]  }
   0x5   :  { %v242_v18 = vld [vmem:[%s389_s2] ss:$0 sm:$0xff] }
   0x6   :  { %265 = vmatpush3.bf16.msra.mxu0 %v285_v2  ;;  %v250_v19 = vld [vmem:[%s390_s3] sm:$0xff]  }
   0x7   :  { %266 = vmatprep.subr.bf16.mxu0 %v297_v0  ;;  %v251_v22 = vunpack.c.l.bf16 %v250_v19  ;;  %v252_v26 = vunpack.c.h.bf16 %v250_v19  ;;  %v243_v49 = vld [vmem:[%s391_s4] ss:$0 sm:$0xff] }
   0x8   :  { %v31_v10 = vld [vmem:[#allocation2] sm:$0xff]  ;;  %v32_v12 = vld [vmem:[#allocation2 + $0x8] sm:$0xff] }
   0x9   :  { %v244_v51 = vld [vmem:[%s392_s5] ss:$0 sm:$0xff] }
   0xa   :  { %267 = vmatpush3.bf16.msra.mxu0 %v286_v3 }
   0xb   :  { %268 = vmatprep.subr.bf16.mxu0 %v297_v0 }
   0xe   :  { %269 = vmatpush3.bf16.msra.mxu0 %v287_v4 }
   0xf   :  { %270 = vmatprep.subr.bf16.mxu0 %v297_v0 }
  0x12   :  { %271 = vmatpush3.bf16.msra.mxu0 %v288_v5 }
  0x13   :  { %272 = vmatprep.subr.bf16.mxu0 %v297_v0 }
  0x16   :  { %273 = vmatpush3.bf16.msra.mxu0 %v289_v6 }
  0x17   :  { %274 = vmatprep.subr.bf16.mxu0 %v297_v0 }
  0x1a   :  { %275 = vmatpush3.bf16.msra.mxu0 %v290_v7 }
  0x1b   :  { %276 = vmatprep.subr.bf16.mxu0 %v297_v0 }
  0x1e   :  { %277 = vmatpush3.bf16.msra.mxu0 %v291_v8 }
  0x21   :  { %279 = vmatmul.mubr.bf16.vlgmr.msra.gmra.mrb[0].mxu0 %v292_v9 }
  0xf4   :  { %v139_v11 = vpop.f32.mrb[0].mxu0 }
  0xf5   :  { %v146_v13 = vadd.f32 %v139_v11, %v31_v10  ;;  %v280_v14 = vpop.f32.mrb[1].mxu0 }
  0xf6   :  { %v142_v15 = vpop.f32.mrb[2].mxu0 }
  0xf7   :  { %149 = vst.msk [vmem:[#allocation2] sm:$0xff] %vm28_vm0, %v146_v13  ;;  %v147_v16 = vadd.f32 %v142_v15, %v32_v12  ;;  %v281_v17 = vpop.f32.mrb[3].mxu0 }
  0xf9   :  { %150 = vst.msk [vmem:[#allocation2 + $0x8] sm:$0xff] %vm28_vm0, %v147_v16 }
  0xfe   :  { %v154_v20 = vld [vmem:[#allocation2] sm:$0xff] }
  0xff   :  { %v163_v21 = vadd.f32 %v242_v18, %v154_v20 }
 0x100   :  { %v155_v23 = vld [vmem:[#allocation2 + $0x8] sm:$0xff] }
 0x101   :  { %v165_v24 = vmul.f32 0.5, %v163_v21  ;;  %v164_v25 = vadd.f32 %v242_v18, %v155_v23 }
 0x103   :  { %v171_v27 = vadd.f32 %v251_v22, %v165_v24  ;;  %v166_v28 = vmul.f32 0.5, %v164_v25 }
 0x105   :  { %v173_v29 = vsel %vm28_vm0, %v171_v27, 0.0  ;;  %v172_v30 = vadd.f32 %v252_v26, %v166_v28 }
 0x106   :  { %174 = vadd.xlane.f32.xlu0 %v173_v29 }
 0x107   :  { %v176_v31 = vsel %vm28_vm0, %v172_v30, 0.0 }
 0x10a   :  { %177 = vadd.xlane.f32.xlu0 %v176_v31 }
 0x193   :  { %v175_v32 = vpop.xlane.xlu0 %174 }
 0x194   :  { %v180_v33 = vmul.f32 0.03125, %v175_v32 }
 0x196   :  { %v182_v34 = vsub.f32 %v171_v27, %v180_v33 }
 0x197   :  { %v178_v35 = vpop.xlane.xlu0 %177 }
 0x198   :  { %v181_v36 = vmul.f32 0.03125, %v178_v35  ;;  %v184_v37 = vmul.f32 %v182_v34, %v182_v34 }
 0x19a   :  { %v183_v38 = vsub.f32 %v172_v30, %v181_v36  ;;  %v186_v39 = vsel %vm28_vm0, %v184_v37, 0.0 }
 0x19b   :  { %187 = vadd.xlane.f32.xlu1 %v186_v39 }
 0x19c   :  { %v185_v40 = vmul.f32 %v183_v38, %v183_v38 }
 0x19e   :  { %v189_v41 = vsel %vm28_vm0, %v185_v40, 0.0 }
 0x19f   :  { %190 = vadd.xlane.f32.xlu1 %v189_v41 }
 0x228   :  { %v188_v42 = vpop.xlane.xlu1 %187 }
 0x229   :  { %v192_v43 = vmul.f32 0.03125, %v188_v42 }
 0x22b   :  { %v194_v44 = vadd.f32 1e-05, %v192_v43 }
 0x22c   :  { %v191_v45 = vpop.xlane.xlu1 %190 }
 0x22d   :  { %293 = vrsqrt.f32 %v194_v44  ;;  %v193_v46 = vmul.f32 0.03125, %v191_v45 }
 0x22f   :  { %v195_v47 = vadd.f32 1e-05, %v193_v46 }
 0x231   :  { %295 = vrsqrt.f32 %v195_v47 }
 0x237   :  { %v294_v48 = vpop.eup %293 }
 0x238   :  { %v198_v50 = vmul.f32 %v294_v48, %v182_v34 }
 0x23a   :  { %v207_v52 = vmul.f32 %v243_v49, %v198_v50 }
 0x23b   :  { %v296_v53 = vpop.eup %295 }
 0x23c   :  { %v216_v54 = vadd.f32 %v244_v51, %v207_v52  ;;  %v199_v55 = vmul.f32 %v296_v53, %v183_v38 }
 0x23e   :  { %v247_v56 = vpack.c.bf16 %v216_v54, %v216_v54  ;;  %v208_v57 = vmul.f32 %v243_v49, %v199_v55 }
 0x240   :  { %227 = vst.msk [vmem:[%s393_s6] sm:$0xf] %vm226_vm2, %v247_v56  ;;  %v217_v58 = vadd.f32 %v244_v51, %v208_v57 }
 0x242   :  { %v248_v59 = vpack.c.bf16 %v217_v58, %v217_v58 }
 0x244   :  { %228 = vst.msk [vmem:[%s393_s6 + $0x4] sm:$0xf] %vm226_vm2, %v248_v59 }

// kernel: conformer_forward.69
= control target key start
LH: loop header
LB: loop body
LE: loop exit
PB: predicated region body
PF: predicated region fallthrough
CT: control target
= control target key end

     0   :  { %vm19_vm0 = vcmask 523264   ;;  %v151_v0 = vmov 0.0   ;;  %vm152_vm1 = vmmov 0   ;;  %vm47_vm2 = vcmask 261120   ;;  %s195_s1 = inlined_call_operand.vmem [shape: bf16[32,64], index: 1, kind: input, shape index: {}]   ;;  %s196_s0 = inlined_call_operand.vmem [shape: bf16[16,32], index: 0, kind: input, shape index: {}]   ;;  %s197_s2 = inlined_call_operand.vmem [shape: f32[1,64], index: 2, kind: input, shape index: {}]   ;;  %s198_s3 = inlined_call_operand.vmem [shape: bf16[16,64], index: 3, kind: output, shape index: {}]  }
   0x1   :  { %138 = vmatprep.subr.bf16.mxu0 %v151_v0  ;;  %v148_v1 = vld [vmem:[%s195_s1] sm:$0xff]   ;;  %142 = vmatprep.mubr.msk.bf16.mxu0 %vm152_vm1, %v151_v0  ;;  %20 = vst.msk [vmem:[#allocation2] sm:$0xff] %vm19_vm0, %v151_v0  ;;  %21 = vst.msk [vmem:[#allocation2 + $0x8] sm:$0xff] %vm19_vm0, %v151_v0  ;;  %v149_v2 = vld [vmem:[%s195_s1 + $0x8] sm:$0xff]   ;;  %vm119_vm3 = vcmask 519168  }
   0x2   :  { %139 = vmatpush3.bf16.msra.mxu0 %v148_v1  ;;  %v150_v3 = vld [vmem:[%s196_s0] sm:$0xff]  }
   0x3   :  { %140 = vmatprep.subr.bf16.mxu0 %v151_v0  ;;  %v130_v12 = vld [vmem:[%s197_s2] ss:$0 sm:$0xff] }
   0x6   :  { %141 = vmatpush3.bf16.msra.mxu0 %v149_v2 }
   0x8   :  { %v22_v4 = vld [vmem:[#allocation2] sm:$0xff]  ;;  %v23_v6 = vld [vmem:[#allocation2 + $0x8] sm:$0xff] }
   0x9   :  { %143 = vmatmul.mubr.msk.bf16.vlgmr.msra.gmra.mrb[0].mxu0 %vm47_vm2, %v150_v3 }
  0xdc   :  { %v85_v5 = vpop.f32.mrb[0].mxu0 }
  0xdd   :  { %v92_v7 = vadd.f32 %v85_v5, %v22_v4  ;;  %v144_v8 = vpop.f32.mrb[1].mxu0 }
  0xde   :  { %v88_v9 = vpop.f32.mrb[2].mxu0 }
  0xdf   :  { %95 = vst.msk [vmem:[#allocation2] sm:$0xff] %vm19_vm0, %v92_v7  ;;  %v93_v10 = vadd.f32 %v88_v9, %v23_v6  ;;  %v145_v11 = vpop.f32.mrb[3].mxu0 }
  0xe1   :  { %96 = vst.msk [vmem:[#allocation2 + $0x8] sm:$0xff] %vm19_vm0, %v93_v10 }
  0xe6   :  { %v100_v13 = vld [vmem:[#allocation2] sm:$0xff] }
  0xe7   :  { %v109_v14 = vadd.f32 %v130_v12, %v100_v13 }
  0xe8   :  { %v101_v15 = vld [vmem:[#allocation2 + $0x8] sm:$0xff] }
  0xe9   :  { %v133_v16 = vpack.c.bf16 %v109_v14, %v109_v14  ;;  %v110_v17 = vadd.f32 %v130_v12, %v101_v15 }
  0xeb   :  { %120 = vst.msk [vmem:[%s198_s3] sm:$0xf] %vm119_vm3, %v133_v16  ;;  %v134_v18 = vpack.c.bf16 %v110_v17, %v110_v17 }
  0xed   :  { %121 = vst.msk [vmem:[%s198_s3 + $0x4] sm:$0xf] %vm119_vm3, %v134_v18 }

// kernel: conformer_forward.66
= control target key start
LH: loop header
LB: loop body
LE: loop exit
PB: predicated region body
PF: predicated region fallthrough
CT: control target
= control target key end

     0   :  { %s854_s0 = inlined_call_operand.vmem [shape: s32[2], index: 0, kind: input, shape index: {}]   ;;  %s855_s1 = inlined_call_operand.vmem [shape: bf16[2,4,8,8], index: 1, kind: input, shape index: {}]   ;;  %s856_s2 = inlined_call_operand.vmem [shape: bf16[2,4,8,8], index: 2, kind: input, shape index: {}]   ;;  %s857_s3 = inlined_call_operand.vmem [shape: bf16[2,4,8,8], index: 3, kind: input, shape index: {}]   ;;  %s858_s4 = inlined_call_operand.vmem [shape: bf16[2,4,8,8], index: 4, kind: output, shape index: {}]  }
   0x1   :  { %s9_s17 = sshll.u32 %s854_s0, 4  ;;  %s10_s17 = int_to_ptr.vmem [resolvable:$true] %s9_s17 }
   0x2   :  { %s688_s18 = scalar_lea.vmem %s10_s17, 16  ;;  %p693_p1 = scmp.lt.s32.totalorder %s10_s17, %s10_s17 }
   0x3   :  { %p689_p0 = scmp.ne.s32.totalorder %s10_s17, %s688_s18  ;;  %p694_p2 = scmp.lt.s32.totalorder %s688_s18, %s688_s18 }
   0x5   :  { %p695_p3 = por %p694_p2, %p693_p1 }
   0x7   :  { %p696_p4 = pnand %p695_p3, %p689_p0 }
   0x9   :  { %699 = shalt.err (!%p696_p4)  }
   0xa   :  { %s742_s19 = smov [#allocation6]  }
   0xb   :  { %12 = dma.vmem_to_smem %s10_s17, 16, %s742_s19, [#allocation5] }
   0xc   :  { %720 = dma.done.wait [#allocation5], 16 }
   0xd   :  { %721 = vsyncadd [#allocation5], 4294967280 }
   0xe   :  { %14 = sfence }
   0xf   :  { %s775_s20 = smov 0   ;;  %s777_s21 = smov 0  }
  0x10   :  { %s779_s22 = smov 0   ;;  %s781_s0 = smov 0  }
  0x11   :  { %s783_s23 = smov 0  }
  0x12 LB: > { %s35_s24 = sadd.s32 1, %s732_s22  ;;  %s39_s25 = sadd.s32 1, %s736_s0  ;;  %s740_s23 = sphi %s783_s23, %s20_s23   ;;  %s736_s0 = sphi %s781_s0, %s862_s0   ;;  %s732_s22 = sphi %s779_s22, %s861_s22   ;;  %s728_s21 = sphi %s777_s21, %s860_s21   ;;  %s724_s20 = sphi %s775_s20, %s859_s20  }
  0x13   : > { %p37_p5 = scmp.ge.s32.totalorder %s35_s24, 4  ;;  %p606_p6 = scmp.ge.s32.totalorder %s740_s23, 1 }
  0x14   : > { %p210_p7 = scmp.lt.s32.totalorder %s740_s23, 9 }
  0x15   : > { %s864_s24 = smov (%p37_p5, %s35_s24), 0  ;;  %s866_s25 = smov (!%p37_p5, %s39_s25), %s736_s0 }
  0x16   : > { %p211_p8 = pnand %p606_p6, %p210_p7  ;;  %p41_p9 = scmp.ge.s32.totalorder %s866_s25, 2 }
  0x17   : > { %p262_p10 = scmp.lt.s32.totalorder (!%p211_p8), %s728_s21, 1  ;;  %p264_p11 = scmp.lt.s32.totalorder (!%p211_p8), %s724_s20, 3  ;;  %vm309_vm0 = vcmask (!%p211_p8), 64512   ;;  %v743_v0 = vmov (!%p211_p8), 0.0   ;;  %vm744_vm1 = vmmov (!%p211_p8), 0   ;;  %vm306_vm2 = vcmask (!%p211_p8), 7168  }
  0x18   : > { %s868_s25 = smov (%p41_p9, %s866_s25), 0  ;;  %214 = sbr.rel (%p211_p8) target bundleno = 846 (0x34e), region = 32 }
  0x19   : > { %623 = vmatprep.subr.bf16.mxu0 (!%p211_p8), %v743_v0  ;;  %310 = vst.msk [vmem:[#allocation4] sm:$0xff] (!%p211_p8), %vm309_vm0, %v743_v0  ;;  %625 = vmatprep.mubr.msk.bf16.mxu0 (!%p211_p8), %vm744_vm1, %v743_v0  ;;  %v745_v4 = vmov (!%p211_p8), -1e+09   ;;  %s301_s10 = sld [smem:[#allocation6 + %s728_s21]] (!%p211_p8)  ;;  %v315_v5 = vlaneseq (!%p211_p8)  ;;  %v746_v16 = vmov (!%p211_p8), 0   ;;  %vm409_vm6 = vcmask (!%p211_p8), 1043456  }
  0x1a   : > { %629 = vmatprep.subr.bf16.mxu1 (!%p211_p8), %v743_v0  ;;  %631 = vmatprep.mubr.msk.bf16.mxu1 (!%p211_p8), %vm744_vm1, %v743_v0  ;;  %307 = vst.msk [vmem:[#allocation2] sm:$0xff] (!%p211_p8), %vm306_vm2, %v745_v4  ;;  %308 = vst.msk [vmem:[#allocation3] sm:$0xff] (!%p211_p8), %vm306_vm2, %v743_v0  ;;  %vm469_vm7 = vcmask (!%p211_p8), 60416  }
  0x1b   : > { %v316_v6 = vand.u32 (!%p211_p8), 127, %v315_v5  ;;  %v322_v7 = vshrl.u32 (!%p211_p8), %v315_v5, 7  ;;  %680 = vset.pattern.permute.xlu0 (!%p211_p8), %v746_v16  ;;  %681 = vset.pattern.permute.xlu1 (!%p211_p8), %v746_v16 }
  0x1d   : > { %vm323_vm4 = vcmp.le.s32.totalorder (!%p211_p8), %v316_v6, %v322_v7 }
  0x1f   : > { %s263_s26 = scalar_select %p262_p10, %s728_s21, 1  ;;  %v319_v8 = vstv %s301_s10 }
  0x20   : > { %s870_s20 = smov (!%p264_p11, %s724_s20), 3  ;;  %vm320_vm3 = vcmp.lt.s32.totalorder %v316_v6, %v319_v8  ;;  %v398_v36 = vld [vmem:[#allocation4] sm:$0xff] }
  0x21   : > { %s607_s27 = sshll.u32 %s263_s26, 2  ;;  %vm324_vm5 = vmand %vm320_vm3, %vm323_vm4  ;;  %v374_v17 = vld [vmem:[#allocation2] sm:$0xff]  ;;  %v390_v31 = vld [vmem:[#allocation3] sm:$0xff] }
  0x22   : > { %s267_s28 = sadd.s32 %s607_s27, %s870_s20 }
  0x23   : > { %s810_s29 = sshll.u32 %s267_s28, 2 }
  0x24   : > { %s280_s6 = scalar_lea.vmem %s856_s2, %s810_s29  ;;  %s269_s9 = scalar_lea.vmem %s855_s1, %s810_s29 }
  0x25   : > { %v312_v1 = vld [vmem:[%s280_s6] sm:$0xf]  ;;  %s291_s13 = scalar_lea.vmem %s857_s3, %s810_s29  ;;  %s299_s16 = scalar_lea.vmem %s858_s4, %s810_s29 }
  0x26   : > { %v330_v2 = vsel %vm309_vm0, %v312_v1, 0  ;;  %v311_v3 = vld [vmem:[%s269_s9] sm:$0xf] }
  0x27   : > { %624 = vmatpush3.bf16.xpose.msra.mxu0 %v330_v2  ;;  %v313_v21 = vld [vmem:[%s291_s13] sm:$0xf] }
  0x28   : > { %v411_v22 = vsel %vm409_vm6, %v313_v21, 0 }
  0x29   : > { %630 = vmatpush3.bf16.msra.mxu1 %v411_v22 }
  0x2e   : > { %626 = vmatmul.mubr.msk.bf16.vlgmr.msra.gmra.mrb[0].mxu0 %vm309_vm0, %v311_v3 }
 0x101   : > { %v366_v9 = vpop.f32.mrb[0].mxu0 }
 0x102   : > { %v372_v10 = vmul.f32 0.35355338, %v366_v9  ;;  %v627_v11 = vpop.f32.mrb[1].mxu0 }
 0x103   : > { %v369_v12 = vpop.f32.mrb[2].mxu0 }
 0x104   : > { %v628_v13 = vpop.f32.mrb[3].mxu0  ;;  %v373_v14 = vsel %vm324_vm5, %v372_v10, -1e+09 }
 0x105   : > { %v375_v15 = vsel %vm309_vm0, %v373_v14, -inf }
 0x106   : > { %376 = vmax.xlane.f32.xlu0 %v375_v15 }
 0x193   : > { %v377_v18 = vpop.xlane.xlu0 %376 }
 0x194   : > { %v378_v19 = vmax.f32 %v374_v17, %v377_v18 }
 0x196   : > { %v379_v20 = vsub.f32 %v374_v17, %v378_v19  ;;  %455 = vst.msk [vmem:[#allocation2] sm:$0xff] %vm306_vm2, %v378_v19  ;;  %384 = vperm.xlu0 %680, %v378_v19  }
 0x198   : > { %v380_v29 = vmul.f32 1.442695, %v379_v20 }
 0x215   : > { %v385_v23 = vpop.permute.xlu0 %384 }
 0x216   : > { %v387_v24 = vsub.f32 %v373_v14, %v385_v23 }
 0x218   : > { %v388_v25 = vmul.f32 1.442695, %v387_v24 }
 0x21a   : > { %682 = vpow2.f32 %v388_v25 }
 0x21b   : > { %684 = vpow2.f32 %v380_v29 }
 0x224   : > { %v683_v26 = vpop.eup %682 }
 0x225   : > { %v392_v27 = vsel %vm309_vm0, %v683_v26, 0.0  ;;  %v405_v28 = vpack.c.bf16 %v683_v26, %v683_v26  ;;  %v685_v30 = vpop.eup %684 }
 0x226   : > { %393 = vadd.xlane.f32.xlu1 %v392_v27  ;;  %v391_v32 = vmul.f32 %v685_v30, %v390_v31 }
 0x227   : > { %632 = vmatmul.mubr.msk.bf16.vlgmr.msra.gmra.mrb[0].mxu1 %vm309_vm0, %v405_v28 }
 0x237   : > { %401 = vperm.xlu1 %681, %v685_v30  }
 0x2b3   : > { %v394_v33 = vpop.xlane.xlu1 %393 }
 0x2b4   : > { %v395_v34 = vadd.f32 %v394_v33, %v391_v32 }
 0x2b6   : > { %397 = vst.msk [vmem:[#allocation3] sm:$0xff] %vm306_vm2, %v395_v34 }
 0x2b7   : > { %v402_v37 = vpop.permute.xlu1 %401 }
 0x2b8   : > { %v404_v38 = vmul.f32 %v402_v37, %v398_v36 }
 0x2bd   : > { %v460_v35 = vld [vmem:[#allocation3] sm:$0xff] }
 0x2be   : > { %463 = vperm.xlu1 %681, %v460_v35  }
 0x2fa   : > { %v447_v39 = vpop.f32.mrb[0].mxu1 }
 0x2fb   : > { %v453_v40 = vadd.f32 %v447_v39, %v404_v38  ;;  %v633_v41 = vpop.f32.mrb[1].mxu1 }
 0x2fc   : > { %v450_v42 = vpop.f32.mrb[2].mxu1 }
 0x2fd   : > { %454 = vst.msk [vmem:[#allocation4] sm:$0xff] %vm309_vm0, %v453_v40  ;;  %v634_v43 = vpop.f32.mrb[3].mxu1 }
 0x304   : > { %v459_v46 = vld [vmem:[#allocation4] sm:$0xff] }
 0x33d   : > { %v464_v44 = vpop.permute.xlu1 %463 }
 0x33e   : > { %686 = vrcp.f32 %v464_v44 }
 0x348   : > { %v687_v45 = vpop.eup %686 }
 0x349   : > { %v467_v47 = vmul.f32 %v687_v45, %v459_v46 }
 0x34b   : > { %v468_v48 = vpack.c.bf16 %v467_v47, %v467_v47 }
 0x34d   : > { %470 = vst.msk [vmem:[%s299_s16] sm:$0xf] %vm469_vm7, %v468_v48 }
 0x34e PF: > { %s20_s23 = sadd.s32 1, %s740_s23   ;;  %s859_s20 = smov %s732_s22 }
 0x34f   : > { %p17_p12 = scmp.ge.s32.totalorder %s20_s23, 10   ;;  %s860_s21 = smov %s736_s0 }
 0x350   : > { %s861_s22 = smov %s864_s24  ;;  %s862_s0 = smov %s868_s25 }
 0x351   :  { %19 = sbr.rel (!%p17_p12) target bundleno = 18 (0x12), region = 76 }

// kernel: conformer_forward.68
= control target key start
LH: loop header
LB: loop body
LE: loop exit
PB: predicated region body
PF: predicated region fallthrough
CT: control target
= control target key end

     0   :  { %vm29_vm0 = vcmask 261120   ;;  %v194_v16 = vmov 0.0   ;;  %vm195_vm1 = vmmov 0   ;;  %vm154_vm2 = vcmask 257024   ;;  %s256_s0 = inlined_call_operand.vmem [shape: bf16[16,32], index: 0, kind: input, shape index: {}]   ;;  %s257_s3 = inlined_call_operand.vmem [shape: bf16[32,32], index: 3, kind: input, shape index: {}]   ;;  %s258_s1 = inlined_call_operand.vmem [shape: f32[1,32], index: 1, kind: input, shape index: {}]   ;;  %s259_s2 = inlined_call_operand.vmem [shape: f32[1,32], index: 2, kind: input, shape index: {}]   ;;  %s260_s4 = inlined_call_operand.vmem [shape: f32[1,32], index: 4, kind: input, shape index: {}]   ;;  %s261_s5 = inlined_call_operand.vmem [shape: bf16[16,32], index: 5, kind: output, shape index: {}]  }
   0x1   :  { %v172_v0 = vld [vmem:[%s256_s0] sm:$0xff]   ;;  %178 = vmatprep.subr.bf16.mxu0 %v194_v16  ;;  %v189_v17 = vld [vmem:[%s257_s3 + $0x8] sm:$0xff]   ;;  %182 = vmatprep.mubr.msk.bf16.mxu0 %vm195_vm1, %v194_v16 }
   0x2   :  { %v173_v1 = vunpack.c.l.bf16 %v172_v0  ;;  %v174_v2 = vunpack.c.h.bf16 %v172_v0  ;;  %v188_v15 = vld [vmem:[%s257_s3] sm:$0xff]  }
   0x3   :  { %179 = vmatpush3.bf16.msra.mxu0 %v188_v15  ;;  %v161_v26 = vld [vmem:[%s258_s1] ss:$0 sm:$0xff] }
   0x4   :  { %v30_v3 = vsel %vm29_vm0, %v173_v1, 0.0  ;;  %v33_v4 = vsel %vm29_vm0, %v174_v2, 0.0  ;;  %180 = vmatprep.subr.bf16.mxu0 %v194_v16  ;;  %v162_v30 = vld [vmem:[%s259_s2] ss:$0 sm:$0xff] }
   0x5   :  { %31 = vadd.xlane.f32.xlu0 %v30_v3  ;;  %v163_v36 = vld [vmem:[%s260_s4] ss:$0 sm:$0xff] }
   0x7   :  { %181 = vmatpush3.bf16.msra.mxu0 %v189_v17 }
   0x9   :  { %34 = vadd.xlane.f32.xlu0 %v33_v4 }
  0x92   :  { %v32_v5 = vpop.xlane.xlu0 %31 }
  0x93   :  { %v37_v6 = vmul.f32 0.03125, %v32_v5 }
  0x95   :  { %v39_v7 = vsub.f32 %v173_v1, %v37_v6 }
  0x96   :  { %v35_v8 = vpop.xlane.xlu0 %34 }
  0x97   :  { %v38_v9 = vmul.f32 0.03125, %v35_v8  ;;  %v41_v10 = vmul.f32 %v39_v7, %v39_v7 }
  0x99   :  { %v40_v11 = vsub.f32 %v174_v2, %v38_v9  ;;  %v43_v12 = vsel %vm29_vm0, %v41_v10, 0.0 }
  0x9a   :  { %44 = vadd.xlane.f32.xlu1 %v43_v12 }
  0x9b   :  { %v42_v13 = vmul.f32 %v40_v11, %v40_v11 }
  0x9d   :  { %v46_v14 = vsel %vm29_vm0, %v42_v13, 0.0 }
  0x9e   :  { %47 = vadd.xlane.f32.xlu1 %v46_v14 }
 0x127   :  { %v45_v18 = vpop.xlane.xlu1 %44 }
 0x128   :  { %v49_v19 = vmul.f32 0.03125, %v45_v18 }
 0x12a   :  { %v51_v20 = vadd.f32 1e-05, %v49_v19 }
 0x12b   :  { %v48_v21 = vpop.xlane.xlu1 %47 }
 0x12c   :  { %190 = vrsqrt.f32 %v51_v20  ;;  %v50_v22 = vmul.f32 0.03125, %v48_v21 }
 0x12e   :  { %v52_v23 = vadd.f32 1e-05, %v50_v22 }
 0x130   :  { %192 = vrsqrt.f32 %v52_v23 }
 0x136   :  { %v191_v24 = vpop.eup %190 }
 0x137   :  { %v55_v25 = vmul.f32 %v191_v24, %v39_v7 }
 0x139   :  { %v64_v28 = vmul.f32 %v161_v26, %v55_v25 }
 0x13a   :  { %v193_v27 = vpop.eup %192 }
 0x13b   :  { %v56_v29 = vmul.f32 %v193_v27, %v40_v11  ;;  %v73_v32 = vadd.f32 %v162_v30, %v64_v28 }
 0x13d   :  { %v65_v31 = vmul.f32 %v161_v26, %v56_v29 }
 0x13f   :  { %v74_v33 = vadd.f32 %v162_v30, %v65_v31 }
 0x141   :  { %v75_v34 = vpack.c.bf16 %v74_v33, %v73_v32 }
 0x143   :  { %76 = vst.msk [vmem:[#allocation2] sm:$0xff] %vm29_vm0, %v75_v34 }
 0x14a   :  { %v77_v35 = vld [vmem:[#allocation2] sm:$0xff] }
 0x14b   :  { %183 = vmatmul.mubr.msk.bf16.vlgmr.msra.gmra.mrb[0].mxu0 %vm29_vm0, %v77_v35 }
 0x21e   :  { %v139_v37 = vpop.f32.mrb[0].mxu0 }
 0x21f   :  { %v140_v38 = vadd.f32 %v163_v36, %v139_v37  ;;  %v184_v39 = vpop.f32.mrb[1].mxu0 }
 0x220   :  { %v142_v40 = vpop.f32.mrb[2].mxu0 }
 0x221   :  { %v169_v41 = vpack.c.bf16 %v140_v38, %v140_v38  ;;  %v143_v42 = vadd.f32 %v163_v36, %v142_v40  ;;  %v185_v43 = vpop.f32.mrb[3].mxu0 }
 0x223   :  { %155 = vst.msk [vmem:[%s261_s5] sm:$0xf] %vm154_vm2, %v169_v41  ;;  %v170_v44 = vpack.c.bf16 %v143_v42, %v143_v42 }
 0x225   :  { %156 = vst.msk [vmem:[%s261_s5 + $0x4] sm:$0xf] %vm154_vm2, %v170_v44 }

// kernel: conformer_forward.70
= control target key start
LH: loop header
LB: loop body
LE: loop exit
PB: predicated region body
PF: predicated region fallthrough
CT: control target
= control target key end

     0   :  { %s856_s0 = inlined_call_operand.vmem [shape: s32[2], index: 0, kind: input, shape index: {}]   ;;  %s857_s1 = inlined_call_operand.vmem [shape: bf16[2,4,8,8], index: 1, kind: input, shape index: {}]   ;;  %s858_s2 = inlined_call_operand.vmem [shape: bf16[2,4,7,8], index: 2, kind: input, shape index: {}]   ;;  %s859_s3 = inlined_call_operand.vmem [shape: bf16[2,4,7,8], index: 3, kind: input, shape index: {}]   ;;  %s860_s4 = inlined_call_operand.vmem [shape: bf16[2,4,8,8], index: 4, kind: output, shape index: {}]  }
   0x1   :  { %s9_s17 = sshll.u32 %s856_s0, 4  ;;  %s10_s17 = int_to_ptr.vmem [resolvable:$true] %s9_s17 }
   0x2   :  { %s689_s18 = scalar_lea.vmem %s10_s17, 16  ;;  %p694_p1 = scmp.lt.s32.totalorder %s10_s17, %s10_s17 }
   0x3   :  { %p690_p0 = scmp.ne.s32.totalorder %s10_s17, %s689_s18  ;;  %p695_p2 = scmp.lt.s32.totalorder %s689_s18, %s689_s18 }
   0x5   :  { %p696_p3 = por %p695_p2, %p694_p1 }
   0x7   :  { %p697_p4 = pnand %p696_p3, %p690_p0 }
   0x9   :  { %700 = shalt.err (!%p697_p4)  }
   0xa   :  { %s743_s19 = smov [#allocation6]  }
   0xb   :  { %12 = dma.vmem_to_smem %s10_s17, 16, %s743_s19, [#allocation5] }
   0xc   :  { %721 = dma.done.wait [#allocation5], 16 }
   0xd   :  { %722 = vsyncadd [#allocation5], 4294967280 }
   0xe   :  { %14 = sfence }
   0xf   :  { %s777_s20 = smov 0   ;;  %s779_s21 = smov 0  }
  0x10   :  { %s781_s22 = smov 0   ;;  %s783_s0 = smov 0  }
  0x11   :  { %s785_s23 = smov 0  }
  0x12 LB: > { %s35_s24 = sadd.s32 1, %s733_s22  ;;  %s39_s25 = sadd.s32 1, %s737_s0  ;;  %s741_s23 = sphi %s785_s23, %s20_s23   ;;  %s737_s0 = sphi %s783_s0, %s864_s0   ;;  %s733_s22 = sphi %s781_s22, %s863_s22   ;;  %s729_s21 = sphi %s779_s21, %s862_s21   ;;  %s725_s20 = sphi %s777_s20, %s861_s20  }
  0x13   : > { %p37_p5 = scmp.ge.s32.totalorder %s35_s24, 4  ;;  %p606_p6 = scmp.ge.s32.totalorder %s741_s23, 1 }
  0x14   : > { %p210_p7 = scmp.lt.s32.totalorder %s741_s23, 9 }
  0x15   : > { %s866_s24 = smov (%p37_p5, %s35_s24), 0  ;;  %s868_s25 = smov (!%p37_p5, %s39_s25), %s737_s0 }
  0x16   : > { %p211_p8 = pnand %p606_p6, %p210_p7  ;;  %p41_p9 = scmp.ge.s32.totalorder %s868_s25, 2 }
  0x17   : > { %p262_p10 = scmp.lt.s32.totalorder (!%p211_p8), %s729_s21, 1  ;;  %p264_p11 = scmp.lt.s32.totalorder (!%p211_p8), %s725_s20, 3  ;;  %vm309_vm0 = vcmask (!%p211_p8), 64512   ;;  %v744_v0 = vmov (!%p211_p8), 0.0   ;;  %vm745_vm1 = vmmov (!%p211_p8), 0   ;;  %vm306_vm2 = vcmask (!%p211_p8), 7168  }
  0x18   : > { %s870_s25 = smov (%p41_p9, %s868_s25), 0  ;;  %214 = sbr.rel (%p211_p8) target bundleno = 846 (0x34e), region = 32 }
  0x19   : > { %623 = vmatprep.subr.bf16.mxu0 (!%p211_p8), %v744_v0  ;;  %310 = vst.msk [vmem:[#allocation4] sm:$0xff] (!%p211_p8), %vm309_vm0, %v744_v0  ;;  %625 = vmatprep.mubr.msk.bf16.mxu0 (!%p211_p8), %vm745_vm1, %v744_v0  ;;  %v746_v4 = vmov (!%p211_p8), -1e+09   ;;  %s301_s10 = sld [smem:[#allocation6 + %s729_s21]] (!%p211_p8)  ;;  %v315_v5 = vlaneseq (!%p211_p8)  ;;  %vm371_vm4 = vcmask (!%p211_p8), 56320   ;;  %v747_v15 = vmov (!%p211_p8), 0  }
  0x1a   : > { %629 = vmatprep.subr.bf16.mxu1 (!%p211_p8), %v744_v0  ;;  %631 = vmatprep.mubr.msk.bf16.mxu1 (!%p211_p8), %vm745_vm1, %v744_v0  ;;  %307 = vst.msk [vmem:[#allocation2] sm:$0xff] (!%p211_p8), %vm306_vm2, %v746_v4  ;;  %308 = vst.msk [vmem:[#allocation3] sm:$0xff] (!%p211_p8), %vm306_vm2, %v744_v0  ;;  %vm406_vm5 = vcmask (!%p211_p8), 1042432   ;;  %vm407_vm6 = vcmask (!%p211_p8), 1043456   ;;  %v748_v21 = vmov (!%p211_p8), 65535   ;;  %vm469_vm7 = vcmask (!%p211_p8), 60416  }
  0x1b   : > { %v316_v6 = vand.u32 (!%p211_p8), 127, %v315_v5  ;;  %681 = vset.pattern.permute.xlu0 (!%p211_p8), %v747_v15  ;;  %682 = vset.pattern.permute.xlu1 (!%p211_p8), %v747_v15  ;;  %v408_v22 = vsel (!%p211_p8), %vm406_vm5, 4294967295, %v748_v21 }
  0x1c   : > { %v409_v23 = vsel (!%p211_p8), %vm407_vm6, %v408_v22, 0 }
  0x1f   : > { %s263_s26 = scalar_select %p262_p10, %s729_s21, 1  ;;  %v319_v7 = vstv %s301_s10 }
  0x20   : > { %s872_s20 = smov (!%p264_p11, %s725_s20), 3  ;;  %vm320_vm3 = vcmp.lt.s32.totalorder %v316_v6, %v319_v7  ;;  %v395_v38 = vld [vmem:[#allocation4] sm:$0xff] }
  0x21   : > { %s607_s27 = sshll.u32 %s263_s26, 2  ;;  %v370_v16 = vld [vmem:[#allocation2] sm:$0xff]  ;;  %v387_v33 = vld [vmem:[#allocation3] sm:$0xff] }
  0x22   : > { %s267_s28 = sadd.s32 %s607_s27, %s872_s20 }
  0x23   : > { %s812_s29 = sshll.u32 %s267_s28, 2 }
  0x24   : > { %s280_s6 = scalar_lea.vmem %s858_s2, %s812_s29  ;;  %s269_s9 = scalar_lea.vmem %s857_s1, %s812_s29 }
  0x25   : > { %v312_v1 = vld [vmem:[%s280_s6] sm:$0xf]  ;;  %s291_s13 = scalar_lea.vmem %s859_s3, %s812_s29  ;;  %s299_s16 = scalar_lea.vmem %s860_s4, %s812_s29 }
  0x26   : > { %v326_v2 = vsel %vm309_vm0, %v312_v1, 0  ;;  %v311_v3 = vld [vmem:[%s269_s9] sm:$0xf] }
  0x27   : > { %624 = vmatpush3.bf16.xpose.msra.mxu0 %v326_v2  ;;  %v313_v20 = vld [vmem:[%s291_s13] sm:$0xf] }
  0x28   : > { %v411_v24 = vand.u32 %v409_v23, %v313_v20 }
  0x2a   : > { %630 = vmatpush3.bf16.msra.mxu1 %v411_v24 }
  0x2e   : > { %626 = vmatmul.mubr.msk.bf16.vlgmr.msra.gmra.mrb[0].mxu0 %vm309_vm0, %v311_v3 }
 0x101   : > { %v362_v8 = vpop.f32.mrb[0].mxu0 }
 0x102   : > { %v368_v9 = vmul.f32 0.35355338, %v362_v8  ;;  %v627_v10 = vpop.f32.mrb[1].mxu0 }
 0x103   : > { %v365_v11 = vpop.f32.mrb[2].mxu0 }
 0x104   : > { %v628_v12 = vpop.f32.mrb[3].mxu0  ;;  %v369_v13 = vsel %vm320_vm3, %v368_v9, -1e+09 }
 0x105   : > { %v372_v14 = vsel %vm371_vm4, %v369_v13, -inf }
 0x106   : > { %373 = vmax.xlane.f32.xlu0 %v372_v14 }
 0x193   : > { %v374_v17 = vpop.xlane.xlu0 %373 }
 0x194   : > { %v375_v18 = vmax.f32 %v370_v16, %v374_v17 }
 0x196   : > { %v376_v19 = vsub.f32 %v370_v16, %v375_v18  ;;  %455 = vst.msk [vmem:[#allocation2] sm:$0xff] %vm306_vm2, %v375_v18  ;;  %381 = vperm.xlu0 %681, %v375_v18  }
 0x198   : > { %v377_v31 = vmul.f32 1.442695, %v376_v19 }
 0x215   : > { %v382_v25 = vpop.permute.xlu0 %381 }
 0x216   : > { %v384_v26 = vsub.f32 %v369_v13, %v382_v25 }
 0x218   : > { %v385_v27 = vmul.f32 1.442695, %v384_v26 }
 0x21a   : > { %683 = vpow2.f32 %v385_v27 }
 0x21b   : > { %685 = vpow2.f32 %v377_v31 }
 0x224   : > { %v684_v28 = vpop.eup %683 }
 0x225   : > { %v389_v29 = vsel %vm371_vm4, %v684_v28, 0.0  ;;  %v402_v30 = vpack.c.bf16 %v684_v28, %v684_v28  ;;  %v686_v32 = vpop.eup %685 }
 0x226   : > { %390 = vadd.xlane.f32.xlu1 %v389_v29  ;;  %v388_v34 = vmul.f32 %v686_v32, %v387_v33 }
 0x227   : > { %632 = vmatmul.mubr.msk.bf16.vlgmr.msra.gmra.mrb[0].mxu1 %vm371_vm4, %v402_v30 }
 0x237   : > { %398 = vperm.xlu1 %682, %v686_v32  }
 0x2b3   : > { %v391_v35 = vpop.xlane.xlu1 %390 }
 0x2b4   : > { %v392_v36 = vadd.f32 %v391_v35, %v388_v34 }
 0x2b6   : > { %394 = vst.msk [vmem:[#allocation3] sm:$0xff] %vm306_vm2, %v392_v36 }
 0x2b7   : > { %v399_v39 = vpop.permute.xlu1 %398 }
 0x2b8   : > { %v401_v40 = vmul.f32 %v399_v39, %v395_v38 }
 0x2bd   : > { %v460_v37 = vld [vmem:[#allocation3] sm:$0xff] }
 0x2be   : > { %463 = vperm.xlu1 %682, %v460_v37  }
 0x2fa   : > { %v447_v41 = vpop.f32.mrb[0].mxu1 }
 0x2fb   : > { %v453_v42 = vadd.f32 %v447_v41, %v401_v40  ;;  %v633_v43 = vpop.f32.mrb[1].mxu1 }
 0x2fc   : > { %v450_v44 = vpop.f32.mrb[2].mxu1 }
 0x2fd   : > { %454 = vst.msk [vmem:[#allocation4] sm:$0xff] %vm309_vm0, %v453_v42  ;;  %v634_v45 = vpop.f32.mrb[3].mxu1 }
 0x304   : > { %v459_v48 = vld [vmem:[#allocation4] sm:$0xff] }
 0x33d   : > { %v464_v46 = vpop.permute.xlu1 %463 }
 0x33e   : > { %687 = vrcp.f32 %v464_v46 }
 0x348   : > { %v688_v47 = vpop.eup %687 }
 0x349   : > { %v467_v49 = vmul.f32 %v688_v47, %v459_v48 }
 0x34b   : > { %v468_v50 = vpack.c.bf16 %v467_v49, %v467_v49 }
 0x34d   : > { %470 = vst.msk [vmem:[%s299_s16] sm:$0xf] %vm469_vm7, %v468_v50 }
 0x34e PF: > { %s20_s23 = sadd.s32 1, %s741_s23   ;;  %s861_s20 = smov %s733_s22 }
 0x34f   : > { %p17_p12 = scmp.ge.s32.totalorder %s20_s23, 10   ;;  %s862_s21 = smov %s737_s0 }
 0x350   : > { %s863_s22 = smov %s866_s24  ;;  %s864_s0 = smov %s870_s25 }
 0x351   :  { %19 = sbr.rel (!%p17_p12) target bundleno = 18 (0x12), region = 76 }

// kernel: conformer_forward.72
= control target key start
LH: loop header
LB: loop body
LE: loop exit
PB: predicated region body
PF: predicated region fallthrough
CT: control target
= control target key end

     0   :  { %vm29_vm0 = vcmask 261120   ;;  %v196_v16 = vmov 0.0   ;;  %vm197_vm1 = vmmov 0   ;;  %vm156_vm2 = vcmask 519168   ;;  %s258_s0 = inlined_call_operand.vmem [shape: bf16[16,32], index: 0, kind: input, shape index: {}]   ;;  %s259_s3 = inlined_call_operand.vmem [shape: bf16[32,64], index: 3, kind: input, shape index: {}]   ;;  %s260_s1 = inlined_call_operand.vmem [shape: f32[1,32], index: 1, kind: input, shape index: {}]   ;;  %s261_s2 = inlined_call_operand.vmem [shape: f32[1,32], index: 2, kind: input, shape index: {}]   ;;  %s262_s4 = inlined_call_operand.vmem [shape: f32[1,64], index: 4, kind: input, shape index: {}]   ;;  %s263_s5 = inlined_call_operand.vmem [shape: bf16[16,64], index: 5, kind: output, shape index: {}]  }
   0x1   :  { %v174_v0 = vld [vmem:[%s258_s0] sm:$0xff]   ;;  %180 = vmatprep.subr.bf16.mxu0 %v196_v16  ;;  %v191_v17 = vld [vmem:[%s259_s3 + $0x8] sm:$0xff]   ;;  %184 = vmatprep.mubr.msk.bf16.mxu0 %vm197_vm1, %v196_v16 }
   0x2   :  { %v175_v1 = vunpack.c.l.bf16 %v174_v0  ;;  %v176_v2 = vunpack.c.h.bf16 %v174_v0  ;;  %v190_v15 = vld [vmem:[%s259_s3] sm:$0xff]  }
   0x3   :  { %181 = vmatpush3.bf16.msra.mxu0 %v190_v15  ;;  %v163_v26 = vld [vmem:[%s260_s1] ss:$0 sm:$0xff] }
   0x4   :  { %v30_v3 = vsel %vm29_vm0, %v175_v1, 0.0  ;;  %v33_v4 = vsel %vm29_vm0, %v176_v2, 0.0  ;;  %182 = vmatprep.subr.bf16.mxu0 %v196_v16  ;;  %v164_v30 = vld [vmem:[%s261_s2] ss:$0 sm:$0xff] }
   0x5   :  { %31 = vadd.xlane.f32.xlu0 %v30_v3  ;;  %v165_v36 = vld [vmem:[%s262_s4] ss:$0 sm:$0xff] }
   0x7   :  { %183 = vmatpush3.bf16.msra.mxu0 %v191_v17 }
   0x9   :  { %34 = vadd.xlane.f32.xlu0 %v33_v4 }
  0x92   :  { %v32_v5 = vpop.xlane.xlu0 %31 }
  0x93   :  { %v37_v6 = vmul.f32 0.03125, %v32_v5 }
  0x95   :  { %v39_v7 = vsub.f32 %v175_v1, %v37_v6 }
  0x96   :  { %v35_v8 = vpop.xlane.xlu0 %34 }
  0x97   :  { %v38_v9 = vmul.f32 0.03125, %v35_v8  ;;  %v41_v10 = vmul.f32 %v39_v7, %v39_v7 }
  0x99   :  { %v40_v11 = vsub.f32 %v176_v2, %v38_v9  ;;  %v43_v12 = vsel %vm29_vm0, %v41_v10, 0.0 }
  0x9a   :  { %44 = vadd.xlane.f32.xlu1 %v43_v12 }
  0x9b   :  { %v42_v13 = vmul.f32 %v40_v11, %v40_v11 }
  0x9d   :  { %v46_v14 = vsel %vm29_vm0, %v42_v13, 0.0 }
  0x9e   :  { %47 = vadd.xlane.f32.xlu1 %v46_v14 }
 0x127   :  { %v45_v18 = vpop.xlane.xlu1 %44 }
 0x128   :  { %v49_v19 = vmul.f32 0.03125, %v45_v18 }
 0x12a   :  { %v51_v20 = vadd.f32 1e-05, %v49_v19 }
 0x12b   :  { %v48_v21 = vpop.xlane.xlu1 %47 }
 0x12c   :  { %192 = vrsqrt.f32 %v51_v20  ;;  %v50_v22 = vmul.f32 0.03125, %v48_v21 }
 0x12e   :  { %v52_v23 = vadd.f32 1e-05, %v50_v22 }
 0x130   :  { %194 = vrsqrt.f32 %v52_v23 }
 0x136   :  { %v193_v24 = vpop.eup %192 }
 0x137   :  { %v55_v25 = vmul.f32 %v193_v24, %v39_v7 }
 0x139   :  { %v64_v28 = vmul.f32 %v163_v26, %v55_v25 }
 0x13a   :  { %v195_v27 = vpop.eup %194 }
 0x13b   :  { %v56_v29 = vmul.f32 %v195_v27, %v40_v11  ;;  %v73_v32 = vadd.f32 %v164_v30, %v64_v28 }
 0x13d   :  { %v65_v31 = vmul.f32 %v163_v26, %v56_v29 }
 0x13f   :  { %v74_v33 = vadd.f32 %v164_v30, %v65_v31 }
 0x141   :  { %v75_v34 = vpack.c.bf16 %v74_v33, %v73_v32 }
 0x143   :  { %76 = vst.msk [vmem:[#allocation2] sm:$0xff] %vm29_vm0, %v75_v34 }
 0x14a   :  { %v77_v35 = vld [vmem:[#allocation2] sm:$0xff] }
 0x14b   :  { %185 = vmatmul.mubr.msk.bf16.vlgmr.msra.gmra.mrb[0].mxu0 %vm29_vm0, %v77_v35 }
 0x21e   :  { %v139_v37 = vpop.f32.mrb[0].mxu0 }
 0x21f   :  { %v140_v38 = vadd.f32 %v165_v36, %v139_v37  ;;  %v186_v39 = vpop.f32.mrb[1].mxu0 }
 0x220   :  { %v142_v40 = vpop.f32.mrb[2].mxu0 }
 0x221   :  { %v146_v41 = vmax.f32 %v140_v38, 0.0  ;;  %v143_v42 = vadd.f32 %v165_v36, %v142_v40  ;;  %v187_v43 = vpop.f32.mrb[3].mxu0 }
 0x223   :  { %v171_v44 = vpack.c.bf16 %v146_v41, %v146_v41  ;;  %v147_v45 = vmax.f32 %v143_v42, 0.0 }
 0x225   :  { %157 = vst.msk [vmem:[%s263_s5] sm:$0xf] %vm156_vm2, %v171_v44  ;;  %v172_v46 = vpack.c.bf16 %v147_v45, %v147_v45 }
 0x227   :  { %158 = vst.msk [vmem:[%s263_s5 + $0x4] sm:$0xf] %vm156_vm2, %v172_v46 }

// kernel: conformer_forward.73
= control target key start
LH: loop header
LB: loop body
LE: loop exit
PB: predicated region body
PF: predicated region fallthrough
CT: control target
= control target key end

     0   :  { %vm22_vm0 = vcmask 261120   ;;  %v190_v0 = vmov 0.0   ;;  %vm191_vm1 = vmmov 0   ;;  %vm66_vm2 = vcmask 523264   ;;  %s248_s1 = inlined_call_operand.vmem [shape: bf16[64,32], index: 1, kind: input, shape index: {}]   ;;  %s249_s0 = inlined_call_operand.vmem [shape: bf16[16,64], index: 0, kind: input, shape index: {}]   ;;  %s250_s3 = inlined_call_operand.vmem [shape: bf16[16,32], index: 3, kind: input, shape index: {}]   ;;  %s251_s2 = inlined_call_operand.vmem [shape: f32[1,32], index: 2, kind: input, shape index: {}]   ;;  %s252_s4 = inlined_call_operand.vmem [shape: bf16[16,32], index: 4, kind: output, shape index: {}]  }
   0x1   :  { %171 = vmatprep.subr.bf16.mxu0 %v190_v0  ;;  %v185_v1 = vld [vmem:[%s248_s1] sm:$0xff]   ;;  %179 = vmatprep.mubr.msk.bf16.mxu0 %vm191_vm1, %v190_v0  ;;  %23 = vst.msk [vmem:[#allocation2] sm:$0xff] %vm22_vm0, %v190_v0  ;;  %24 = vst.msk [vmem:[#allocation2 + $0x8] sm:$0xff] %vm22_vm0, %v190_v0  ;;  %v186_v2 = vld [vmem:[%s248_s1 + $0x8] sm:$0xff]   ;;  %vm144_vm3 = vcmask 257024  }
   0x2   :  { %172 = vmatpush3.bf16.msra.mxu0 %v185_v1  ;;  %v187_v3 = vld [vmem:[%s248_s1 + $0x10] sm:$0xff]   ;;  %v188_v4 = vld [vmem:[%s248_s1 + $0x18] sm:$0xff]   ;;  %v189_v5 = vld [vmem:[%s249_s0] sm:$0xff]  }
   0x3   :  { %173 = vmatprep.subr.bf16.mxu0 %v190_v0  ;;  %v163_v14 = vld [vmem:[%s250_s3] sm:$0xff]  }
   0x4   :  { %v157_v15 = vld [vmem:[%s251_s2] ss:$0 sm:$0xff]  ;;  %v164_v16 = vunpack.c.l.bf16 %v163_v14  ;;  %v165_v19 = vunpack.c.h.bf16 %v163_v14 }
   0x6   :  { %174 = vmatpush3.bf16.msra.mxu0 %v186_v2 }
   0x7   :  { %175 = vmatprep.subr.bf16.mxu0 %v190_v0 }
   0x8   :  { %v25_v6 = vld [vmem:[#allocation2] sm:$0xff]  ;;  %v26_v8 = vld [vmem:[#allocation2 + $0x8] sm:$0xff] }
   0xa   :  { %176 = vmatpush3.bf16.msra.mxu0 %v187_v3 }
   0xb   :  { %177 = vmatprep.subr.bf16.mxu0 %v190_v0 }
   0xe   :  { %178 = vmatpush3.bf16.msra.mxu0 %v188_v4 }
  0x11   :  { %180 = vmatmul.mubr.msk.bf16.vlgmr.msra.gmra.mrb[0].mxu0 %vm66_vm2, %v189_v5 }
  0xe4   :  { %v104_v7 = vpop.f32.mrb[0].mxu0 }
  0xe5   :  { %v111_v9 = vadd.f32 %v104_v7, %v25_v6  ;;  %v181_v10 = vpop.f32.mrb[1].mxu0 }
  0xe6   :  { %v107_v11 = vpop.f32.mrb[2].mxu0 }
  0xe7   :  { %114 = vst.msk [vmem:[#allocation2] sm:$0xff] %vm22_vm0, %v111_v9  ;;  %v112_v12 = vadd.f32 %v107_v11, %v26_v8  ;;  %v182_v13 = vpop.f32.mrb[3].mxu0 }
  0xe9   :  { %115 = vst.msk [vmem:[#allocation2 + $0x8] sm:$0xff] %vm22_vm0, %v112_v12 }
  0xee   :  { %v119_v17 = vld [vmem:[#allocation2] sm:$0xff] }
  0xef   :  { %v128_v18 = vadd.f32 %v157_v15, %v119_v17 }
  0xf0   :  { %v120_v20 = vld [vmem:[#allocation2 + $0x8] sm:$0xff] }
  0xf1   :  { %v134_v21 = vadd.f32 %v164_v16, %v128_v18  ;;  %v129_v22 = vadd.f32 %v157_v15, %v120_v20 }
  0xf3   :  { %v160_v23 = vpack.c.bf16 %v134_v21, %v134_v21  ;;  %v135_v24 = vadd.f32 %v165_v19, %v129_v22 }
  0xf5   :  { %145 = vst.msk [vmem:[%s252_s4] sm:$0xf] %vm144_vm3, %v160_v23  ;;  %v161_v25 = vpack.c.bf16 %v135_v24, %v135_v24 }
  0xf7   :  { %146 = vst.msk [vmem:[%s252_s4 + $0x4] sm:$0xf] %vm144_vm3, %v161_v25 }

// kernel: conformer_forward.83
= control target key start
LH: loop header
LB: loop body
LE: loop exit
PB: predicated region body
PF: predicated region fallthrough
CT: control target
= control target key end

     0   :  { %vm30_vm0 = vcmask 261120   ;;  %s293_s0 = inlined_call_operand.vmem [shape: bf16[16,32], index: 0, kind: input, shape index: {}]   ;;  %s294_s1 = inlined_call_operand.vmem [shape: f32[1,32], index: 1, kind: input, shape index: {}]   ;;  %s295_s2 = inlined_call_operand.vmem [shape: f32[1,32], index: 2, kind: input, shape index: {}]   ;;  %s296_s3 = inlined_call_operand.vmem [shape: bf16[32,16], index: 3, kind: input, shape index: {}]   ;;  %s297_s4 = inlined_call_operand.vmem [shape: f32[1,16], index: 4, kind: input, shape index: {}]   ;;  %s298_s5 = inlined_call_operand.hbm [shape: f32[16,16], index: 5, kind: output, shape index: {}]  }
   0x1   :  { %v173_v0 = vld [vmem:[%s293_s0] sm:$0xff]  }
   0x2   :  { %v174_v1 = vunpack.c.l.bf16 %v173_v0  ;;  %v175_v2 = vunpack.c.h.bf16 %v173_v0 }
   0x3   :  { %10 = vsyncpa [#allocation4], 0  ;;  %v192_v15 = vld [vmem:[%s296_s3] sm:$0xff]   ;;  %v222_v16 = vmov 0.0   ;;  %v193_v17 = vld [vmem:[%s296_s3 + $0x8] sm:$0xff]   ;;  %vm223_vm1 = vmmov 0  }
   0x4   :  { %v31_v3 = vsel %vm30_vm0, %v174_v1, 0.0  ;;  %v34_v4 = vsel %vm30_vm0, %v175_v2, 0.0  ;;  %179 = vmatprep.subr.bf16.mxu0 %v222_v16  ;;  %183 = vmatprep.mubr.msk.bf16.mxu0 %vm223_vm1, %v222_v16  ;;  %v166_v26 = vld [vmem:[%s294_s1] ss:$0 sm:$0xff]  ;;  %s224_s1 = smov [#allocation3]   ;;  %vm147_vm2 = vcmask 130048  }
   0x5   :  { %32 = vadd.xlane.f32.xlu0 %v31_v3  ;;  %180 = vmatpush3.bf16.msra.mxu0 %v192_v15  ;;  %v167_v30 = vld [vmem:[%s295_s2] ss:$0 sm:$0xff]  ;;  %s155_s28 = sshll.u32 %s224_s1, 4  ;;  %s156_s28 = int_to_ptr.vmem [resolvable:$true] %s155_s28 }
   0x6   :  { %181 = vmatprep.subr.bf16.mxu0 %v222_v16  ;;  %v168_v36 = vld [vmem:[%s297_s4] ss:$0 sm:$0xff]  ;;  %s198_s2 = scalar_lea.vmem %s156_s28, 256  ;;  %p203_p1 = scmp.lt.s32.totalorder %s156_s28, %s156_s28 }
   0x7   :  { %p199_p0 = scmp.ne.s32.totalorder %s156_s28, %s198_s2  ;;  %p204_p2 = scmp.lt.s32.totalorder %s198_s2, %s198_s2 }
   0x9   :  { %35 = vadd.xlane.f32.xlu0 %v34_v4  ;;  %182 = vmatpush3.bf16.msra.mxu0 %v193_v17  ;;  %p205_p3 = por %p204_p2, %p203_p1 }
   0xb   :  { %p206_p4 = pnand %p205_p3, %p199_p0 }
  0x92   :  { %v33_v5 = vpop.xlane.xlu0 %32 }
  0x93   :  { %v38_v6 = vmul.f32 0.03125, %v33_v5 }
  0x95   :  { %v40_v7 = vsub.f32 %v174_v1, %v38_v6 }
  0x96   :  { %v36_v8 = vpop.xlane.xlu0 %35 }
  0x97   :  { %v39_v9 = vmul.f32 0.03125, %v36_v8  ;;  %v42_v10 = vmul.f32 %v40_v7, %v40_v7 }
  0x99   :  { %v41_v11 = vsub.f32 %v175_v2, %v39_v9  ;;  %v44_v12 = vsel %vm30_vm0, %v42_v10, 0.0 }
  0x9a   :  { %45 = vadd.xlane.f32.xlu1 %v44_v12 }
  0x9b   :  { %v43_v13 = vmul.f32 %v41_v11, %v41_v11 }
  0x9d   :  { %v47_v14 = vsel %vm30_vm0, %v43_v13, 0.0 }
  0x9e   :  { %48 = vadd.xlane.f32.xlu1 %v47_v14 }
 0x127   :  { %v46_v18 = vpop.xlane.xlu1 %45 }
 0x128   :  { %v50_v19 = vmul.f32 0.03125, %v46_v18 }
 0x12a   :  { %v52_v20 = vadd.f32 1e-05, %v50_v19 }
 0x12b   :  { %v49_v21 = vpop.xlane.xlu1 %48 }
 0x12c   :  { %194 = vrsqrt.f32 %v52_v20  ;;  %v51_v22 = vmul.f32 0.03125, %v49_v21 }
 0x12e   :  { %v53_v23 = vadd.f32 1e-05, %v51_v22 }
 0x130   :  { %196 = vrsqrt.f32 %v53_v23 }
 0x136   :  { %v195_v24 = vpop.eup %194 }
 0x137   :  { %v56_v25 = vmul.f32 %v195_v24, %v40_v7 }
 0x139   :  { %v65_v28 = vmul.f32 %v166_v26, %v56_v25 }
 0x13a   :  { %v197_v27 = vpop.eup %196 }
 0x13b   :  { %v57_v29 = vmul.f32 %v197_v27, %v41_v11  ;;  %v74_v32 = vadd.f32 %v167_v30, %v65_v28 }
 0x13d   :  { %v66_v31 = vmul.f32 %v166_v26, %v57_v29 }
 0x13f   :  { %v75_v33 = vadd.f32 %v167_v30, %v66_v31 }
 0x141   :  { %v76_v34 = vpack.c.bf16 %v75_v33, %v74_v32 }
 0x143   :  { %77 = vst.msk [vmem:[#allocation2] sm:$0xff] %vm30_vm0, %v76_v34 }
 0x14a   :  { %v78_v35 = vld [vmem:[#allocation2] sm:$0xff] }
 0x14b   :  { %184 = vmatmul.mubr.msk.bf16.vlgmr.msra.gmra.mrb[0].mxu0 %vm30_vm0, %v78_v35 }
 0x21e   :  { %v140_v37 = vpop.f32.mrb[0].mxu0 }
 0x21f   :  { %v141_v38 = vadd.f32 %v168_v36, %v140_v37  ;;  %v185_v39 = vpop.f32.mrb[1].mxu0 }
 0x220   :  { %v143_v40 = vpop.f32.mrb[2].mxu0 }
 0x221   :  { %148 = vst.msk [vmem:[#allocation3] sm:$0xff] %vm147_vm2, %v141_v38  ;;  %v144_v41 = vadd.f32 %v168_v36, %v143_v40  ;;  %v186_v42 = vpop.f32.mrb[3].mxu0 }
 0x223   :  { %149 = vst.msk [vmem:[#allocation3 + $0x8] sm:$0xff] %vm147_vm2, %v144_v41 }
 0x224   :  { %209 = shalt.err (!%p206_p4)
}
 0x225   :  { %s210_s30 = scalar_lea.hbm %s298_s5, 256 }
 0x226   :  { %p211_p5 = scmp.ne.s32.totalorder %s298_s5, %s210_s30  ;;  %p214_p6 = scmp.lt.u32.totalorder %s210_s30, %s298_s5 }
 0x228   :  { %p216_p7 = pnand %p214_p6, %p211_p5 }
 0x22a   :  { %219 = shalt.err (!%p216_p7)
}
 0x22b   :  { %s225_s10 = smov 128   ;;  %s226_s11 = smov 8  }
 0x22c   :  { %161 = dma.vmem_to_hbm [thread:$0]  %s156_s28, 256, %s298_s5, [#allocation4], %s225_s10, %s225_s10, %s226_s11  }
 0x22d   :  { %220 = dma.done.wait [#allocation4], 256  }
 0x22e   :  { %221 = vsyncadd [#allocation4], 4294967040 }
 0x22f   :  { %165 = vsyncpa [#allocation4], 1 }

</bundles_post_ra>
